<compile_context>
chip_gen: v7x
topology: tpu7x:2x2x1
jax: 0.10.0
libtpu: 0.0.40
codegen_flags: <defaults>
</compile_context>

<pallas_src>
import jax
import jax.numpy as jnp
from jax.experimental import pallas as pl
from jax.experimental.pallas import tpu as pltpu


# ----------------------------- fused Pallas kernel ---------------------------

def _fused_lstm_dpcnn_kernel(x_ref, wi_ref, whf_ref, whb_ref, b_ref,
                             wcv_ref, bcv_ref, w1_ref, b1_ref, w2_ref, b2_ref,
                             o_ref, lstm_scr):
    """Bidirectional LSTM -> Conv1d(k3,p1) -> (blocks+1) x [ReLU,Conv,ReLU,Conv,+res]."""
    B, T, D = x_ref.shape
    H = whf_ref.shape[0]           # LSTM hidden size (per direction)
    NB = w1_ref.shape[0]           # number of dpcnn blocks (= blocks + 1)

    x = x_ref[...].astype(jnp.float32)          # [B, T, D]
    wi = wi_ref[...]                            # [D, 8H]  (fwd gates then bwd gates)
    bias = b_ref[...]                           # [1, 8H]  (= b_ih + b_hh per direction)
    whf = whf_ref[...]                          # [H, 4H]
    whb = whb_ref[...]                          # [H, 4H]

    # ---- (1) LSTM input projection hoisted out of the recurrence:
    #      one (T, D) @ (D, 8H = 128 lanes) matmul per batch row.
    gx = jnp.stack(
        [jnp.dot(x[b], wi, preferred_element_type=jnp.float32) for b in range(B)],
        axis=0) + bias                          # [B, T, 8H]

    def lstm_cell(gx_t, h, c, wh):
        # PyTorch gate order: i, f, g, o
        g = gx_t + jnp.dot(h, wh, preferred_element_type=jnp.float32)   # [B, 4H]
        i = jax.nn.sigmoid(g[:, 0 * H:1 * H])
        f = jax.nn.sigmoid(g[:, 1 * H:2 * H])
        gg = jnp.tanh(g[:, 2 * H:3 * H])
        o = jax.nn.sigmoid(g[:, 3 * H:4 * H])
        c_new = f * c + i * gg
        h_new = o * jnp.tanh(c_new)
        return h_new, c_new

    # ---- (2) recurrence: only the small h @ Wh matmul per step; hidden states go to
    #      VMEM scratch and never round-trip through HBM.
    h = jnp.zeros((B, H), jnp.float32)
    c = jnp.zeros((B, H), jnp.float32)
    for t in range(T):                                         # static unroll (T small)
        h, c = lstm_cell(gx[:, t, 0:4 * H], h, c, whf)
        lstm_scr[:, pl.ds(t, 1), pl.ds(0, H)] = h[:, None, :]

    h = jnp.zeros((B, H), jnp.float32)
    c = jnp.zeros((B, H), jnp.float32)
    for t in range(T - 1, -1, -1):                             # backward direction
        h, c = lstm_cell(gx[:, t, 4 * H:8 * H], h, c, whb)
        lstm_scr[:, pl.ds(t, 1), pl.ds(H, H)] = h[:, None, :]

    lstm_out = lstm_scr[...]                                   # [B, T, 2H]

    # ---- (3) Conv1d(kernel=3, padding=1) as im2col + a single K=3*Cin matmul.
    def conv_k3(feat, w, bvec):
        # feat: [T, Cin], w: [3*Cin, Cout] with row index = k*Cin + cin, bvec: [1, Cout]
        cin = feat.shape[1]
        z = jnp.zeros((1, cin), jnp.float32)
        hp = jnp.concatenate([z, feat, z], axis=0)                         # [T+2, Cin]
        im = jnp.concatenate([hp[0:T, :], hp[1:T + 1, :], hp[2:T + 2, :]],
                             axis=1)                                       # [T, 3*Cin]
        return jnp.dot(im, w, preferred_element_type=jnp.float32) + bvec   # [T, Cout]

    wcv = wcv_ref[...]
    bcv = bcv_ref[...]
    blk_w1 = [w1_ref[i] for i in range(NB)]
    blk_b1 = [b1_ref[i] for i in range(NB)]
    blk_w2 = [w2_ref[i] for i in range(NB)]
    blk_b2 = [b2_ref[i] for i in range(NB)]

    feats = []
    for b in range(B):                                         # B is tiny & static
        f_b = conv_k3(lstm_out[b], wcv, bcv)                   # convert_conv
        for blk in range(NB):
            # F.max_pool1d(kernel_size=1, stride=1) between blocks is the identity.
            h1 = conv_k3(jnp.maximum(f_b, 0.0), blk_w1[blk], blk_b1[blk])
            y2 = conv_k3(jnp.maximum(h1, 0.0), blk_w2[blk], blk_b2[blk])
            f_b = y2 + f_b                                     # residual add
        feats.append(f_b)

    # ---- (4) single dense output store [B, T, C]
    o_ref[...] = jnp.stack(feats, axis=0).astype(o_ref.dtype)


def fused_lstm_dpcnn(x, params):
    """Single pallas_call: whole arrays VMEM-resident, no grid, no per-stage launches."""
    B, T, _ = x.shape
    H = params["lstm_wh_f"].shape[0]
    C = params["convert_w"].shape[1]
    return pl.pallas_call(
        _fused_lstm_dpcnn_kernel,
        out_shape=jax.ShapeDtypeStruct((B, T, C), jnp.float32),
        scratch_shapes=[pltpu.VMEM((B, T, 2 * H), jnp.float32)],
    )(x,
      params["lstm_wi"], params["lstm_wh_f"], params["lstm_wh_b"], params["lstm_b"],
      params["convert_w"], params["convert_b"],
      params["blk_w1"], params["blk_b1"], params["blk_w2"], params["blk_b2"])


# ----------------------------- plain-JAX glue --------------------------------
# TODO(synk): ElementEmbedder / StoichiometryEmbedder sources were not provided; the
# embedding gather and sinusoidal fractional-encoder table are the standard CrabNet-style
# versions and are left in plain JAX (a tiny gather has no Pallas win at this size).

def make_frac_pe_table(d_half, resolution=2000):
    x = jnp.linspace(0.0, resolution - 1, resolution)[:, None]          # [R, 1]
    fraction = jnp.linspace(0.0, d_half - 1, d_half)[None, :]           # [1, half]
    fraction = jnp.broadcast_to(fraction, (resolution, d_half))
    pe = jnp.zeros((resolution, d_half), jnp.float32)
    pe = pe.at[:, 0::2].set(jnp.sin(x / jnp.power(50.0, 2 * fraction[:, 0::2] / d_half)))
    pe = pe.at[:, 1::2].set(jnp.cos(x / jnp.power(50.0, 2 * fraction[:, 1::2] / d_half)))
    return pe


def frac_encode(frac, table, resolution, use_log10):
    # Clamp BEFORE the log so a fraction of exactly 0 cannot produce -inf -> inf.
    f = jnp.maximum(frac.astype(jnp.float32), 1.0 / resolution)
    if use_log10:
        f = 0.0025 * (jnp.log2(f)) ** 2
        f = jnp.minimum(f, 1.0)
    f = jnp.maximum(f, 1.0 / resolution)
    idx = jnp.clip(jnp.round(f * resolution).astype(jnp.int32) - 1, 0, resolution - 1)
    return table[idx]                                                   # [B, T, half]


def init_params(key, d_model=32, hidden=16, num_kernels=32, blocks=2, vocab=100):
    assert 2 * hidden == d_model, "bidirectional LSTM output must match conv in-channels"
    keys = iter(jax.random.split(key, 24))

    def nrm(shape, scale=0.1):
        return scale * jax.random.normal(next(keys), shape, jnp.float32)

    p = {}
    p["embed_table"] = nrm((vocab, d_model), 1.0)
    p["emb_scaler"] = jnp.float32(1.0)
    p["pos_scaler"] = jnp.float32(1.0)
    p["pos_scaler_log"] = jnp.float32(1.0)
    d_half = d_model // 2
    p["pe_table"] = make_frac_pe_table(d_half, 2000)
    p["ple_table"] = make_frac_pe_table(d_half, 2000)
    # Bidirectional LSTM, packed for channels-last matmul:
    #   lstm_wi : [D, 8H] = concat(W_ih_fwd^T, W_ih_bwd^T), gate order (i,f,g,o) per dir
    #   lstm_b  : [1, 8H] = concat(b_ih_fwd + b_hh_fwd, b_ih_bwd + b_hh_bwd)  (SUMMED!)
    p["lstm_wi"] = nrm((d_model, 8 * hidden))
    p["lstm_wh_f"] = nrm((hidden, 4 * hidden))
    p["lstm_wh_b"] = nrm((hidden, 4 * hidden))
    p["lstm_b"] = nrm((1, 8 * hidden))
    # im2col conv weights: [3*Cin, Cout], row index = k*Cin + cin
    # (== PyTorch Conv1d weight [Cout, Cin, 3] permuted to [3, Cin, Cout] then reshaped)
    p["convert_w"] = nrm((3 * d_model, num_kernels))
    p["convert_b"] = nrm((1, num_kernels))
    nb = blocks + 1
    p["blk_w1"] = nrm((nb, 3 * num_kernels, num_kernels))
    p["blk_b1"] = nrm((nb, 1, num_kernels))
    p["blk_w2"] = nrm((nb, 3 * num_kernels, num_kernels))
    p["blk_b2"] = nrm((nb, 1, num_kernels))
    return p


def base_model_forward(params, src, frac):
    d_model = params["embed_table"].shape[1]
    B, T = src.shape

    # ElementEmbedder: embedding lookup, scaled by 2**emb_scaler
    x = params["embed_table"][src] * (2.0 ** params["emb_scaler"])

    # _calculate_pe: first half gets pe(frac), second half gets ple(frac)
    pe_scaler = 2.0 ** ((1.0 - params["pos_scaler"]) ** 2)
    ple_scaler = 2.0 ** ((1.0 - params["pos_scaler_log"]) ** 2)
    pe_half = frac_encode(frac, params["pe_table"], 2000, use_log10=False) * pe_scaler
    ple_half = frac_encode(frac, params["ple_table"], 2000, use_log10=True) * ple_scaler
    zeros_half = jnp.zeros((B, T, d_model // 2), x.dtype)
    x_src = (x + jnp.concatenate([pe_half, zeros_half], axis=-1)
               + jnp.concatenate([zeros_half, ple_half], axis=-1))

    # multi_lstm_dpcnnmodify: entire hot path in ONE fused Pallas kernel.
    return fused_lstm_dpcnn(x_src.astype(jnp.float32), params)
    # output: [B, T, num_kernels] == conv_features.permute(0, 2, 1)


if __name__ == "__main__":
    key = jax.random.PRNGKey(0)
    kp, ks, kf = jax.random.split(key, 3)
    B, T = 2, 8
    d_model, hidden, num_kernels = 32, 16, 32
    params = init_params(kp, d_model=d_model, hidden=hidden, num_kernels=num_kernels)

    src = jax.random.randint(ks, (B, T), 1, 100)                       # element indices
    frac = jax.nn.softmax(jax.random.normal(kf, (B, T)), axis=-1)      # positive fractions

    forward = jax.jit(base_model_forward)
    out = forward(params, src, frac)
    out = jax.block_until_ready(out)
    assert out.shape == (B, T, num_kernels), out.shape
    assert bool(jnp.all(jnp.isfinite(out)))
    print("KERNEL_OK")
</pallas_src>

<mosaic_0001>
module attributes {stable_mosaic.version = 11 : i64} {
  func.func @_fused_lstm_dpcnn_kernel(%arg0: memref<2x8x32xf32, #tpu.memory_space<vmem>>, %arg1: memref<32x128xf32, #tpu.memory_space<vmem>>, %arg2: memref<16x64xf32, #tpu.memory_space<vmem>>, %arg3: memref<16x64xf32, #tpu.memory_space<vmem>>, %arg4: memref<1x128xf32, #tpu.memory_space<vmem>>, %arg5: memref<96x32xf32, #tpu.memory_space<vmem>>, %arg6: memref<1x32xf32, #tpu.memory_space<vmem>>, %arg7: memref<3x96x32xf32, #tpu.memory_space<vmem>>, %arg8: memref<3x1x32xf32, #tpu.memory_space<vmem>>, %arg9: memref<3x96x32xf32, #tpu.memory_space<vmem>>, %arg10: memref<3x1x32xf32, #tpu.memory_space<vmem>>, %arg11: memref<2x8x32xf32, #tpu.memory_space<vmem>>, %arg12: memref<2x8x32xf32, #tpu.memory_space<vmem>>) attributes {dimension_semantics = [], scalar_prefetch = 0 : i64, scratch_operands = 1 : i64, tpu.core_type = #tpu.core_type<tc>} {
    %c0 = arith.constant 0 : index
    %c0_0 = arith.constant 0 : index
    %c0_1 = arith.constant 0 : index
    %0 = vector.load %arg0[%c0, %c0_0, %c0_1] : memref<2x8x32xf32, #tpu.memory_space<vmem>>, vector<2x8x32xf32>
    %c0_2 = arith.constant 0 : index
    %c0_3 = arith.constant 0 : index
    %1 = vector.load %arg1[%c0_2, %c0_3] : memref<32x128xf32, #tpu.memory_space<vmem>>, vector<32x128xf32>
    %c0_4 = arith.constant 0 : index
    %c0_5 = arith.constant 0 : index
    %2 = vector.load %arg4[%c0_4, %c0_5] : memref<1x128xf32, #tpu.memory_space<vmem>>, vector<1x128xf32>
    %c0_6 = arith.constant 0 : index
    %c0_7 = arith.constant 0 : index
    %3 = vector.load %arg2[%c0_6, %c0_7] : memref<16x64xf32, #tpu.memory_space<vmem>>, vector<16x64xf32>
    %c0_8 = arith.constant 0 : index
    %c0_9 = arith.constant 0 : index
    %4 = vector.load %arg3[%c0_8, %c0_9] : memref<16x64xf32, #tpu.memory_space<vmem>>, vector<16x64xf32>
    %5 = vector.extract_strided_slice %0 {offsets = [0, 0, 0], sizes = [1, 8, 32], strides = [1, 1, 1]} : vector<2x8x32xf32> to vector<1x8x32xf32>
    %6 = vector.shape_cast %5 : vector<1x8x32xf32> to vector<8x32xf32>
    %cst = arith.constant dense<0.000000e+00> : vector<8x128xf32>
    %7 = tpu.matmul %6, %1, %cst {dimension_numbers = #tpu.dot_dimension_numbers<[1], [0], [0], [1], [0, 0, 1, 1], [], []>} : vector<8x32xf32>, vector<32x128xf32>, vector<8x128xf32> -> vector<8x128xf32>
    %8 = vector.extract_strided_slice %0 {offsets = [1, 0, 0], sizes = [1, 8, 32], strides = [1, 1, 1]} : vector<2x8x32xf32> to vector<1x8x32xf32>
    %9 = vector.shape_cast %8 : vector<1x8x32xf32> to vector<8x32xf32>
    %cst_10 = arith.constant dense<0.000000e+00> : vector<8x128xf32>
    %10 = tpu.matmul %9, %1, %cst_10 {dimension_numbers = #tpu.dot_dimension_numbers<[1], [0], [0], [1], [0, 0, 1, 1], [], []>} : vector<8x32xf32>, vector<32x128xf32>, vector<8x128xf32> -> vector<8x128xf32>
    %11 = vector.shape_cast %7 : vector<8x128xf32> to vector<1x8x128xf32>
    %12 = vector.shape_cast %10 : vector<8x128xf32> to vector<1x8x128xf32>
    %13 = tpu.concatenate %11, %12 in 0 : vector<1x8x128xf32>, vector<1x8x128xf32> -> vector<2x8x128xf32>
    %14 = vector.shape_cast %2 : vector<1x128xf32> to vector<1x1x128xf32>
    %15 = vector.broadcast %14 : vector<1x1x128xf32> to vector<2x8x128xf32>
    %16 = arith.addf %13, %15 : vector<2x8x128xf32>
    %cst_11 = arith.constant 0.000000e+00 : f32
    %17 = vector.broadcast %cst_11 : f32 to vector<2x16xf32>
    %cst_12 = arith.constant 0.000000e+00 : f32
    %18 = vector.broadcast %cst_12 : f32 to vector<2x16xf32>
    %19 = vector.extract_strided_slice %16 {offsets = [0, 0, 0], sizes = [2, 1, 64], strides = [1, 1, 1]} : vector<2x8x128xf32> to vector<2x1x64xf32>
    %20 = vector.shape_cast %19 : vector<2x1x64xf32> to vector<2x64xf32>
    %cst_13 = arith.constant dense<0.000000e+00> : vector<2x64xf32>
    %21 = tpu.matmul %17, %3, %cst_13 {dimension_numbers = #tpu.dot_dimension_numbers<[1], [0], [0], [1], [0, 0, 1, 1], [], []>} : vector<2x16xf32>, vector<16x64xf32>, vector<2x64xf32> -> vector<2x64xf32>
    %22 = arith.addf %20, %21 : vector<2x64xf32>
    %23 = vector.extract_strided_slice %22 {offsets = [0, 0], sizes = [2, 16], strides = [1, 1]} : vector<2x64xf32> to vector<2x16xf32>
    %24 = arith.negf %23 : vector<2x16xf32>
    %25 = math.exp %24 : vector<2x16xf32>
    %cst_14 = arith.constant 1.000000e+00 : f32
    %26 = vector.broadcast %cst_14 : f32 to vector<2x16xf32>
    %27 = arith.addf %26, %25 : vector<2x16xf32>
    %28 = arith.divf %26, %27 : vector<2x16xf32>
    %29 = vector.extract_strided_slice %22 {offsets = [0, 16], sizes = [2, 16], strides = [1, 1]} : vector<2x64xf32> to vector<2x16xf32>
    %30 = arith.negf %29 : vector<2x16xf32>
    %31 = math.exp %30 : vector<2x16xf32>
    %cst_15 = arith.constant 1.000000e+00 : f32
    %32 = vector.broadcast %cst_15 : f32 to vector<2x16xf32>
    %33 = arith.addf %32, %31 : vector<2x16xf32>
    %34 = arith.divf %32, %33 : vector<2x16xf32>
    %35 = vector.extract_strided_slice %22 {offsets = [0, 32], sizes = [2, 16], strides = [1, 1]} : vector<2x64xf32> to vector<2x16xf32>
    %36 = math.tanh %35 : vector<2x16xf32>
    %37 = vector.extract_strided_slice %22 {offsets = [0, 48], sizes = [2, 16], strides = [1, 1]} : vector<2x64xf32> to vector<2x16xf32>
    %38 = arith.negf %37 : vector<2x16xf32>
    %39 = math.exp %38 : vector<2x16xf32>
    %cst_16 = arith.constant 1.000000e+00 : f32
    %40 = vector.broadcast %cst_16 : f32 to vector<2x16xf32>
    %41 = arith.addf %40, %39 : vector<2x16xf32>
    %42 = arith.divf %40, %41 : vector<2x16xf32>
    %43 = arith.mulf %34, %18 : vector<2x16xf32>
    %44 = arith.mulf %28, %36 : vector<2x16xf32>
    %45 = arith.addf %43, %44 : vector<2x16xf32>
    %46 = math.tanh %45 : vector<2x16xf32>
    %47 = arith.mulf %42, %46 : vector<2x16xf32>
    %48 = vector.shape_cast %47 : vector<2x16xf32> to vector<2x1x16xf32>
    %c0_17 = arith.constant 0 : index
    %c0_18 = arith.constant 0 : index
    %c0_19 = arith.constant 0 : index
    %49 = vector.load %arg12[%c0_17, %c0_18, %c0_19] : memref<2x8x32xf32, #tpu.memory_space<vmem>>, vector<2x1x16xf32>
    tpu.vector_store %arg12[%c0_17, %c0_18, %c0_19], %48 {strides = array<i32>} : memref<2x8x32xf32, #tpu.memory_space<vmem>>, vector<2x1x16xf32>,
    %50 = vector.extract_strided_slice %16 {offsets = [0, 1, 0], sizes = [2, 1, 64], strides = [1, 1, 1]} : vector<2x8x128xf32> to vector<2x1x64xf32>
    %51 = vector.shape_cast %50 : vector<2x1x64xf32> to vector<2x64xf32>
    %cst_20 = arith.constant dense<0.000000e+00> : vector<2x64xf32>
    %52 = tpu.matmul %47, %3, %cst_20 {dimension_numbers = #tpu.dot_dimension_numbers<[1], [0], [0], [1], [0, 0, 1, 1], [], []>} : vector<2x16xf32>, vector<16x64xf32>, vector<2x64xf32> -> vector<2x64xf32>
    %53 = arith.addf %51, %52 : vector<2x64xf32>
    %54 = vector.extract_strided_slice %53 {offsets = [0, 0], sizes = [2, 16], strides = [1, 1]} : vector<2x64xf32> to vector<2x16xf32>
    %55 = arith.negf %54 : vector<2x16xf32>
    %56 = math.exp %55 : vector<2x16xf32>
    %cst_21 = arith.constant 1.000000e+00 : f32
    %57 = vector.broadcast %cst_21 : f32 to vector<2x16xf32>
    %58 = arith.addf %57, %56 : vector<2x16xf32>
    %59 = arith.divf %57, %58 : vector<2x16xf32>
    %60 = vector.extract_strided_slice %53 {offsets = [0, 16], sizes = [2, 16], strides = [1, 1]} : vector<2x64xf32> to vector<2x16xf32>
    %61 = arith.negf %60 : vector<2x16xf32>
    %62 = math.exp %61 : vector<2x16xf32>
    %cst_22 = arith.constant 1.000000e+00 : f32
    %63 = vector.broadcast %cst_22 : f32 to vector<2x16xf32>
    %64 = arith.addf %63, %62 : vector<2x16xf32>
    %65 = arith.divf %63, %64 : vector<2x16xf32>
    %66 = vector.extract_strided_slice %53 {offsets = [0, 32], sizes = [2, 16], strides = [1, 1]} : vector<2x64xf32> to vector<2x16xf32>
    %67 = math.tanh %66 : vector<2x16xf32>
    %68 = vector.extract_strided_slice %53 {offsets = [0, 48], sizes = [2, 16], strides = [1, 1]} : vector<2x64xf32> to vector<2x16xf32>
    %69 = arith.negf %68 : vector<2x16xf32>
    %70 = math.exp %69 : vector<2x16xf32>
    %cst_23 = arith.constant 1.000000e+00 : f32
    %71 = vector.broadcast %cst_23 : f32 to vector<2x16xf32>
    %72 = arith.addf %71, %70 : vector<2x16xf32>
    %73 = arith.divf %71, %72 : vector<2x16xf32>
    %74 = arith.mulf %65, %45 : vector<2x16xf32>
    %75 = arith.mulf %59, %67 : vector<2x16xf32>
    %76 = arith.addf %74, %75 : vector<2x16xf32>
    %77 = math.tanh %76 : vector<2x16xf32>
    %78 = arith.mulf %73, %77 : vector<2x16xf32>
    %79 = vector.shape_cast %78 : vector<2x16xf32> to vector<2x1x16xf32>
    %c0_24 = arith.constant 0 : index
    %c1 = arith.constant 1 : index
    %c0_25 = arith.constant 0 : index
    %80 = vector.load %arg12[%c0_24, %c1, %c0_25] : memref<2x8x32xf32, #tpu.memory_space<vmem>>, vector<2x1x16xf32>
    tpu.vector_store %arg12[%c0_24, %c1, %c0_25], %79 {strides = array<i32>} : memref<2x8x32xf32, #tpu.memory_space<vmem>>, vector<2x1x16xf32>,
    %81 = vector.extract_strided_slice %16 {offsets = [0, 2, 0], sizes = [2, 1, 64], strides = [1, 1, 1]} : vector<2x8x128xf32> to vector<2x1x64xf32>
    %82 = vector.shape_cast %81 : vector<2x1x64xf32> to vector<2x64xf32>
    %cst_26 = arith.constant dense<0.000000e+00> : vector<2x64xf32>
    %83 = tpu.matmul %78, %3, %cst_26 {dimension_numbers = #tpu.dot_dimension_numbers<[1], [0], [0], [1], [0, 0, 1, 1], [], []>} : vector<2x16xf32>, vector<16x64xf32>, vector<2x64xf32> -> vector<2x64xf32>
    %84 = arith.addf %82, %83 : vector<2x64xf32>
    %85 = vector.extract_strided_slice %84 {offsets = [0, 0], sizes = [2, 16], strides = [1, 1]} : vector<2x64xf32> to vector<2x16xf32>
    %86 = arith.negf %85 : vector<2x16xf32>
    %87 = math.exp %86 : vector<2x16xf32>
    %cst_27 = arith.constant 1.000000e+00 : f32
    %88 = vector.broadcast %cst_27 : f32 to vector<2x16xf32>
    %89 = arith.addf %88, %87 : vector<2x16xf32>
    %90 = arith.divf %88, %89 : vector<2x16xf32>
    %91 = vector.extract_strided_slice %84 {offsets = [0, 16], sizes = [2, 16], strides = [1, 1]} : vector<2x64xf32> to vector<2x16xf32>
    %92 = arith.negf %91 : vector<2x16xf32>
    %93 = math.exp %92 : vector<2x16xf32>
    %cst_28 = arith.constant 1.000000e+00 : f32
    %94 = vector.broadcast %cst_28 : f32 to vector<2x16xf32>
    %95 = arith.addf %94, %93 : vector<2x16xf32>
    %96 = arith.divf %94, %95 : vector<2x16xf32>
    %97 = vector.extract_strided_slice %84 {offsets = [0, 32], sizes = [2, 16], strides = [1, 1]} : vector<2x64xf32> to vector<2x16xf32>
    %98 = math.tanh %97 : vector<2x16xf32>
    %99 = vector.extract_strided_slice %84 {offsets = [0, 48], sizes = [2, 16], strides = [1, 1]} : vector<2x64xf32> to vector<2x16xf32>
    %100 = arith.negf %99 : vector<2x16xf32>
    %101 = math.exp %100 : vector<2x16xf32>
    %cst_29 = arith.constant 1.000000e+00 : f32
    %102 = vector.broadcast %cst_29 : f32 to vector<2x16xf32>
    %103 = arith.addf %102, %101 : vector<2x16xf32>
    %104 = arith.divf %102, %103 : vector<2x16xf32>
    %105 = arith.mulf %96, %76 : vector<2x16xf32>
    %106 = arith.mulf %90, %98 : vector<2x16xf32>
    %107 = arith.addf %105, %106 : vector<2x16xf32>
    %108 = math.tanh %107 : vector<2x16xf32>
    %109 = arith.mulf %104, %108 : vector<2x16xf32>
    %110 = vector.shape_cast %109 : vector<2x16xf32> to vector<2x1x16xf32>
    %c0_30 = arith.constant 0 : index
    %c2 = arith.constant 2 : index
    %c0_31 = arith.constant 0 : index
    %111 = vector.load %arg12[%c0_30, %c2, %c0_31] : memref<2x8x32xf32, #tpu.memory_space<vmem>>, vector<2x1x16xf32>
    tpu.vector_store %arg12[%c0_30, %c2, %c0_31], %110 {strides = array<i32>} : memref<2x8x32xf32, #tpu.memory_space<vmem>>, vector<2x1x16xf32>,
    %112 = vector.extract_strided_slice %16 {offsets = [0, 3, 0], sizes = [2, 1, 64], strides = [1, 1, 1]} : vector<2x8x128xf32> to vector<2x1x64xf32>
    %113 = vector.shape_cast %112 : vector<2x1x64xf32> to vector<2x64xf32>
    %cst_32 = arith.constant dense<0.000000e+00> : vector<2x64xf32>
    %114 = tpu.matmul %109, %3, %cst_32 {dimension_numbers = #tpu.dot_dimension_numbers<[1], [0], [0], [1], [0, 0, 1, 1], [], []>} : vector<2x16xf32>, vector<16x64xf32>, vector<2x64xf32> -> vector<2x64xf32>
    %115 = arith.addf %113, %114 : vector<2x64xf32>
    %116 = vector.extract_strided_slice %115 {offsets = [0, 0], sizes = [2, 16], strides = [1, 1]} : vector<2x64xf32> to vector<2x16xf32>
    %117 = arith.negf %116 : vector<2x16xf32>
    %118 = math.exp %117 : vector<2x16xf32>
    %cst_33 = arith.constant 1.000000e+00 : f32
    %119 = vector.broadcast %cst_33 : f32 to vector<2x16xf32>
    %120 = arith.addf %119, %118 : vector<2x16xf32>
    %121 = arith.divf %119, %120 : vector<2x16xf32>
    %122 = vector.extract_strided_slice %115 {offsets = [0, 16], sizes = [2, 16], strides = [1, 1]} : vector<2x64xf32> to vector<2x16xf32>
    %123 = arith.negf %122 : vector<2x16xf32>
    %124 = math.exp %123 : vector<2x16xf32>
    %cst_34 = arith.constant 1.000000e+00 : f32
    %125 = vector.broadcast %cst_34 : f32 to vector<2x16xf32>
    %126 = arith.addf %125, %124 : vector<2x16xf32>
    %127 = arith.divf %125, %126 : vector<2x16xf32>
    %128 = vector.extract_strided_slice %115 {offsets = [0, 32], sizes = [2, 16], strides = [1, 1]} : vector<2x64xf32> to vector<2x16xf32>
    %129 = math.tanh %128 : vector<2x16xf32>
    %130 = vector.extract_strided_slice %115 {offsets = [0, 48], sizes = [2, 16], strides = [1, 1]} : vector<2x64xf32> to vector<2x16xf32>
    %131 = arith.negf %130 : vector<2x16xf32>
    %132 = math.exp %131 : vector<2x16xf32>
    %cst_35 = arith.constant 1.000000e+00 : f32
    %133 = vector.broadcast %cst_35 : f32 to vector<2x16xf32>
    %134 = arith.addf %133, %132 : vector<2x16xf32>
    %135 = arith.divf %133, %134 : vector<2x16xf32>
    %136 = arith.mulf %127, %107 : vector<2x16xf32>
    %137 = arith.mulf %121, %129 : vector<2x16xf32>
    %138 = arith.addf %136, %137 : vector<2x16xf32>
    %139 = math.tanh %138 : vector<2x16xf32>
    %140 = arith.mulf %135, %139 : vector<2x16xf32>
    %141 = vector.shape_cast %140 : vector<2x16xf32> to vector<2x1x16xf32>
    %c0_36 = arith.constant 0 : index
    %c3 = arith.constant 3 : index
    %c0_37 = arith.constant 0 : index
    %142 = vector.load %arg12[%c0_36, %c3, %c0_37] : memref<2x8x32xf32, #tpu.memory_space<vmem>>, vector<2x1x16xf32>
    tpu.vector_store %arg12[%c0_36, %c3, %c0_37], %141 {strides = array<i32>} : memref<2x8x32xf32, #tpu.memory_space<vmem>>, vector<2x1x16xf32>,
    %143 = vector.extract_strided_slice %16 {offsets = [0, 4, 0], sizes = [2, 1, 64], strides = [1, 1, 1]} : vector<2x8x128xf32> to vector<2x1x64xf32>
    %144 = vector.shape_cast %143 : vector<2x1x64xf32> to vector<2x64xf32>
    %cst_38 = arith.constant dense<0.000000e+00> : vector<2x64xf32>
    %145 = tpu.matmul %140, %3, %cst_38 {dimension_numbers = #tpu.dot_dimension_numbers<[1], [0], [0], [1], [0, 0, 1, 1], [], []>} : vector<2x16xf32>, vector<16x64xf32>, vector<2x64xf32> -> vector<2x64xf32>
    %146 = arith.addf %144, %145 : vector<2x64xf32>
    %147 = vector.extract_strided_slice %146 {offsets = [0, 0], sizes = [2, 16], strides = [1, 1]} : vector<2x64xf32> to vector<2x16xf32>
    %148 = arith.negf %147 : vector<2x16xf32>
    %149 = math.exp %148 : vector<2x16xf32>
    %cst_39 = arith.constant 1.000000e+00 : f32
    %150 = vector.broadcast %cst_39 : f32 to vector<2x16xf32>
    %151 = arith.addf %150, %149 : vector<2x16xf32>
    %152 = arith.divf %150, %151 : vector<2x16xf32>
    %153 = vector.extract_strided_slice %146 {offsets = [0, 16], sizes = [2, 16], strides = [1, 1]} : vector<2x64xf32> to vector<2x16xf32>
    %154 = arith.negf %153 : vector<2x16xf32>
    %155 = math.exp %154 : vector<2x16xf32>
    %cst_40 = arith.constant 1.000000e+00 : f32
    %156 = vector.broadcast %cst_40 : f32 to vector<2x16xf32>
    %157 = arith.addf %156, %155 : vector<2x16xf32>
    %158 = arith.divf %156, %157 : vector<2x16xf32>
    %159 = vector.extract_strided_slice %146 {offsets = [0, 32], sizes = [2, 16], strides = [1, 1]} : vector<2x64xf32> to vector<2x16xf32>
    %160 = math.tanh %159 : vector<2x16xf32>
    %161 = vector.extract_strided_slice %146 {offsets = [0, 48], sizes = [2, 16], strides = [1, 1]} : vector<2x64xf32> to vector<2x16xf32>
    %162 = arith.negf %161 : vector<2x16xf32>
    %163 = math.exp %162 : vector<2x16xf32>
    %cst_41 = arith.constant 1.000000e+00 : f32
    %164 = vector.broadcast %cst_41 : f32 to vector<2x16xf32>
    %165 = arith.addf %164, %163 : vector<2x16xf32>
    %166 = arith.divf %164, %165 : vector<2x16xf32>
    %167 = arith.mulf %158, %138 : vector<2x16xf32>
    %168 = arith.mulf %152, %160 : vector<2x16xf32>
    %169 = arith.addf %167, %168 : vector<2x16xf32>
    %170 = math.tanh %169 : vector<2x16xf32>
    %171 = arith.mulf %166, %170 : vector<2x16xf32>
    %172 = vector.shape_cast %171 : vector<2x16xf32> to vector<2x1x16xf32>
    %c0_42 = arith.constant 0 : index
    %c4 = arith.constant 4 : index
    %c0_43 = arith.constant 0 : index
    %173 = vector.load %arg12[%c0_42, %c4, %c0_43] : memref<2x8x32xf32, #tpu.memory_space<vmem>>, vector<2x1x16xf32>
    tpu.vector_store %arg12[%c0_42, %c4, %c0_43], %172 {strides = array<i32>} : memref<2x8x32xf32, #tpu.memory_space<vmem>>, vector<2x1x16xf32>,
    %174 = vector.extract_strided_slice %16 {offsets = [0, 5, 0], sizes = [2, 1, 64], strides = [1, 1, 1]} : vector<2x8x128xf32> to vector<2x1x64xf32>
    %175 = vector.shape_cast %174 : vector<2x1x64xf32> to vector<2x64xf32>
    %cst_44 = arith.constant dense<0.000000e+00> : vector<2x64xf32>
    %176 = tpu.matmul %171, %3, %cst_44 {dimension_numbers = #tpu.dot_dimension_numbers<[1], [0], [0], [1], [0, 0, 1, 1], [], []>} : vector<2x16xf32>, vector<16x64xf32>, vector<2x64xf32> -> vector<2x64xf32>
    %177 = arith.addf %175, %176 : vector<2x64xf32>
    %178 = vector.extract_strided_slice %177 {offsets = [0, 0], sizes = [2, 16], strides = [1, 1]} : vector<2x64xf32> to vector<2x16xf32>
    %179 = arith.negf %178 : vector<2x16xf32>
    %180 = math.exp %179 : vector<2x16xf32>
    %cst_45 = arith.constant 1.000000e+00 : f32
    %181 = vector.broadcast %cst_45 : f32 to vector<2x16xf32>
    %182 = arith.addf %181, %180 : vector<2x16xf32>
    %183 = arith.divf %181, %182 : vector<2x16xf32>
    %184 = vector.extract_strided_slice %177 {offsets = [0, 16], sizes = [2, 16], strides = [1, 1]} : vector<2x64xf32> to vector<2x16xf32>
    %185 = arith.negf %184 : vector<2x16xf32>
    %186 = math.exp %185 : vector<2x16xf32>
    %cst_46 = arith.constant 1.000000e+00 : f32
    %187 = vector.broadcast %cst_46 : f32 to vector<2x16xf32>
    %188 = arith.addf %187, %186 : vector<2x16xf32>
    %189 = arith.divf %187, %188 : vector<2x16xf32>
    %190 = vector.extract_strided_slice %177 {offsets = [0, 32], sizes = [2, 16], strides = [1, 1]} : vector<2x64xf32> to vector<2x16xf32>
    %191 = math.tanh %190 : vector<2x16xf32>
    %192 = vector.extract_strided_slice %177 {offsets = [0, 48], sizes = [2, 16], strides = [1, 1]} : vector<2x64xf32> to vector<2x16xf32>
    %193 = arith.negf %192 : vector<2x16xf32>
    %194 = math.exp %193 : vector<2x16xf32>
    %cst_47 = arith.constant 1.000000e+00 : f32
    %195 = vector.broadcast %cst_47 : f32 to vector<2x16xf32>
    %196 = arith.addf %195, %194 : vector<2x16xf32>
    %197 = arith.divf %195, %196 : vector<2x16xf32>
    %198 = arith.mulf %189, %169 : vector<2x16xf32>
    %199 = arith.mulf %183, %191 : vector<2x16xf32>
    %200 = arith.addf %198, %199 : vector<2x16xf32>
    %201 = math.tanh %200 : vector<2x16xf32>
    %202 = arith.mulf %197, %201 : vector<2x16xf32>
    %203 = vector.shape_cast %202 : vector<2x16xf32> to vector<2x1x16xf32>
    %c0_48 = arith.constant 0 : index
    %c5 = arith.constant 5 : index
    %c0_49 = arith.constant 0 : index
    %204 = vector.load %arg12[%c0_48, %c5, %c0_49] : memref<2x8x32xf32, #tpu.memory_space<vmem>>, vector<2x1x16xf32>
    tpu.vector_store %arg12[%c0_48, %c5, %c0_49], %203 {strides = array<i32>} : memref<2x8x32xf32, #tpu.memory_space<vmem>>, vector<2x1x16xf32>,
    %205 = vector.extract_strided_slice %16 {offsets = [0, 6, 0], sizes = [2, 1, 64], strides = [1, 1, 1]} : vector<2x8x128xf32> to vector<2x1x64xf32>
    %206 = vector.shape_cast %205 : vector<2x1x64xf32> to vector<2x64xf32>
    %cst_50 = arith.constant dense<0.000000e+00> : vector<2x64xf32>
    %207 = tpu.matmul %202, %3, %cst_50 {dimension_numbers = #tpu.dot_dimension_numbers<[1], [0], [0], [1], [0, 0, 1, 1], [], []>} : vector<2x16xf32>, vector<16x64xf32>, vector<2x64xf32> -> vector<2x64xf32>
    %208 = arith.addf %206, %207 : vector<2x64xf32>
    %209 = vector.extract_strided_slice %208 {offsets = [0, 0], sizes = [2, 16], strides = [1, 1]} : vector<2x64xf32> to vector<2x16xf32>
    %210 = arith.negf %209 : vector<2x16xf32>
    %211 = math.exp %210 : vector<2x16xf32>
    %cst_51 = arith.constant 1.000000e+00 : f32
    %212 = vector.broadcast %cst_51 : f32 to vector<2x16xf32>
    %213 = arith.addf %212, %211 : vector<2x16xf32>
    %214 = arith.divf %212, %213 : vector<2x16xf32>
    %215 = vector.extract_strided_slice %208 {offsets = [0, 16], sizes = [2, 16], strides = [1, 1]} : vector<2x64xf32> to vector<2x16xf32>
    %216 = arith.negf %215 : vector<2x16xf32>
    %217 = math.exp %216 : vector<2x16xf32>
    %cst_52 = arith.constant 1.000000e+00 : f32
    %218 = vector.broadcast %cst_52 : f32 to vector<2x16xf32>
    %219 = arith.addf %218, %217 : vector<2x16xf32>
    %220 = arith.divf %218, %219 : vector<2x16xf32>
    %221 = vector.extract_strided_slice %208 {offsets = [0, 32], sizes = [2, 16], strides = [1, 1]} : vector<2x64xf32> to vector<2x16xf32>
    %222 = math.tanh %221 : vector<2x16xf32>
    %223 = vector.extract_strided_slice %208 {offsets = [0, 48], sizes = [2, 16], strides = [1, 1]} : vector<2x64xf32> to vector<2x16xf32>
    %224 = arith.negf %223 : vector<2x16xf32>
    %225 = math.exp %224 : vector<2x16xf32>
    %cst_53 = arith.constant 1.000000e+00 : f32
    %226 = vector.broadcast %cst_53 : f32 to vector<2x16xf32>
    %227 = arith.addf %226, %225 : vector<2x16xf32>
    %228 = arith.divf %226, %227 : vector<2x16xf32>
    %229 = arith.mulf %220, %200 : vector<2x16xf32>
    %230 = arith.mulf %214, %222 : vector<2x16xf32>
    %231 = arith.addf %229, %230 : vector<2x16xf32>
    %232 = math.tanh %231 : vector<2x16xf32>
    %233 = arith.mulf %228, %232 : vector<2x16xf32>
    %234 = vector.shape_cast %233 : vector<2x16xf32> to vector<2x1x16xf32>
    %c0_54 = arith.constant 0 : index
    %c6 = arith.constant 6 : index
    %c0_55 = arith.constant 0 : index
    %235 = vector.load %arg12[%c0_54, %c6, %c0_55] : memref<2x8x32xf32, #tpu.memory_space<vmem>>, vector<2x1x16xf32>
    tpu.vector_store %arg12[%c0_54, %c6, %c0_55], %234 {strides = array<i32>} : memref<2x8x32xf32, #tpu.memory_space<vmem>>, vector<2x1x16xf32>,
    %236 = vector.extract_strided_slice %16 {offsets = [0, 7, 0], sizes = [2, 1, 64], strides = [1, 1, 1]} : vector<2x8x128xf32> to vector<2x1x64xf32>
    %237 = vector.shape_cast %236 : vector<2x1x64xf32> to vector<2x64xf32>
    %cst_56 = arith.constant dense<0.000000e+00> : vector<2x64xf32>
    %238 = tpu.matmul %233, %3, %cst_56 {dimension_numbers = #tpu.dot_dimension_numbers<[1], [0], [0], [1], [0, 0, 1, 1], [], []>} : vector<2x16xf32>, vector<16x64xf32>, vector<2x64xf32> -> vector<2x64xf32>
    %239 = arith.addf %237, %238 : vector<2x64xf32>
    %240 = vector.extract_strided_slice %239 {offsets = [0, 0], sizes = [2, 16], strides = [1, 1]} : vector<2x64xf32> to vector<2x16xf32>
    %241 = arith.negf %240 : vector<2x16xf32>
    %242 = math.exp %241 : vector<2x16xf32>
    %cst_57 = arith.constant 1.000000e+00 : f32
    %243 = vector.broadcast %cst_57 : f32 to vector<2x16xf32>
    %244 = arith.addf %243, %242 : vector<2x16xf32>
    %245 = arith.divf %243, %244 : vector<2x16xf32>
    %246 = vector.extract_strided_slice %239 {offsets = [0, 16], sizes = [2, 16], strides = [1, 1]} : vector<2x64xf32> to vector<2x16xf32>
    %247 = arith.negf %246 : vector<2x16xf32>
    %248 = math.exp %247 : vector<2x16xf32>
    %cst_58 = arith.constant 1.000000e+00 : f32
    %249 = vector.broadcast %cst_58 : f32 to vector<2x16xf32>
    %250 = arith.addf %249, %248 : vector<2x16xf32>
    %251 = arith.divf %249, %250 : vector<2x16xf32>
    %252 = vector.extract_strided_slice %239 {offsets = [0, 32], sizes = [2, 16], strides = [1, 1]} : vector<2x64xf32> to vector<2x16xf32>
    %253 = math.tanh %252 : vector<2x16xf32>
    %254 = vector.extract_strided_slice %239 {offsets = [0, 48], sizes = [2, 16], strides = [1, 1]} : vector<2x64xf32> to vector<2x16xf32>
    %255 = arith.negf %254 : vector<2x16xf32>
    %256 = math.exp %255 : vector<2x16xf32>
    %cst_59 = arith.constant 1.000000e+00 : f32
    %257 = vector.broadcast %cst_59 : f32 to vector<2x16xf32>
    %258 = arith.addf %257, %256 : vector<2x16xf32>
    %259 = arith.divf %257, %258 : vector<2x16xf32>
    %260 = arith.mulf %251, %231 : vector<2x16xf32>
    %261 = arith.mulf %245, %253 : vector<2x16xf32>
    %262 = arith.addf %260, %261 : vector<2x16xf32>
    %263 = math.tanh %262 : vector<2x16xf32>
    %264 = arith.mulf %259, %263 : vector<2x16xf32>
    %265 = vector.shape_cast %264 : vector<2x16xf32> to vector<2x1x16xf32>
    %c0_60 = arith.constant 0 : index
    %c7 = arith.constant 7 : index
    %c0_61 = arith.constant 0 : index
    %266 = vector.load %arg12[%c0_60, %c7, %c0_61] : memref<2x8x32xf32, #tpu.memory_space<vmem>>, vector<2x1x16xf32>
    tpu.vector_store %arg12[%c0_60, %c7, %c0_61], %265 {strides = array<i32>} : memref<2x8x32xf32, #tpu.memory_space<vmem>>, vector<2x1x16xf32>,
    %cst_62 = arith.constant 0.000000e+00 : f32
    %267 = vector.broadcast %cst_62 : f32 to vector<2x16xf32>
    %cst_63 = arith.constant 0.000000e+00 : f32
    %268 = vector.broadcast %cst_63 : f32 to vector<2x16xf32>
    %269 = vector.extract_strided_slice %16 {offsets = [0, 7, 64], sizes = [2, 1, 64], strides = [1, 1, 1]} : vector<2x8x128xf32> to vector<2x1x64xf32>
    %270 = vector.shape_cast %269 : vector<2x1x64xf32> to vector<2x64xf32>
    %cst_64 = arith.constant dense<0.000000e+00> : vector<2x64xf32>
    %271 = tpu.matmul %267, %4, %cst_64 {dimension_numbers = #tpu.dot_dimension_numbers<[1], [0], [0], [1], [0, 0, 1, 1], [], []>} : vector<2x16xf32>, vector<16x64xf32>, vector<2x64xf32> -> vector<2x64xf32>
    %272 = arith.addf %270, %271 : vector<2x64xf32>
    %273 = vector.extract_strided_slice %272 {offsets = [0, 0], sizes = [2, 16], strides = [1, 1]} : vector<2x64xf32> to vector<2x16xf32>
    %274 = arith.negf %273 : vector<2x16xf32>
    %275 = math.exp %274 : vector<2x16xf32>
    %cst_65 = arith.constant 1.000000e+00 : f32
    %276 = vector.broadcast %cst_65 : f32 to vector<2x16xf32>
    %277 = arith.addf %276, %275 : vector<2x16xf32>
    %278 = arith.divf %276, %277 : vector<2x16xf32>
    %279 = vector.extract_strided_slice %272 {offsets = [0, 16], sizes = [2, 16], strides = [1, 1]} : vector<2x64xf32> to vector<2x16xf32>
    %280 = arith.negf %279 : vector<2x16xf32>
    %281 = math.exp %280 : vector<2x16xf32>
    %cst_66 = arith.constant 1.000000e+00 : f32
    %282 = vector.broadcast %cst_66 : f32 to vector<2x16xf32>
    %283 = arith.addf %282, %281 : vector<2x16xf32>
    %284 = arith.divf %282, %283 : vector<2x16xf32>
    %285 = vector.extract_strided_slice %272 {offsets = [0, 32], sizes = [2, 16], strides = [1, 1]} : vector<2x64xf32> to vector<2x16xf32>
    %286 = math.tanh %285 : vector<2x16xf32>
    %287 = vector.extract_strided_slice %272 {offsets = [0, 48], sizes = [2, 16], strides = [1, 1]} : vector<2x64xf32> to vector<2x16xf32>
    %288 = arith.negf %287 : vector<2x16xf32>
    %289 = math.exp %288 : vector<2x16xf32>
    %cst_67 = arith.constant 1.000000e+00 : f32
    %290 = vector.broadcast %cst_67 : f32 to vector<2x16xf32>
    %291 = arith.addf %290, %289 : vector<2x16xf32>
    %292 = arith.divf %290, %291 : vector<2x16xf32>
    %293 = arith.mulf %284, %268 : vector<2x16xf32>
    %294 = arith.mulf %278, %286 : vector<2x16xf32>
    %295 = arith.addf %293, %294 : vector<2x16xf32>
    %296 = math.tanh %295 : vector<2x16xf32>
    %297 = arith.mulf %292, %296 : vector<2x16xf32>
    %298 = vector.shape_cast %297 : vector<2x16xf32> to vector<2x1x16xf32>
    %c0_68 = arith.constant 0 : index
    %c7_69 = arith.constant 7 : index
    %c16 = arith.constant 16 : index
    %299 = vector.load %arg12[%c0_68, %c7_69, %c16] : memref<2x8x32xf32, #tpu.memory_space<vmem>>, vector<2x1x16xf32>
    tpu.vector_store %arg12[%c0_68, %c7_69, %c16], %298 {strides = array<i32>} : memref<2x8x32xf32, #tpu.memory_space<vmem>>, vector<2x1x16xf32>,
    %300 = vector.extract_strided_slice %16 {offsets = [0, 6, 64], sizes = [2, 1, 64], strides = [1, 1, 1]} : vector<2x8x128xf32> to vector<2x1x64xf32>
    %301 = vector.shape_cast %300 : vector<2x1x64xf32> to vector<2x64xf32>
    %cst_70 = arith.constant dense<0.000000e+00> : vector<2x64xf32>
    %302 = tpu.matmul %297, %4, %cst_70 {dimension_numbers = #tpu.dot_dimension_numbers<[1], [0], [0], [1], [0, 0, 1, 1], [], []>} : vector<2x16xf32>, vector<16x64xf32>, vector<2x64xf32> -> vector<2x64xf32>
    %303 = arith.addf %301, %302 : vector<2x64xf32>
    %304 = vector.extract_strided_slice %303 {offsets = [0, 0], sizes = [2, 16], strides = [1, 1]} : vector<2x64xf32> to vector<2x16xf32>
    %305 = arith.negf %304 : vector<2x16xf32>
    %306 = math.exp %305 : vector<2x16xf32>
    %cst_71 = arith.constant 1.000000e+00 : f32
    %307 = vector.broadcast %cst_71 : f32 to vector<2x16xf32>
    %308 = arith.addf %307, %306 : vector<2x16xf32>
    %309 = arith.divf %307, %308 : vector<2x16xf32>
    %310 = vector.extract_strided_slice %303 {offsets = [0, 16], sizes = [2, 16], strides = [1, 1]} : vector<2x64xf32> to vector<2x16xf32>
    %311 = arith.negf %310 : vector<2x16xf32>
    %312 = math.exp %311 : vector<2x16xf32>
    %cst_72 = arith.constant 1.000000e+00 : f32
    %313 = vector.broadcast %cst_72 : f32 to vector<2x16xf32>
    %314 = arith.addf %313, %312 : vector<2x16xf32>
    %315 = arith.divf %313, %314 : vector<2x16xf32>
    %316 = vector.extract_strided_slice %303 {offsets = [0, 32], sizes = [2, 16], strides = [1, 1]} : vector<2x64xf32> to vector<2x16xf32>
    %317 = math.tanh %316 : vector<2x16xf32>
    %318 = vector.extract_strided_slice %303 {offsets = [0, 48], sizes = [2, 16], strides = [1, 1]} : vector<2x64xf32> to vector<2x16xf32>
    %319 = arith.negf %318 : vector<2x16xf32>
    %320 = math.exp %319 : vector<2x16xf32>
    %cst_73 = arith.constant 1.000000e+00 : f32
    %321 = vector.broadcast %cst_73 : f32 to vector<2x16xf32>
    %322 = arith.addf %321, %320 : vector<2x16xf32>
    %323 = arith.divf %321, %322 : vector<2x16xf32>
    %324 = arith.mulf %315, %295 : vector<2x16xf32>
    %325 = arith.mulf %309, %317 : vector<2x16xf32>
    %326 = arith.addf %324, %325 : vector<2x16xf32>
    %327 = math.tanh %326 : vector<2x16xf32>
    %328 = arith.mulf %323, %327 : vector<2x16xf32>
    %329 = vector.shape_cast %328 : vector<2x16xf32> to vector<2x1x16xf32>
    %c0_74 = arith.constant 0 : index
    %c6_75 = arith.constant 6 : index
    %c16_76 = arith.constant 16 : index
    %330 = vector.load %arg12[%c0_74, %c6_75, %c16_76] : memref<2x8x32xf32, #tpu.memory_space<vmem>>, vector<2x1x16xf32>
    tpu.vector_store %arg12[%c0_74, %c6_75, %c16_76], %329 {strides = array<i32>} : memref<2x8x32xf32, #tpu.memory_space<vmem>>, vector<2x1x16xf32>,
    %331 = vector.extract_strided_slice %16 {offsets = [0, 5, 64], sizes = [2, 1, 64], strides = [1, 1, 1]} : vector<2x8x128xf32> to vector<2x1x64xf32>
    %332 = vector.shape_cast %331 : vector<2x1x64xf32> to vector<2x64xf32>
    %cst_77 = arith.constant dense<0.000000e+00> : vector<2x64xf32>
    %333 = tpu.matmul %328, %4, %cst_77 {dimension_numbers = #tpu.dot_dimension_numbers<[1], [0], [0], [1], [0, 0, 1, 1], [], []>} : vector<2x16xf32>, vector<16x64xf32>, vector<2x64xf32> -> vector<2x64xf32>
    %334 = arith.addf %332, %333 : vector<2x64xf32>
    %335 = vector.extract_strided_slice %334 {offsets = [0, 0], sizes = [2, 16], strides = [1, 1]} : vector<2x64xf32> to vector<2x16xf32>
    %336 = arith.negf %335 : vector<2x16xf32>
    %337 = math.exp %336 : vector<2x16xf32>
    %cst_78 = arith.constant 1.000000e+00 : f32
    %338 = vector.broadcast %cst_78 : f32 to vector<2x16xf32>
    %339 = arith.addf %338, %337 : vector<2x16xf32>
    %340 = arith.divf %338, %339 : vector<2x16xf32>
    %341 = vector.extract_strided_slice %334 {offsets = [0, 16], sizes = [2, 16], strides = [1, 1]} : vector<2x64xf32> to vector<2x16xf32>
    %342 = arith.negf %341 : vector<2x16xf32>
    %343 = math.exp %342 : vector<2x16xf32>
    %cst_79 = arith.constant 1.000000e+00 : f32
    %344 = vector.broadcast %cst_79 : f32 to vector<2x16xf32>
    %345 = arith.addf %344, %343 : vector<2x16xf32>
    %346 = arith.divf %344, %345 : vector<2x16xf32>
    %347 = vector.extract_strided_slice %334 {offsets = [0, 32], sizes = [2, 16], strides = [1, 1]} : vector<2x64xf32> to vector<2x16xf32>
    %348 = math.tanh %347 : vector<2x16xf32>
    %349 = vector.extract_strided_slice %334 {offsets = [0, 48], sizes = [2, 16], strides = [1, 1]} : vector<2x64xf32> to vector<2x16xf32>
    %350 = arith.negf %349 : vector<2x16xf32>
    %351 = math.exp %350 : vector<2x16xf32>
    %cst_80 = arith.constant 1.000000e+00 : f32
    %352 = vector.broadcast %cst_80 : f32 to vector<2x16xf32>
    %353 = arith.addf %352, %351 : vector<2x16xf32>
    %354 = arith.divf %352, %353 : vector<2x16xf32>
    %355 = arith.mulf %346, %326 : vector<2x16xf32>
    %356 = arith.mulf %340, %348 : vector<2x16xf32>
    %357 = arith.addf %355, %356 : vector<2x16xf32>
    %358 = math.tanh %357 : vector<2x16xf32>
    %359 = arith.mulf %354, %358 : vector<2x16xf32>
    %360 = vector.shape_cast %359 : vector<2x16xf32> to vector<2x1x16xf32>
    %c0_81 = arith.constant 0 : index
    %c5_82 = arith.constant 5 : index
    %c16_83 = arith.constant 16 : index
    %361 = vector.load %arg12[%c0_81, %c5_82, %c16_83] : memref<2x8x32xf32, #tpu.memory_space<vmem>>, vector<2x1x16xf32>
    tpu.vector_store %arg12[%c0_81, %c5_82, %c16_83], %360 {strides = array<i32>} : memref<2x8x32xf32, #tpu.memory_space<vmem>>, vector<2x1x16xf32>,
    %362 = vector.extract_strided_slice %16 {offsets = [0, 4, 64], sizes = [2, 1, 64], strides = [1, 1, 1]} : vector<2x8x128xf32> to vector<2x1x64xf32>
    %363 = vector.shape_cast %362 : vector<2x1x64xf32> to vector<2x64xf32>
    %cst_84 = arith.constant dense<0.000000e+00> : vector<2x64xf32>
    %364 = tpu.matmul %359, %4, %cst_84 {dimension_numbers = #tpu.dot_dimension_numbers<[1], [0], [0], [1], [0, 0, 1, 1], [], []>} : vector<2x16xf32>, vector<16x64xf32>, vector<2x64xf32> -> vector<2x64xf32>
    %365 = arith.addf %363, %364 : vector<2x64xf32>
    %366 = vector.extract_strided_slice %365 {offsets = [0, 0], sizes = [2, 16], strides = [1, 1]} : vector<2x64xf32> to vector<2x16xf32>
    %367 = arith.negf %366 : vector<2x16xf32>
    %368 = math.exp %367 : vector<2x16xf32>
    %cst_85 = arith.constant 1.000000e+00 : f32
    %369 = vector.broadcast %cst_85 : f32 to vector<2x16xf32>
    %370 = arith.addf %369, %368 : vector<2x16xf32>
    %371 = arith.divf %369, %370 : vector<2x16xf32>
    %372 = vector.extract_strided_slice %365 {offsets = [0, 16], sizes = [2, 16], strides = [1, 1]} : vector<2x64xf32> to vector<2x16xf32>
    %373 = arith.negf %372 : vector<2x16xf32>
    %374 = math.exp %373 : vector<2x16xf32>
    %cst_86 = arith.constant 1.000000e+00 : f32
    %375 = vector.broadcast %cst_86 : f32 to vector<2x16xf32>
    %376 = arith.addf %375, %374 : vector<2x16xf32>
    %377 = arith.divf %375, %376 : vector<2x16xf32>
    %378 = vector.extract_strided_slice %365 {offsets = [0, 32], sizes = [2, 16], strides = [1, 1]} : vector<2x64xf32> to vector<2x16xf32>
    %379 = math.tanh %378 : vector<2x16xf32>
    %380 = vector.extract_strided_slice %365 {offsets = [0, 48], sizes = [2, 16], strides = [1, 1]} : vector<2x64xf32> to vector<2x16xf32>
    %381 = arith.negf %380 : vector<2x16xf32>
    %382 = math.exp %381 : vector<2x16xf32>
    %cst_87 = arith.constant 1.000000e+00 : f32
    %383 = vector.broadcast %cst_87 : f32 to vector<2x16xf32>
    %384 = arith.addf %383, %382 : vector<2x16xf32>
    %385 = arith.divf %383, %384 : vector<2x16xf32>
    %386 = arith.mulf %377, %357 : vector<2x16xf32>
    %387 = arith.mulf %371, %379 : vector<2x16xf32>
    %388 = arith.addf %386, %387 : vector<2x16xf32>
    %389 = math.tanh %388 : vector<2x16xf32>
    %390 = arith.mulf %385, %389 : vector<2x16xf32>
    %391 = vector.shape_cast %390 : vector<2x16xf32> to vector<2x1x16xf32>
    %c0_88 = arith.constant 0 : index
    %c4_89 = arith.constant 4 : index
    %c16_90 = arith.constant 16 : index
    %392 = vector.load %arg12[%c0_88, %c4_89, %c16_90] : memref<2x8x32xf32, #tpu.memory_space<vmem>>, vector<2x1x16xf32>
    tpu.vector_store %arg12[%c0_88, %c4_89, %c16_90], %391 {strides = array<i32>} : memref<2x8x32xf32, #tpu.memory_space<vmem>>, vector<2x1x16xf32>,
    %393 = vector.extract_strided_slice %16 {offsets = [0, 3, 64], sizes = [2, 1, 64], strides = [1, 1, 1]} : vector<2x8x128xf32> to vector<2x1x64xf32>
    %394 = vector.shape_cast %393 : vector<2x1x64xf32> to vector<2x64xf32>
    %cst_91 = arith.constant dense<0.000000e+00> : vector<2x64xf32>
    %395 = tpu.matmul %390, %4, %cst_91 {dimension_numbers = #tpu.dot_dimension_numbers<[1], [0], [0], [1], [0, 0, 1, 1], [], []>} : vector<2x16xf32>, vector<16x64xf32>, vector<2x64xf32> -> vector<2x64xf32>
    %396 = arith.addf %394, %395 : vector<2x64xf32>
    %397 = vector.extract_strided_slice %396 {offsets = [0, 0], sizes = [2, 16], strides = [1, 1]} : vector<2x64xf32> to vector<2x16xf32>
    %398 = arith.negf %397 : vector<2x16xf32>
    %399 = math.exp %398 : vector<2x16xf32>
    %cst_92 = arith.constant 1.000000e+00 : f32
    %400 = vector.broadcast %cst_92 : f32 to vector<2x16xf32>
    %401 = arith.addf %400, %399 : vector<2x16xf32>
    %402 = arith.divf %400, %401 : vector<2x16xf32>
    %403 = vector.extract_strided_slice %396 {offsets = [0, 16], sizes = [2, 16], strides = [1, 1]} : vector<2x64xf32> to vector<2x16xf32>
    %404 = arith.negf %403 : vector<2x16xf32>
    %405 = math.exp %404 : vector<2x16xf32>
    %cst_93 = arith.constant 1.000000e+00 : f32
    %406 = vector.broadcast %cst_93 : f32 to vector<2x16xf32>
    %407 = arith.addf %406, %405 : vector<2x16xf32>
    %408 = arith.divf %406, %407 : vector<2x16xf32>
    %409 = vector.extract_strided_slice %396 {offsets = [0, 32], sizes = [2, 16], strides = [1, 1]} : vector<2x64xf32> to vector<2x16xf32>
    %410 = math.tanh %409 : vector<2x16xf32>
    %411 = vector.extract_strided_slice %396 {offsets = [0, 48], sizes = [2, 16], strides = [1, 1]} : vector<2x64xf32> to vector<2x16xf32>
    %412 = arith.negf %411 : vector<2x16xf32>
    %413 = math.exp %412 : vector<2x16xf32>
    %cst_94 = arith.constant 1.000000e+00 : f32
    %414 = vector.broadcast %cst_94 : f32 to vector<2x16xf32>
    %415 = arith.addf %414, %413 : vector<2x16xf32>
    %416 = arith.divf %414, %415 : vector<2x16xf32>
    %417 = arith.mulf %408, %388 : vector<2x16xf32>
    %418 = arith.mulf %402, %410 : vector<2x16xf32>
    %419 = arith.addf %417, %418 : vector<2x16xf32>
    %420 = math.tanh %419 : vector<2x16xf32>
    %421 = arith.mulf %416, %420 : vector<2x16xf32>
    %422 = vector.shape_cast %421 : vector<2x16xf32> to vector<2x1x16xf32>
    %c0_95 = arith.constant 0 : index
    %c3_96 = arith.constant 3 : index
    %c16_97 = arith.constant 16 : index
    %423 = vector.load %arg12[%c0_95, %c3_96, %c16_97] : memref<2x8x32xf32, #tpu.memory_space<vmem>>, vector<2x1x16xf32>
    tpu.vector_store %arg12[%c0_95, %c3_96, %c16_97], %422 {strides = array<i32>} : memref<2x8x32xf32, #tpu.memory_space<vmem>>, vector<2x1x16xf32>,
    %424 = vector.extract_strided_slice %16 {offsets = [0, 2, 64], sizes = [2, 1, 64], strides = [1, 1, 1]} : vector<2x8x128xf32> to vector<2x1x64xf32>
    %425 = vector.shape_cast %424 : vector<2x1x64xf32> to vector<2x64xf32>
    %cst_98 = arith.constant dense<0.000000e+00> : vector<2x64xf32>
    %426 = tpu.matmul %421, %4, %cst_98 {dimension_numbers = #tpu.dot_dimension_numbers<[1], [0], [0], [1], [0, 0, 1, 1], [], []>} : vector<2x16xf32>, vector<16x64xf32>, vector<2x64xf32> -> vector<2x64xf32>
    %427 = arith.addf %425, %426 : vector<2x64xf32>
    %428 = vector.extract_strided_slice %427 {offsets = [0, 0], sizes = [2, 16], strides = [1, 1]} : vector<2x64xf32> to vector<2x16xf32>
    %429 = arith.negf %428 : vector<2x16xf32>
    %430 = math.exp %429 : vector<2x16xf32>
    %cst_99 = arith.constant 1.000000e+00 : f32
    %431 = vector.broadcast %cst_99 : f32 to vector<2x16xf32>
    %432 = arith.addf %431, %430 : vector<2x16xf32>
    %433 = arith.divf %431, %432 : vector<2x16xf32>
    %434 = vector.extract_strided_slice %427 {offsets = [0, 16], sizes = [2, 16], strides = [1, 1]} : vector<2x64xf32> to vector<2x16xf32>
    %435 = arith.negf %434 : vector<2x16xf32>
    %436 = math.exp %435 : vector<2x16xf32>
    %cst_100 = arith.constant 1.000000e+00 : f32
    %437 = vector.broadcast %cst_100 : f32 to vector<2x16xf32>
    %438 = arith.addf %437, %436 : vector<2x16xf32>
    %439 = arith.divf %437, %438 : vector<2x16xf32>
    %440 = vector.extract_strided_slice %427 {offsets = [0, 32], sizes = [2, 16], strides = [1, 1]} : vector<2x64xf32> to vector<2x16xf32>
    %441 = math.tanh %440 : vector<2x16xf32>
    %442 = vector.extract_strided_slice %427 {offsets = [0, 48], sizes = [2, 16], strides = [1, 1]} : vector<2x64xf32> to vector<2x16xf32>
    %443 = arith.negf %442 : vector<2x16xf32>
    %444 = math.exp %443 : vector<2x16xf32>
    %cst_101 = arith.constant 1.000000e+00 : f32
    %445 = vector.broadcast %cst_101 : f32 to vector<2x16xf32>
    %446 = arith.addf %445, %444 : vector<2x16xf32>
    %447 = arith.divf %445, %446 : vector<2x16xf32>
    %448 = arith.mulf %439, %419 : vector<2x16xf32>
    %449 = arith.mulf %433, %441 : vector<2x16xf32>
    %450 = arith.addf %448, %449 : vector<2x16xf32>
    %451 = math.tanh %450 : vector<2x16xf32>
    %452 = arith.mulf %447, %451 : vector<2x16xf32>
    %453 = vector.shape_cast %452 : vector<2x16xf32> to vector<2x1x16xf32>
    %c0_102 = arith.constant 0 : index
    %c2_103 = arith.constant 2 : index
    %c16_104 = arith.constant 16 : index
    %454 = vector.load %arg12[%c0_102, %c2_103, %c16_104] : memref<2x8x32xf32, #tpu.memory_space<vmem>>, vector<2x1x16xf32>
    tpu.vector_store %arg12[%c0_102, %c2_103, %c16_104], %453 {strides = array<i32>} : memref<2x8x32xf32, #tpu.memory_space<vmem>>, vector<2x1x16xf32>,
    %455 = vector.extract_strided_slice %16 {offsets = [0, 1, 64], sizes = [2, 1, 64], strides = [1, 1, 1]} : vector<2x8x128xf32> to vector<2x1x64xf32>
    %456 = vector.shape_cast %455 : vector<2x1x64xf32> to vector<2x64xf32>
    %cst_105 = arith.constant dense<0.000000e+00> : vector<2x64xf32>
    %457 = tpu.matmul %452, %4, %cst_105 {dimension_numbers = #tpu.dot_dimension_numbers<[1], [0], [0], [1], [0, 0, 1, 1], [], []>} : vector<2x16xf32>, vector<16x64xf32>, vector<2x64xf32> -> vector<2x64xf32>
    %458 = arith.addf %456, %457 : vector<2x64xf32>
    %459 = vector.extract_strided_slice %458 {offsets = [0, 0], sizes = [2, 16], strides = [1, 1]} : vector<2x64xf32> to vector<2x16xf32>
    %460 = arith.negf %459 : vector<2x16xf32>
    %461 = math.exp %460 : vector<2x16xf32>
    %cst_106 = arith.constant 1.000000e+00 : f32
    %462 = vector.broadcast %cst_106 : f32 to vector<2x16xf32>
    %463 = arith.addf %462, %461 : vector<2x16xf32>
    %464 = arith.divf %462, %463 : vector<2x16xf32>
    %465 = vector.extract_strided_slice %458 {offsets = [0, 16], sizes = [2, 16], strides = [1, 1]} : vector<2x64xf32> to vector<2x16xf32>
    %466 = arith.negf %465 : vector<2x16xf32>
    %467 = math.exp %466 : vector<2x16xf32>
    %cst_107 = arith.constant 1.000000e+00 : f32
    %468 = vector.broadcast %cst_107 : f32 to vector<2x16xf32>
    %469 = arith.addf %468, %467 : vector<2x16xf32>
    %470 = arith.divf %468, %469 : vector<2x16xf32>
    %471 = vector.extract_strided_slice %458 {offsets = [0, 32], sizes = [2, 16], strides = [1, 1]} : vector<2x64xf32> to vector<2x16xf32>
    %472 = math.tanh %471 : vector<2x16xf32>
    %473 = vector.extract_strided_slice %458 {offsets = [0, 48], sizes = [2, 16], strides = [1, 1]} : vector<2x64xf32> to vector<2x16xf32>
    %474 = arith.negf %473 : vector<2x16xf32>
    %475 = math.exp %474 : vector<2x16xf32>
    %cst_108 = arith.constant 1.000000e+00 : f32
    %476 = vector.broadcast %cst_108 : f32 to vector<2x16xf32>
    %477 = arith.addf %476, %475 : vector<2x16xf32>
    %478 = arith.divf %476, %477 : vector<2x16xf32>
    %479 = arith.mulf %470, %450 : vector<2x16xf32>
    %480 = arith.mulf %464, %472 : vector<2x16xf32>
    %481 = arith.addf %479, %480 : vector<2x16xf32>
    %482 = math.tanh %481 : vector<2x16xf32>
    %483 = arith.mulf %478, %482 : vector<2x16xf32>
    %484 = vector.shape_cast %483 : vector<2x16xf32> to vector<2x1x16xf32>
    %c0_109 = arith.constant 0 : index
    %c1_110 = arith.constant 1 : index
    %c16_111 = arith.constant 16 : index
    %485 = vector.load %arg12[%c0_109, %c1_110, %c16_111] : memref<2x8x32xf32, #tpu.memory_space<vmem>>, vector<2x1x16xf32>
    tpu.vector_store %arg12[%c0_109, %c1_110, %c16_111], %484 {strides = array<i32>} : memref<2x8x32xf32, #tpu.memory_space<vmem>>, vector<2x1x16xf32>,
    %486 = vector.extract_strided_slice %16 {offsets = [0, 0, 64], sizes = [2, 1, 64], strides = [1, 1, 1]} : vector<2x8x128xf32> to vector<2x1x64xf32>
    %487 = vector.shape_cast %486 : vector<2x1x64xf32> to vector<2x64xf32>
    %cst_112 = arith.constant dense<0.000000e+00> : vector<2x64xf32>
    %488 = tpu.matmul %483, %4, %cst_112 {dimension_numbers = #tpu.dot_dimension_numbers<[1], [0], [0], [1], [0, 0, 1, 1], [], []>} : vector<2x16xf32>, vector<16x64xf32>, vector<2x64xf32> -> vector<2x64xf32>
    %489 = arith.addf %487, %488 : vector<2x64xf32>
    %490 = vector.extract_strided_slice %489 {offsets = [0, 0], sizes = [2, 16], strides = [1, 1]} : vector<2x64xf32> to vector<2x16xf32>
    %491 = arith.negf %490 : vector<2x16xf32>
    %492 = math.exp %491 : vector<2x16xf32>
    %cst_113 = arith.constant 1.000000e+00 : f32
    %493 = vector.broadcast %cst_113 : f32 to vector<2x16xf32>
    %494 = arith.addf %493, %492 : vector<2x16xf32>
    %495 = arith.divf %493, %494 : vector<2x16xf32>
    %496 = vector.extract_strided_slice %489 {offsets = [0, 16], sizes = [2, 16], strides = [1, 1]} : vector<2x64xf32> to vector<2x16xf32>
    %497 = arith.negf %496 : vector<2x16xf32>
    %498 = math.exp %497 : vector<2x16xf32>
    %cst_114 = arith.constant 1.000000e+00 : f32
    %499 = vector.broadcast %cst_114 : f32 to vector<2x16xf32>
    %500 = arith.addf %499, %498 : vector<2x16xf32>
    %501 = arith.divf %499, %500 : vector<2x16xf32>
    %502 = vector.extract_strided_slice %489 {offsets = [0, 32], sizes = [2, 16], strides = [1, 1]} : vector<2x64xf32> to vector<2x16xf32>
    %503 = math.tanh %502 : vector<2x16xf32>
    %504 = vector.extract_strided_slice %489 {offsets = [0, 48], sizes = [2, 16], strides = [1, 1]} : vector<2x64xf32> to vector<2x16xf32>
    %505 = arith.negf %504 : vector<2x16xf32>
    %506 = math.exp %505 : vector<2x16xf32>
    %cst_115 = arith.constant 1.000000e+00 : f32
    %507 = vector.broadcast %cst_115 : f32 to vector<2x16xf32>
    %508 = arith.addf %507, %506 : vector<2x16xf32>
    %509 = arith.divf %507, %508 : vector<2x16xf32>
    %510 = arith.mulf %501, %481 : vector<2x16xf32>
    %511 = arith.mulf %495, %503 : vector<2x16xf32>
    %512 = arith.addf %510, %511 : vector<2x16xf32>
    %513 = math.tanh %512 : vector<2x16xf32>
    %514 = arith.mulf %509, %513 : vector<2x16xf32>
    %515 = vector.shape_cast %514 : vector<2x16xf32> to vector<2x1x16xf32>
    %c0_116 = arith.constant 0 : index
    %c0_117 = arith.constant 0 : index
    %c16_118 = arith.constant 16 : index
    %516 = vector.load %arg12[%c0_116, %c0_117, %c16_118] : memref<2x8x32xf32, #tpu.memory_space<vmem>>, vector<2x1x16xf32>
    tpu.vector_store %arg12[%c0_116, %c0_117, %c16_118], %515 {strides = array<i32>} : memref<2x8x32xf32, #tpu.memory_space<vmem>>, vector<2x1x16xf32>,
    %c0_119 = arith.constant 0 : index
    %c0_120 = arith.constant 0 : index
    %c0_121 = arith.constant 0 : index
    %517 = vector.load %arg12[%c0_119, %c0_120, %c0_121] : memref<2x8x32xf32, #tpu.memory_space<vmem>>, vector<2x8x32xf32>
    %c0_122 = arith.constant 0 : index
    %c0_123 = arith.constant 0 : index
    %518 = vector.load %arg5[%c0_122, %c0_123] : memref<96x32xf32, #tpu.memory_space<vmem>>, vector<96x32xf32>
    %c0_124 = arith.constant 0 : index
    %c0_125 = arith.constant 0 : index
    %519 = vector.load %arg6[%c0_124, %c0_125] : memref<1x32xf32, #tpu.memory_space<vmem>>, vector<1x32xf32>
    %c0_126 = arith.constant 0 : index
    %c0_127 = arith.constant 0 : index
    %c0_128 = arith.constant 0 : index
    %520 = vector.load %arg7[%c0_126, %c0_127, %c0_128] : memref<3x96x32xf32, #tpu.memory_space<vmem>>, vector<1x96x32xf32>
    %521 = vector.shape_cast %520 : vector<1x96x32xf32> to vector<96x32xf32>
    %c1_129 = arith.constant 1 : index
    %c0_130 = arith.constant 0 : index
    %c0_131 = arith.constant 0 : index
    %522 = vector.load %arg7[%c1_129, %c0_130, %c0_131] : memref<3x96x32xf32, #tpu.memory_space<vmem>>, vector<1x96x32xf32>
    %523 = vector.shape_cast %522 : vector<1x96x32xf32> to vector<96x32xf32>
    %c2_132 = arith.constant 2 : index
    %c0_133 = arith.constant 0 : index
    %c0_134 = arith.constant 0 : index
    %524 = vector.load %arg7[%c2_132, %c0_133, %c0_134] : memref<3x96x32xf32, #tpu.memory_space<vmem>>, vector<1x96x32xf32>
    %525 = vector.shape_cast %524 : vector<1x96x32xf32> to vector<96x32xf32>
    %c0_135 = arith.constant 0 : index
    %c0_136 = arith.constant 0 : index
    %c0_137 = arith.constant 0 : index
    %526 = vector.load %arg8[%c0_135, %c0_136, %c0_137] : memref<3x1x32xf32, #tpu.memory_space<vmem>>, vector<1x1x32xf32>
    %527 = vector.shape_cast %526 : vector<1x1x32xf32> to vector<1x32xf32>
    %c1_138 = arith.constant 1 : index
    %c0_139 = arith.constant 0 : index
    %c0_140 = arith.constant 0 : index
    %528 = vector.load %arg8[%c1_138, %c0_139, %c0_140] : memref<3x1x32xf32, #tpu.memory_space<vmem>>, vector<1x1x32xf32>
    %529 = vector.shape_cast %528 : vector<1x1x32xf32> to vector<1x32xf32>
    %c2_141 = arith.constant 2 : index
    %c0_142 = arith.constant 0 : index
    %c0_143 = arith.constant 0 : index
    %530 = vector.load %arg8[%c2_141, %c0_142, %c0_143] : memref<3x1x32xf32, #tpu.memory_space<vmem>>, vector<1x1x32xf32>
    %531 = vector.shape_cast %530 : vector<1x1x32xf32> to vector<1x32xf32>
    %c0_144 = arith.constant 0 : index
    %c0_145 = arith.constant 0 : index
    %c0_146 = arith.constant 0 : index
    %532 = vector.load %arg9[%c0_144, %c0_145, %c0_146] : memref<3x96x32xf32, #tpu.memory_space<vmem>>, vector<1x96x32xf32>
    %533 = vector.shape_cast %532 : vector<1x96x32xf32> to vector<96x32xf32>
    %c1_147 = arith.constant 1 : index
    %c0_148 = arith.constant 0 : index
    %c0_149 = arith.constant 0 : index
    %534 = vector.load %arg9[%c1_147, %c0_148, %c0_149] : memref<3x96x32xf32, #tpu.memory_space<vmem>>, vector<1x96x32xf32>
    %535 = vector.shape_cast %534 : vector<1x96x32xf32> to vector<96x32xf32>
    %c2_150 = arith.constant 2 : index
    %c0_151 = arith.constant 0 : index
    %c0_152 = arith.constant 0 : index
    %536 = vector.load %arg9[%c2_150, %c0_151, %c0_152] : memref<3x96x32xf32, #tpu.memory_space<vmem>>, vector<1x96x32xf32>
    %537 = vector.shape_cast %536 : vector<1x96x32xf32> to vector<96x32xf32>
    %c0_153 = arith.constant 0 : index
    %c0_154 = arith.constant 0 : index
    %c0_155 = arith.constant 0 : index
    %538 = vector.load %arg10[%c0_153, %c0_154, %c0_155] : memref<3x1x32xf32, #tpu.memory_space<vmem>>, vector<1x1x32xf32>
    %539 = vector.shape_cast %538 : vector<1x1x32xf32> to vector<1x32xf32>
    %c1_156 = arith.constant 1 : index
    %c0_157 = arith.constant 0 : index
    %c0_158 = arith.constant 0 : index
    %540 = vector.load %arg10[%c1_156, %c0_157, %c0_158] : memref<3x1x32xf32, #tpu.memory_space<vmem>>, vector<1x1x32xf32>
    %541 = vector.shape_cast %540 : vector<1x1x32xf32> to vector<1x32xf32>
    %c2_159 = arith.constant 2 : index
    %c0_160 = arith.constant 0 : index
    %c0_161 = arith.constant 0 : index
    %542 = vector.load %arg10[%c2_159, %c0_160, %c0_161] : memref<3x1x32xf32, #tpu.memory_space<vmem>>, vector<1x1x32xf32>
    %543 = vector.shape_cast %542 : vector<1x1x32xf32> to vector<1x32xf32>
    %544 = vector.extract_strided_slice %517 {offsets = [0, 0, 0], sizes = [1, 8, 32], strides = [1, 1, 1]} : vector<2x8x32xf32> to vector<1x8x32xf32>
    %545 = vector.shape_cast %544 : vector<1x8x32xf32> to vector<8x32xf32>
    %cst_162 = arith.constant 0.000000e+00 : f32
    %546 = vector.broadcast %cst_162 : f32 to vector<1x32xf32>
    %547 = tpu.concatenate %546, %545, %546 in 0 : vector<1x32xf32>, vector<8x32xf32>, vector<1x32xf32> -> vector<10x32xf32>
    %548 = vector.extract_strided_slice %547 {offsets = [0, 0], sizes = [8, 32], strides = [1, 1]} : vector<10x32xf32> to vector<8x32xf32>
    %549 = vector.extract_strided_slice %547 {offsets = [1, 0], sizes = [8, 32], strides = [1, 1]} : vector<10x32xf32> to vector<8x32xf32>
    %550 = vector.extract_strided_slice %547 {offsets = [2, 0], sizes = [8, 32], strides = [1, 1]} : vector<10x32xf32> to vector<8x32xf32>
    %551 = tpu.concatenate %548, %549, %550 in 1 : vector<8x32xf32>, vector<8x32xf32>, vector<8x32xf32> -> vector<8x96xf32>
    %cst_163 = arith.constant dense<0.000000e+00> : vector<8x32xf32>
    %552 = tpu.matmul %551, %518, %cst_163 {dimension_numbers = #tpu.dot_dimension_numbers<[1], [0], [0], [1], [0, 0, 1, 1], [], []>} : vector<8x96xf32>, vector<96x32xf32>, vector<8x32xf32> -> vector<8x32xf32>
    %553 = vector.broadcast %519 : vector<1x32xf32> to vector<8x32xf32>
    %554 = arith.addf %552, %553 : vector<8x32xf32>
    %cst_164 = arith.constant 0.000000e+00 : f32
    %555 = vector.broadcast %cst_164 : f32 to vector<8x32xf32>
    %556 = arith.maximumf %554, %555 : vector<8x32xf32>
    %cst_165 = arith.constant 0.000000e+00 : f32
    %557 = vector.broadcast %cst_165 : f32 to vector<1x32xf32>
    %558 = tpu.concatenate %557, %556, %557 in 0 : vector<1x32xf32>, vector<8x32xf32>, vector<1x32xf32> -> vector<10x32xf32>
    %559 = vector.extract_strided_slice %558 {offsets = [0, 0], sizes = [8, 32], strides = [1, 1]} : vector<10x32xf32> to vector<8x32xf32>
    %560 = vector.extract_strided_slice %558 {offsets = [1, 0], sizes = [8, 32], strides = [1, 1]} : vector<10x32xf32> to vector<8x32xf32>
    %561 = vector.extract_strided_slice %558 {offsets = [2, 0], sizes = [8, 32], strides = [1, 1]} : vector<10x32xf32> to vector<8x32xf32>
    %562 = tpu.concatenate %559, %560, %561 in 1 : vector<8x32xf32>, vector<8x32xf32>, vector<8x32xf32> -> vector<8x96xf32>
    %cst_166 = arith.constant dense<0.000000e+00> : vector<8x32xf32>
    %563 = tpu.matmul %562, %521, %cst_166 {dimension_numbers = #tpu.dot_dimension_numbers<[1], [0], [0], [1], [0, 0, 1, 1], [], []>} : vector<8x96xf32>, vector<96x32xf32>, vector<8x32xf32> -> vector<8x32xf32>
    %564 = vector.broadcast %527 : vector<1x32xf32> to vector<8x32xf32>
    %565 = arith.addf %563, %564 : vector<8x32xf32>
    %cst_167 = arith.constant 0.000000e+00 : f32
    %566 = vector.broadcast %cst_167 : f32 to vector<8x32xf32>
    %567 = arith.maximumf %565, %566 : vector<8x32xf32>
    %cst_168 = arith.constant 0.000000e+00 : f32
    %568 = vector.broadcast %cst_168 : f32 to vector<1x32xf32>
    %569 = tpu.concatenate %568, %567, %568 in 0 : vector<1x32xf32>, vector<8x32xf32>, vector<1x32xf32> -> vector<10x32xf32>
    %570 = vector.extract_strided_slice %569 {offsets = [0, 0], sizes = [8, 32], strides = [1, 1]} : vector<10x32xf32> to vector<8x32xf32>
    %571 = vector.extract_strided_slice %569 {offsets = [1, 0], sizes = [8, 32], strides = [1, 1]} : vector<10x32xf32> to vector<8x32xf32>
    %572 = vector.extract_strided_slice %569 {offsets = [2, 0], sizes = [8, 32], strides = [1, 1]} : vector<10x32xf32> to vector<8x32xf32>
    %573 = tpu.concatenate %570, %571, %572 in 1 : vector<8x32xf32>, vector<8x32xf32>, vector<8x32xf32> -> vector<8x96xf32>
    %cst_169 = arith.constant dense<0.000000e+00> : vector<8x32xf32>
    %574 = tpu.matmul %573, %533, %cst_169 {dimension_numbers = #tpu.dot_dimension_numbers<[1], [0], [0], [1], [0, 0, 1, 1], [], []>} : vector<8x96xf32>, vector<96x32xf32>, vector<8x32xf32> -> vector<8x32xf32>
    %575 = vector.broadcast %539 : vector<1x32xf32> to vector<8x32xf32>
    %576 = arith.addf %574, %575 : vector<8x32xf32>
    %577 = arith.addf %576, %554 : vector<8x32xf32>
    %cst_170 = arith.constant 0.000000e+00 : f32
    %578 = vector.broadcast %cst_170 : f32 to vector<8x32xf32>
    %579 = arith.maximumf %577, %578 : vector<8x32xf32>
    %cst_171 = arith.constant 0.000000e+00 : f32
    %580 = vector.broadcast %cst_171 : f32 to vector<1x32xf32>
    %581 = tpu.concatenate %580, %579, %580 in 0 : vector<1x32xf32>, vector<8x32xf32>, vector<1x32xf32> -> vector<10x32xf32>
    %582 = vector.extract_strided_slice %581 {offsets = [0, 0], sizes = [8, 32], strides = [1, 1]} : vector<10x32xf32> to vector<8x32xf32>
    %583 = vector.extract_strided_slice %581 {offsets = [1, 0], sizes = [8, 32], strides = [1, 1]} : vector<10x32xf32> to vector<8x32xf32>
    %584 = vector.extract_strided_slice %581 {offsets = [2, 0], sizes = [8, 32], strides = [1, 1]} : vector<10x32xf32> to vector<8x32xf32>
    %585 = tpu.concatenate %582, %583, %584 in 1 : vector<8x32xf32>, vector<8x32xf32>, vector<8x32xf32> -> vector<8x96xf32>
    %cst_172 = arith.constant dense<0.000000e+00> : vector<8x32xf32>
    %586 = tpu.matmul %585, %523, %cst_172 {dimension_numbers = #tpu.dot_dimension_numbers<[1], [0], [0], [1], [0, 0, 1, 1], [], []>} : vector<8x96xf32>, vector<96x32xf32>, vector<8x32xf32> -> vector<8x32xf32>
    %587 = vector.broadcast %529 : vector<1x32xf32> to vector<8x32xf32>
    %588 = arith.addf %586, %587 : vector<8x32xf32>
    %cst_173 = arith.constant 0.000000e+00 : f32
    %589 = vector.broadcast %cst_173 : f32 to vector<8x32xf32>
    %590 = arith.maximumf %588, %589 : vector<8x32xf32>
    %cst_174 = arith.constant 0.000000e+00 : f32
    %591 = vector.broadcast %cst_174 : f32 to vector<1x32xf32>
    %592 = tpu.concatenate %591, %590, %591 in 0 : vector<1x32xf32>, vector<8x32xf32>, vector<1x32xf32> -> vector<10x32xf32>
    %593 = vector.extract_strided_slice %592 {offsets = [0, 0], sizes = [8, 32], strides = [1, 1]} : vector<10x32xf32> to vector<8x32xf32>
    %594 = vector.extract_strided_slice %592 {offsets = [1, 0], sizes = [8, 32], strides = [1, 1]} : vector<10x32xf32> to vector<8x32xf32>
    %595 = vector.extract_strided_slice %592 {offsets = [2, 0], sizes = [8, 32], strides = [1, 1]} : vector<10x32xf32> to vector<8x32xf32>
    %596 = tpu.concatenate %593, %594, %595 in 1 : vector<8x32xf32>, vector<8x32xf32>, vector<8x32xf32> -> vector<8x96xf32>
    %cst_175 = arith.constant dense<0.000000e+00> : vector<8x32xf32>
    %597 = tpu.matmul %596, %535, %cst_175 {dimension_numbers = #tpu.dot_dimension_numbers<[1], [0], [0], [1], [0, 0, 1, 1], [], []>} : vector<8x96xf32>, vector<96x32xf32>, vector<8x32xf32> -> vector<8x32xf32>
    %598 = vector.broadcast %541 : vector<1x32xf32> to vector<8x32xf32>
    %599 = arith.addf %597, %598 : vector<8x32xf32>
    %600 = arith.addf %599, %577 : vector<8x32xf32>
    %cst_176 = arith.constant 0.000000e+00 : f32
    %601 = vector.broadcast %cst_176 : f32 to vector<8x32xf32>
    %602 = arith.maximumf %600, %601 : vector<8x32xf32>
    %cst_177 = arith.constant 0.000000e+00 : f32
    %603 = vector.broadcast %cst_177 : f32 to vector<1x32xf32>
    %604 = tpu.concatenate %603, %602, %603 in 0 : vector<1x32xf32>, vector<8x32xf32>, vector<1x32xf32> -> vector<10x32xf32>
    %605 = vector.extract_strided_slice %604 {offsets = [0, 0], sizes = [8, 32], strides = [1, 1]} : vector<10x32xf32> to vector<8x32xf32>
    %606 = vector.extract_strided_slice %604 {offsets = [1, 0], sizes = [8, 32], strides = [1, 1]} : vector<10x32xf32> to vector<8x32xf32>
    %607 = vector.extract_strided_slice %604 {offsets = [2, 0], sizes = [8, 32], strides = [1, 1]} : vector<10x32xf32> to vector<8x32xf32>
    %608 = tpu.concatenate %605, %606, %607 in 1 : vector<8x32xf32>, vector<8x32xf32>, vector<8x32xf32> -> vector<8x96xf32>
    %cst_178 = arith.constant dense<0.000000e+00> : vector<8x32xf32>
    %609 = tpu.matmul %608, %525, %cst_178 {dimension_numbers = #tpu.dot_dimension_numbers<[1], [0], [0], [1], [0, 0, 1, 1], [], []>} : vector<8x96xf32>, vector<96x32xf32>, vector<8x32xf32> -> vector<8x32xf32>
    %610 = vector.broadcast %531 : vector<1x32xf32> to vector<8x32xf32>
    %611 = arith.addf %609, %610 : vector<8x32xf32>
    %cst_179 = arith.constant 0.000000e+00 : f32
    %612 = vector.broadcast %cst_179 : f32 to vector<8x32xf32>
    %613 = arith.maximumf %611, %612 : vector<8x32xf32>
    %cst_180 = arith.constant 0.000000e+00 : f32
    %614 = vector.broadcast %cst_180 : f32 to vector<1x32xf32>
    %615 = tpu.concatenate %614, %613, %614 in 0 : vector<1x32xf32>, vector<8x32xf32>, vector<1x32xf32> -> vector<10x32xf32>
    %616 = vector.extract_strided_slice %615 {offsets = [0, 0], sizes = [8, 32], strides = [1, 1]} : vector<10x32xf32> to vector<8x32xf32>
    %617 = vector.extract_strided_slice %615 {offsets = [1, 0], sizes = [8, 32], strides = [1, 1]} : vector<10x32xf32> to vector<8x32xf32>
    %618 = vector.extract_strided_slice %615 {offsets = [2, 0], sizes = [8, 32], strides = [1, 1]} : vector<10x32xf32> to vector<8x32xf32>
    %619 = tpu.concatenate %616, %617, %618 in 1 : vector<8x32xf32>, vector<8x32xf32>, vector<8x32xf32> -> vector<8x96xf32>
    %cst_181 = arith.constant dense<0.000000e+00> : vector<8x32xf32>
    %620 = tpu.matmul %619, %537, %cst_181 {dimension_numbers = #tpu.dot_dimension_numbers<[1], [0], [0], [1], [0, 0, 1, 1], [], []>} : vector<8x96xf32>, vector<96x32xf32>, vector<8x32xf32> -> vector<8x32xf32>
    %621 = vector.broadcast %543 : vector<1x32xf32> to vector<8x32xf32>
    %622 = arith.addf %620, %621 : vector<8x32xf32>
    %623 = arith.addf %622, %600 : vector<8x32xf32>
    %624 = vector.extract_strided_slice %517 {offsets = [1, 0, 0], sizes = [1, 8, 32], strides = [1, 1, 1]} : vector<2x8x32xf32> to vector<1x8x32xf32>
    %625 = vector.shape_cast %624 : vector<1x8x32xf32> to vector<8x32xf32>
    %cst_182 = arith.constant 0.000000e+00 : f32
    %626 = vector.broadcast %cst_182 : f32 to vector<1x32xf32>
    %627 = tpu.concatenate %626, %625, %626 in 0 : vector<1x32xf32>, vector<8x32xf32>, vector<1x32xf32> -> vector<10x32xf32>
    %628 = vector.extract_strided_slice %627 {offsets = [0, 0], sizes = [8, 32], strides = [1, 1]} : vector<10x32xf32> to vector<8x32xf32>
    %629 = vector.extract_strided_slice %627 {offsets = [1, 0], sizes = [8, 32], strides = [1, 1]} : vector<10x32xf32> to vector<8x32xf32>
    %630 = vector.extract_strided_slice %627 {offsets = [2, 0], sizes = [8, 32], strides = [1, 1]} : vector<10x32xf32> to vector<8x32xf32>
    %631 = tpu.concatenate %628, %629, %630 in 1 : vector<8x32xf32>, vector<8x32xf32>, vector<8x32xf32> -> vector<8x96xf32>
    %cst_183 = arith.constant dense<0.000000e+00> : vector<8x32xf32>
    %632 = tpu.matmul %631, %518, %cst_183 {dimension_numbers = #tpu.dot_dimension_numbers<[1], [0], [0], [1], [0, 0, 1, 1], [], []>} : vector<8x96xf32>, vector<96x32xf32>, vector<8x32xf32> -> vector<8x32xf32>
    %633 = vector.broadcast %519 : vector<1x32xf32> to vector<8x32xf32>
    %634 = arith.addf %632, %633 : vector<8x32xf32>
    %cst_184 = arith.constant 0.000000e+00 : f32
    %635 = vector.broadcast %cst_184 : f32 to vector<8x32xf32>
    %636 = arith.maximumf %634, %635 : vector<8x32xf32>
    %cst_185 = arith.constant 0.000000e+00 : f32
    %637 = vector.broadcast %cst_185 : f32 to vector<1x32xf32>
    %638 = tpu.concatenate %637, %636, %637 in 0 : vector<1x32xf32>, vector<8x32xf32>, vector<1x32xf32> -> vector<10x32xf32>
    %639 = vector.extract_strided_slice %638 {offsets = [0, 0], sizes = [8, 32], strides = [1, 1]} : vector<10x32xf32> to vector<8x32xf32>
    %640 = vector.extract_strided_slice %638 {offsets = [1, 0], sizes = [8, 32], strides = [1, 1]} : vector<10x32xf32> to vector<8x32xf32>
    %641 = vector.extract_strided_slice %638 {offsets = [2, 0], sizes = [8, 32], strides = [1, 1]} : vector<10x32xf32> to vector<8x32xf32>
    %642 = tpu.concatenate %639, %640, %641 in 1 : vector<8x32xf32>, vector<8x32xf32>, vector<8x32xf32> -> vector<8x96xf32>
    %cst_186 = arith.constant dense<0.000000e+00> : vector<8x32xf32>
    %643 = tpu.matmul %642, %521, %cst_186 {dimension_numbers = #tpu.dot_dimension_numbers<[1], [0], [0], [1], [0, 0, 1, 1], [], []>} : vector<8x96xf32>, vector<96x32xf32>, vector<8x32xf32> -> vector<8x32xf32>
    %644 = vector.broadcast %527 : vector<1x32xf32> to vector<8x32xf32>
    %645 = arith.addf %643, %644 : vector<8x32xf32>
    %cst_187 = arith.constant 0.000000e+00 : f32
    %646 = vector.broadcast %cst_187 : f32 to vector<8x32xf32>
    %647 = arith.maximumf %645, %646 : vector<8x32xf32>
    %cst_188 = arith.constant 0.000000e+00 : f32
    %648 = vector.broadcast %cst_188 : f32 to vector<1x32xf32>
    %649 = tpu.concatenate %648, %647, %648 in 0 : vector<1x32xf32>, vector<8x32xf32>, vector<1x32xf32> -> vector<10x32xf32>
    %650 = vector.extract_strided_slice %649 {offsets = [0, 0], sizes = [8, 32], strides = [1, 1]} : vector<10x32xf32> to vector<8x32xf32>
    %651 = vector.extract_strided_slice %649 {offsets = [1, 0], sizes = [8, 32], strides = [1, 1]} : vector<10x32xf32> to vector<8x32xf32>
    %652 = vector.extract_strided_slice %649 {offsets = [2, 0], sizes = [8, 32], strides = [1, 1]} : vector<10x32xf32> to vector<8x32xf32>
    %653 = tpu.concatenate %650, %651, %652 in 1 : vector<8x32xf32>, vector<8x32xf32>, vector<8x32xf32> -> vector<8x96xf32>
    %cst_189 = arith.constant dense<0.000000e+00> : vector<8x32xf32>
    %654 = tpu.matmul %653, %533, %cst_189 {dimension_numbers = #tpu.dot_dimension_numbers<[1], [0], [0], [1], [0, 0, 1, 1], [], []>} : vector<8x96xf32>, vector<96x32xf32>, vector<8x32xf32> -> vector<8x32xf32>
    %655 = vector.broadcast %539 : vector<1x32xf32> to vector<8x32xf32>
    %656 = arith.addf %654, %655 : vector<8x32xf32>
    %657 = arith.addf %656, %634 : vector<8x32xf32>
    %cst_190 = arith.constant 0.000000e+00 : f32
    %658 = vector.broadcast %cst_190 : f32 to vector<8x32xf32>
    %659 = arith.maximumf %657, %658 : vector<8x32xf32>
    %cst_191 = arith.constant 0.000000e+00 : f32
    %660 = vector.broadcast %cst_191 : f32 to vector<1x32xf32>
    %661 = tpu.concatenate %660, %659, %660 in 0 : vector<1x32xf32>, vector<8x32xf32>, vector<1x32xf32> -> vector<10x32xf32>
    %662 = vector.extract_strided_slice %661 {offsets = [0, 0], sizes = [8, 32], strides = [1, 1]} : vector<10x32xf32> to vector<8x32xf32>
    %663 = vector.extract_strided_slice %661 {offsets = [1, 0], sizes = [8, 32], strides = [1, 1]} : vector<10x32xf32> to vector<8x32xf32>
    %664 = vector.extract_strided_slice %661 {offsets = [2, 0], sizes = [8, 32], strides = [1, 1]} : vector<10x32xf32> to vector<8x32xf32>
    %665 = tpu.concatenate %662, %663, %664 in 1 : vector<8x32xf32>, vector<8x32xf32>, vector<8x32xf32> -> vector<8x96xf32>
    %cst_192 = arith.constant dense<0.000000e+00> : vector<8x32xf32>
    %666 = tpu.matmul %665, %523, %cst_192 {dimension_numbers = #tpu.dot_dimension_numbers<[1], [0], [0], [1], [0, 0, 1, 1], [], []>} : vector<8x96xf32>, vector<96x32xf32>, vector<8x32xf32> -> vector<8x32xf32>
    %667 = vector.broadcast %529 : vector<1x32xf32> to vector<8x32xf32>
    %668 = arith.addf %666, %667 : vector<8x32xf32>
    %cst_193 = arith.constant 0.000000e+00 : f32
    %669 = vector.broadcast %cst_193 : f32 to vector<8x32xf32>
    %670 = arith.maximumf %668, %669 : vector<8x32xf32>
    %cst_194 = arith.constant 0.000000e+00 : f32
    %671 = vector.broadcast %cst_194 : f32 to vector<1x32xf32>
    %672 = tpu.concatenate %671, %670, %671 in 0 : vector<1x32xf32>, vector<8x32xf32>, vector<1x32xf32> -> vector<10x32xf32>
    %673 = vector.extract_strided_slice %672 {offsets = [0, 0], sizes = [8, 32], strides = [1, 1]} : vector<10x32xf32> to vector<8x32xf32>
    %674 = vector.extract_strided_slice %672 {offsets = [1, 0], sizes = [8, 32], strides = [1, 1]} : vector<10x32xf32> to vector<8x32xf32>
    %675 = vector.extract_strided_slice %672 {offsets = [2, 0], sizes = [8, 32], strides = [1, 1]} : vector<10x32xf32> to vector<8x32xf32>
    %676 = tpu.concatenate %673, %674, %675 in 1 : vector<8x32xf32>, vector<8x32xf32>, vector<8x32xf32> -> vector<8x96xf32>
    %cst_195 = arith.constant dense<0.000000e+00> : vector<8x32xf32>
    %677 = tpu.matmul %676, %535, %cst_195 {dimension_numbers = #tpu.dot_dimension_numbers<[1], [0], [0], [1], [0, 0, 1, 1], [], []>} : vector<8x96xf32>, vector<96x32xf32>, vector<8x32xf32> -> vector<8x32xf32>
    %678 = vector.broadcast %541 : vector<1x32xf32> to vector<8x32xf32>
    %679 = arith.addf %677, %678 : vector<8x32xf32>
    %680 = arith.addf %679, %657 : vector<8x32xf32>
    %cst_196 = arith.constant 0.000000e+00 : f32
    %681 = vector.broadcast %cst_196 : f32 to vector<8x32xf32>
    %682 = arith.maximumf %680, %681 : vector<8x32xf32>
    %cst_197 = arith.constant 0.000000e+00 : f32
    %683 = vector.broadcast %cst_197 : f32 to vector<1x32xf32>
    %684 = tpu.concatenate %683, %682, %683 in 0 : vector<1x32xf32>, vector<8x32xf32>, vector<1x32xf32> -> vector<10x32xf32>
    %685 = vector.extract_strided_slice %684 {offsets = [0, 0], sizes = [8, 32], strides = [1, 1]} : vector<10x32xf32> to vector<8x32xf32>
    %686 = vector.extract_strided_slice %684 {offsets = [1, 0], sizes = [8, 32], strides = [1, 1]} : vector<10x32xf32> to vector<8x32xf32>
    %687 = vector.extract_strided_slice %684 {offsets = [2, 0], sizes = [8, 32], strides = [1, 1]} : vector<10x32xf32> to vector<8x32xf32>
    %688 = tpu.concatenate %685, %686, %687 in 1 : vector<8x32xf32>, vector<8x32xf32>, vector<8x32xf32> -> vector<8x96xf32>
    %cst_198 = arith.constant dense<0.000000e+00> : vector<8x32xf32>
    %689 = tpu.matmul %688, %525, %cst_198 {dimension_numbers = #tpu.dot_dimension_numbers<[1], [0], [0], [1], [0, 0, 1, 1], [], []>} : vector<8x96xf32>, vector<96x32xf32>, vector<8x32xf32> -> vector<8x32xf32>
    %690 = vector.broadcast %531 : vector<1x32xf32> to vector<8x32xf32>
    %691 = arith.addf %689, %690 : vector<8x32xf32>
    %cst_199 = arith.constant 0.000000e+00 : f32
    %692 = vector.broadcast %cst_199 : f32 to vector<8x32xf32>
    %693 = arith.maximumf %691, %692 : vector<8x32xf32>
    %cst_200 = arith.constant 0.000000e+00 : f32
    %694 = vector.broadcast %cst_200 : f32 to vector<1x32xf32>
    %695 = tpu.concatenate %694, %693, %694 in 0 : vector<1x32xf32>, vector<8x32xf32>, vector<1x32xf32> -> vector<10x32xf32>
    %696 = vector.extract_strided_slice %695 {offsets = [0, 0], sizes = [8, 32], strides = [1, 1]} : vector<10x32xf32> to vector<8x32xf32>
    %697 = vector.extract_strided_slice %695 {offsets = [1, 0], sizes = [8, 32], strides = [1, 1]} : vector<10x32xf32> to vector<8x32xf32>
    %698 = vector.extract_strided_slice %695 {offsets = [2, 0], sizes = [8, 32], strides = [1, 1]} : vector<10x32xf32> to vector<8x32xf32>
    %699 = tpu.concatenate %696, %697, %698 in 1 : vector<8x32xf32>, vector<8x32xf32>, vector<8x32xf32> -> vector<8x96xf32>
    %cst_201 = arith.constant dense<0.000000e+00> : vector<8x32xf32>
    %700 = tpu.matmul %699, %537, %cst_201 {dimension_numbers = #tpu.dot_dimension_numbers<[1], [0], [0], [1], [0, 0, 1, 1], [], []>} : vector<8x96xf32>, vector<96x32xf32>, vector<8x32xf32> -> vector<8x32xf32>
    %701 = vector.broadcast %543 : vector<1x32xf32> to vector<8x32xf32>
    %702 = arith.addf %700, %701 : vector<8x32xf32>
    %703 = arith.addf %702, %680 : vector<8x32xf32>
    %704 = vector.shape_cast %623 : vector<8x32xf32> to vector<1x8x32xf32>
    %705 = vector.shape_cast %703 : vector<8x32xf32> to vector<1x8x32xf32>
    %706 = tpu.concatenate %704, %705 in 0 : vector<1x8x32xf32>, vector<1x8x32xf32> -> vector<2x8x32xf32>
    %c0_202 = arith.constant 0 : index
    %c0_203 = arith.constant 0 : index
    %c0_204 = arith.constant 0 : index
    %707 = vector.load %arg11[%c0_202, %c0_203, %c0_204] : memref<2x8x32xf32, #tpu.memory_space<vmem>>, vector<2x8x32xf32>
    tpu.vector_store %arg11[%c0_202, %c0_203, %c0_204], %706 {strides = array<i32>} : memref<2x8x32xf32, #tpu.memory_space<vmem>>, vector<2x8x32xf32>,
    return
  }
}

</mosaic_0001>

<bundles_post_ra>
// kernel: base_model_forward.1
= control target key start
LH: loop header
LB: loop body
LE: loop exit
PB: predicated region body
PF: predicated region fallthrough
CT: control target
= control target key end

     0   :  { %v6931_v3 = vmov 0.0|0.0   ;;  %vm5571_vm0 = vmmov 0   ;;  %v6933_v6 = vmov 0.0   ;;  %s6912_s0 = inlined_call_operand.vmem [shape: f32[2,8,32], index: 0, kind: input, shape index: {}]   ;;  %s6913_s1 = inlined_call_operand.vmem [shape: f32[32,128], index: 1, kind: input, shape index: {}]   ;;  %s6914_s2 = inlined_call_operand.vmem [shape: f32[16,64], index: 2, kind: input, shape index: {}]   ;;  %s6915_s3 = inlined_call_operand.vmem [shape: f32[16,64], index: 3, kind: input, shape index: {}]   ;;  %s6916_s4 = inlined_call_operand.vmem [shape: f32[1,128], index: 4, kind: input, shape index: {}]   ;;  %s6917_s5 = inlined_call_operand.vmem [shape: f32[96,32], index: 5, kind: input, shape index: {}]   ;;  %s6918_s6 = inlined_call_operand.vmem [shape: f32[1,32], index: 6, kind: input, shape index: {}]   ;;  %s6919_s7 = inlined_call_operand.vmem [shape: f32[3,96,32], index: 7, kind: input, shape index: {}]   ;;  %s6920_s8 = inlined_call_operand.vmem [shape: f32[3,1,32], index: 8, kind: input, shape index: {}]   ;;  %s6921_s9 = inlined_call_operand.vmem [shape: f32[3,96,32], index: 9, kind: input, shape index: {}]   ;;  %s6922_s10 = inlined_call_operand.vmem [shape: f32[3,1,32], index: 10, kind: input, shape index: {}]   ;;  %s6923_s11 = inlined_call_operand.hbm [shape: f32[2,8,32], index: 11, kind: output, shape index: {}]  }
   0x1   :  { %v41_v0 = vld [vmem:[%s6913_s1] sm:$0xff]  ;;  %v42_v1 = vld [vmem:[%s6913_s1 + $0x8] sm:$0xff]  ;;  %v43_v2 = vld [vmem:[%s6913_s1 + $0x10] sm:$0xff]  ;;  %4967 = vmatprep.subr.bf16.mxu0 %v6931_v3  ;;  %4973 = vmatprep.subr.bf16.mxu1 %v6931_v3 }
   0x2   :  { %v4968_v4 = vpack.c.bf16 %v42_v1, %v41_v0  ;;  %v44_v5 = vld [vmem:[%s6913_s1 + $0x18] sm:$0xff]  ;;  %4463 = vmatprep.mubr.msk.f32.mxu0 %vm5571_vm0, %v6933_v6  ;;  %4474 = vmatprep.mubr.msk.f32.mxu1 %vm5571_vm0, %v6933_v6 }
   0x3   :  { %v4971_v7 = vpack.c.bf16 %v44_v5, %v43_v2 }
   0x4   :  { %4969 = vmatpush3.bf16.msra.mxu0 %v4968_v4  ;;  %4975 = vmatpush3.bf16.msra.mxu1 %v4968_v4 }
   0x5   :  { %16 = vsyncpa [#allocation4], 0  ;;  %4970 = vmatprep.subr.bf16.mxu0 %v6931_v3  ;;  %4976 = vmatprep.subr.bf16.mxu1 %v6931_v3  ;;  %v46_v8 = vld [vmem:[%s6914_s2] sm:$0xff]  ;;  %v47_v9 = vld [vmem:[%s6914_s2 + $0x8] sm:$0xff]  ;;  %vm50_vm1 = vcmask 261120   ;;  %s5573_s13 = smov 96  }
   0x6   :  { %v39_v10 = vld [vmem:[%s6912_s0] sm:$0xff]  ;;  %v5670_v11 = vpack.c.bf16 %v47_v9, %v46_v8  ;;  %v40_v12 = vld [vmem:[%s6912_s0 + $0x8] sm:$0xff]  ;;  %s5575_s14 = smov 32   ;;  %vm345_vm2 = vcmask 1041409   ;;  %s5576_s15 = smov 80   ;;  %vm205_vm3 = vcmask 130048  }
   0x7   :  { %v4095_v17 = vld [vmem:[%s6916_s4] ss:$0 sm:$0xff]  ;;  %s5574_s4 = smov 16   ;;  %vm341_vm4 = vcmask 122880   ;;  %vm637_vm5 = vcmask 124930   ;;  %vm935_vm6 = vcmask 126980  }
   0x8   :  { %4972 = vmatpush3.bf16.msra.mxu0 %v4971_v7  ;;  %4978 = vmatpush3.bf16.msra.mxu1 %v4971_v7  ;;  %vm1233_vm7 = vcmask 129030   ;;  %vm489_vm8 = vcmask 123905   ;;  %vm6928_vm9 = vcmask 255105   ;;  %vm786_vm10 = vcmask 125955  }
   0x9   :  { %4979 = vmatprep.subr.bf16.mxu0 %v6931_v3  ;;  %4982 = vmatprep.subr.bf16.mxu1 %v6931_v3  ;;  %vm2134_vm11 = vcmask 257155   ;;  %vm1084_vm12 = vcmask 128005   ;;  %vm1828_vm13 = vcmask 259205   ;;  %vm6925_vm14 = vcmask 130055  }
   0xa   :  { %vm6924_vm15 = vcmask 261255  }
   0xb   :  { %4464 = vmatmul.mubr.msk.f32.vlgmr.msra.gmra.mrb[0].mxu0 %vm50_vm1, %v39_v10  ;;  %4475 = vmatmul.mubr.msk.f32.vlgmr.msra.gmra.mrb[0].mxu1 %vm50_vm1, %v40_v12 }
   0xc   :  { %4981 = vmatpush3.bf16.msra.mxu0 %v5670_v11  ;;  %4481 = vmatprep.mubr.msk.f32.mxu0 %vm5571_vm0, %v6933_v6 }
   0xd   :  { %4984 = vmatpush3.bf16.msra.mxu1 %v5670_v11  ;;  %4488 = vmatprep.mubr.msk.f32.mxu1 %vm5571_vm0, %v6933_v6 }
   0xe   :  { %4985 = vmatprep.subr.bf16.mxu0 %v6931_v3  ;;  %4988 = vmatprep.subr.bf16.mxu1 %v6931_v3 }
   0xf   :  { %4482 = vmatmul.mubr.f32.vlgmr.msra.gmra.mrb[2].mxu0 %v6933_v6 }
  0x10   :  { %4987 = vmatpush3.bf16.msra.mxu0 %v5670_v11  ;;  %4495 = vmatprep.mubr.msk.f32.mxu0 %vm5571_vm0, %v6933_v6 }
  0x11   :  { %4991 = vmatprep.subr.bf16.mxu0 %v6931_v3 }
  0xde   :  { %v120_v13 = vpop.f32.mrb[0].mxu0  ;;  %v193_v14 = vpop.f32.mrb[0].mxu1 }
  0xdf   :  { %v4465_v15 = vpop.f32.mrb[1].mxu0  ;;  %v4476_v16 = vpop.f32.mrb[1].mxu1  ;;  %v5695_v18 = vadd.f32 %v4095_v17, %v193_v14  ;;  %v5698_v23 = vadd.f32 %v4095_v17, %v120_v13 }
  0xe2   :  { %v275_v19 = vpop.f32.mrb[2].mxu0 }
  0xe3   :  { %v280_v20 = vrot.slane %v275_v19, 1  ;;  %v4483_v21 = vpop.f32.mrb[3].mxu0  ;;  %v283_v24 = vadd.f32 %v275_v19, %v5698_v23 }
  0xe5   :  { %v284_v22 = vadd.f32 %v280_v20, %v5695_v18  ;;  %v4096_v28 = vmul.f32 -1.442695, %v283_v24 }
  0xe7   :  { %5290 = vtanh.f32 %v284_v22  ;;  %v4097_v27 = vmul.f32 -1.442695, %v284_v22 }
  0xe8   :  { %5292 = vtanh.f32 %v283_v24 }
  0xe9   :  { %5294 = vpow2.f32 %v4097_v27 }
  0xea   :  { %5296 = vpow2.f32 %v4096_v28 }
  0xf1   :  { %v5291_v25 = vpop.eup %5290 }
  0xf2   :  { %305 = vrot.lane.b32.xlu0 %v5291_v25, %s5573_s13  ;;  %v5293_v26 = vpop.eup %5292 }
  0xf3   :  { %v5295_v29 = vpop.eup %5294 }
  0xf4   :  { %v292_v30 = vadd.f32 1.0, %v5295_v29  ;;  %v5297_v31 = vpop.eup %5296 }
  0xf5   :  { %v291_v32 = vadd.f32 1.0, %v5297_v31 }
  0xf6   :  { %303 = vrot.lane.b32.xlu0 %v5293_v26, %s5573_s13  ;;  %5298 = vrcp.f32 %v292_v30 }
  0xf7   :  { %5300 = vrcp.f32 %v291_v32 }
 0x100   :  { %v5299_v33 = vpop.eup %5298 }
 0x101   :  { %v5301_v36 = vpop.eup %5300  ;;  %v300_v39 = vmul.f32 0.0, %v5299_v33 }
 0x102   :  { %v299_v42 = vmul.f32 0.0, %v5301_v36 }
 0x164   :  { %v306_v34 = vpop.permute.xlu0 %305 }
 0x165   :  { %v310_v35 = vmul.f32 %v5299_v33, %v306_v34 }
 0x167   :  { %315 = vrot.lane.b32.xlu1 %v310_v35, %s5574_s4 }
 0x168   :  { %v304_v37 = vpop.permute.xlu0 %303 }
 0x169   :  { %v309_v38 = vmul.f32 %v5301_v36, %v304_v37 }
 0x16b   :  { %313 = vrot.lane.b32.xlu1 %v309_v38, %s5574_s4 }
 0x1d9   :  { %v316_v40 = vpop.permute.xlu1 %315 }
 0x1da   :  { %v320_v41 = vadd.f32 %v316_v40, %v300_v39 }
 0x1dc   :  { %5302 = vtanh.f32 %v320_v41  ;;  %v444_v12 = vrot.slane %v320_v41, 7 }
 0x1dd   :  { %v314_v43 = vpop.permute.xlu1 %313 }
 0x1de   :  { %v319_v44 = vadd.f32 %v314_v43, %v299_v42 }
 0x1e0   :  { %5304 = vtanh.f32 %v319_v44  ;;  %v443_v14 = vrot.slane %v319_v44, 7 }
 0x1e6   :  { %v5303_v45 = vpop.eup %5302 }
 0x1e7   :  { %327 = vrot.lane.b32.xlu0 %v5303_v45, %s5575_s14 }
 0x1ea   :  { %v5305_v46 = vpop.eup %5304 }
 0x1eb   :  { %325 = vrot.lane.b32.xlu1 %v5305_v46, %s5575_s14 }
 0x259   :  { %v328_v47 = vpop.permute.xlu0 %327 }
 0x25a   :  { %v5707_v48 = vmul.f32 %v5299_v33, %v328_v47 }
 0x25c   :  { %v344_v50 = vrot.slane %v5707_v48, 7 }
 0x25d   :  { %v326_v49 = vpop.permute.xlu1 %325 }
 0x25e   :  { %v5710_v51 = vmul.f32 %v5301_v36, %v326_v49 }
 0x260   :  { %v346_v52 = vsel %vm345_vm2, %v344_v50, %v5710_v51 }
 0x261   :  { %347 = vrot.lane.b32.xlu0 %v346_v52, %s5576_s15 }
 0x2d3   :  { %v348_v53 = vpop.permute.xlu0 %347 }
 0x2d4   :  { %4489 = vmatmul.mubr.msk.f32.vlgmr.msra.gmra.mrb[2].mxu1 %vm205_vm3, %v348_v53 }
 0x2d5   :  { %4990 = vmatpush3.bf16.msra.mxu1 %v5670_v11  ;;  %4502 = vmatprep.mubr.msk.f32.mxu1 %vm5571_vm0, %v6933_v6 }
 0x2d6   :  { %4994 = vmatprep.subr.bf16.mxu1 %v6931_v3 }
 0x3a7   :  { %v417_v54 = vpop.f32.mrb[2].mxu1 }
 0x3a8   :  { %v422_v55 = vrot.slane %v417_v54, 7  ;;  %v426_v56 = vadd.f32 %v417_v54, %v5695_v18  ;;  %v4490_v57 = vpop.f32.mrb[3].mxu1 }
 0x3aa   :  { %v425_v58 = vadd.f32 %v422_v55, %v5698_v23  ;;  %5306 = vtanh.f32 %v426_v56  ;;  %v4100_v61 = vmul.f32 -1.442695, %v426_v56 }
 0x3ac   :  { %5308 = vtanh.f32 %v425_v58  ;;  %v4099_v62 = vmul.f32 -1.442695, %v425_v58 }
 0x3ad   :  { %5310 = vpow2.f32 %v4100_v61 }
 0x3ae   :  { %5312 = vpow2.f32 %v4099_v62 }
 0x3b4   :  { %v5307_v59 = vpop.eup %5306 }
 0x3b5   :  { %453 = vrot.lane.b32.xlu0 %v5307_v59, %s5573_s13 }
 0x3b6   :  { %v5309_v60 = vpop.eup %5308 }
 0x3b7   :  { %451 = vrot.lane.b32.xlu1 %v5309_v60, %s5573_s13  ;;  %v5311_v63 = vpop.eup %5310 }
 0x3b8   :  { %v5313_v0 = vpop.eup %5312  ;;  %v434_v1 = vadd.f32 1.0, %v5311_v63 }
 0x3b9   :  { %v433_v2 = vadd.f32 1.0, %v5313_v0 }
 0x3ba   :  { %5314 = vrcp.f32 %v434_v1 }
 0x3bb   :  { %5316 = vrcp.f32 %v433_v2 }
 0x3c4   :  { %v5315_v4 = vpop.eup %5314 }
 0x3c5   :  { %v5317_v8 = vpop.eup %5316  ;;  %v448_v13 = vmul.f32 %v5315_v4, %v444_v12 }
 0x3c6   :  { %v447_v17 = vmul.f32 %v5317_v8, %v443_v14 }
 0x427   :  { %v454_v5 = vpop.permute.xlu0 %453 }
 0x428   :  { %v458_v7 = vmul.f32 %v5315_v4, %v454_v5 }
 0x429   :  { %v452_v9 = vpop.permute.xlu1 %451 }
 0x42a   :  { %463 = vrot.lane.b32.xlu0 %v458_v7, %s5574_s4  ;;  %v457_v10 = vmul.f32 %v5317_v8, %v452_v9 }
 0x42c   :  { %461 = vrot.lane.b32.xlu1 %v457_v10, %s5574_s4 }
 0x49c   :  { %v464_v15 = vpop.permute.xlu0 %463 }
 0x49d   :  { %v468_v16 = vadd.f32 %v464_v15, %v448_v13 }
 0x49e   :  { %v462_v19 = vpop.permute.xlu1 %461 }
 0x49f   :  { %5318 = vtanh.f32 %v468_v16  ;;  %v467_v20 = vadd.f32 %v462_v19, %v447_v17  ;;  %v592_v54 = vrot.slane %v468_v16, 7 }
 0x4a1   :  { %5320 = vtanh.f32 %v467_v20  ;;  %v591_v53 = vrot.slane %v467_v20, 7 }
 0x4a9   :  { %v5319_v21 = vpop.eup %5318 }
 0x4aa   :  { %475 = vrot.lane.b32.xlu0 %v5319_v21, %s5575_s14 }
 0x4ab   :  { %v5321_v22 = vpop.eup %5320 }
 0x4ac   :  { %473 = vrot.lane.b32.xlu1 %v5321_v22, %s5575_s14 }
 0x51c   :  { %v476_v24 = vpop.permute.xlu0 %475 }
 0x51d   :  { %v5730_v27 = vmul.f32 %v5315_v4, %v476_v24 }
 0x51e   :  { %v474_v25 = vpop.permute.xlu1 %473 }
 0x51f   :  { %v5728_v26 = vmul.f32 %v5317_v8, %v474_v25 }
 0x521   :  { %v492_v28 = vrot.slane %v5728_v26, 1 }
 0x523   :  { %v493_v29 = vsel %vm345_vm2, %v5730_v27, %v492_v28 }
 0x524   :  { %494 = vrot.lane.b32.xlu1 %v493_v29, %s5576_s15 }
 0x596   :  { %v495_v30 = vpop.permute.xlu1 %494 }
 0x597   :  { %4496 = vmatmul.mubr.msk.f32.vlgmr.msra.gmra.mrb[4].mxu0 %vm205_vm3, %v495_v30 }
 0x598   :  { %4993 = vmatpush3.bf16.msra.mxu0 %v5670_v11  ;;  %4509 = vmatprep.mubr.msk.f32.mxu0 %vm5571_vm0, %v6933_v6 }
 0x599   :  { %4997 = vmatprep.subr.bf16.mxu0 %v6931_v3 }
 0x66a   :  { %v564_v31 = vpop.f32.mrb[4].mxu0 }
 0x66b   :  { %v569_v32 = vrot.slane %v564_v31, 6  ;;  %v570_v33 = vrot.slane %v564_v31, 7  ;;  %v4497_v34 = vpop.f32.mrb[5].mxu0 }
 0x66d   :  { %v573_v35 = vadd.f32 %v569_v32, %v5698_v23  ;;  %v574_v36 = vadd.f32 %v570_v33, %v5695_v18 }
 0x66f   :  { %5322 = vtanh.f32 %v573_v35  ;;  %v4102_v39 = vmul.f32 -1.442695, %v573_v35  ;;  %v4103_v40 = vmul.f32 -1.442695, %v574_v36 }
 0x670   :  { %5324 = vtanh.f32 %v574_v36 }
 0x671   :  { %5326 = vpow2.f32 %v4102_v39 }
 0x672   :  { %5328 = vpow2.f32 %v4103_v40 }
 0x679   :  { %v5323_v37 = vpop.eup %5322 }
 0x67a   :  { %v5325_v38 = vpop.eup %5324  ;;  %599 = vrot.lane.b32.xlu0 %v5323_v37, %s5573_s13 }
 0x67b   :  { %601 = vrot.lane.b32.xlu1 %v5325_v38, %s5573_s13  ;;  %v5327_v41 = vpop.eup %5326 }
 0x67c   :  { %v5329_v42 = vpop.eup %5328  ;;  %v581_v43 = vadd.f32 1.0, %v5327_v41 }
 0x67d   :  { %v582_v44 = vadd.f32 1.0, %v5329_v42 }
 0x67e   :  { %5330 = vrcp.f32 %v581_v43 }
 0x67f   :  { %5332 = vrcp.f32 %v582_v44 }
 0x688   :  { %v5331_v45 = vpop.eup %5330 }
 0x689   :  { %v5333_v47 = vpop.eup %5332  ;;  %v595_v55 = vmul.f32 %v5331_v45, %v591_v53 }
 0x68a   :  { %v596_v56 = vmul.f32 %v5333_v47, %v592_v54 }
 0x6ec   :  { %v600_v46 = vpop.permute.xlu0 %599 }
 0x6ed   :  { %v602_v49 = vpop.permute.xlu1 %601  ;;  %v605_v50 = vmul.f32 %v5331_v45, %v600_v46 }
 0x6ee   :  { %v606_v52 = vmul.f32 %v5333_v47, %v602_v49 }
 0x6ef   :  { %609 = vrot.lane.b32.xlu0 %v605_v50, %s5574_s4 }
 0x6f0   :  { %611 = vrot.lane.b32.xlu1 %v606_v52, %s5574_s4 }
 0x761   :  { %v610_v57 = vpop.permute.xlu0 %609 }
 0x762   :  { %v612_v58 = vpop.permute.xlu1 %611  ;;  %v615_v59 = vadd.f32 %v610_v57, %v595_v55 }
 0x763   :  { %v616_v60 = vadd.f32 %v612_v58, %v596_v56 }
 0x764   :  { %5334 = vtanh.f32 %v615_v59  ;;  %v740_v34 = vrot.slane %v615_v59, 7 }
 0x765   :  { %5336 = vtanh.f32 %v616_v60  ;;  %v741_v35 = vrot.slane %v616_v60, 7 }
 0x76e   :  { %v5335_v61 = vpop.eup %5334 }
 0x76f   :  { %v5337_v62 = vpop.eup %5336  ;;  %621 = vrot.lane.b32.xlu0 %v5335_v61, %s5575_s14 }
 0x770   :  { %623 = vrot.lane.b32.xlu1 %v5337_v62, %s5575_s14 }
 0x7e1   :  { %v622_v63 = vpop.permute.xlu0 %621 }
 0x7e2   :  { %v624_v0 = vpop.permute.xlu1 %623  ;;  %v5749_v1 = vmul.f32 %v5331_v45, %v622_v63 }
 0x7e3   :  { %v5751_v2 = vmul.f32 %v5333_v47, %v624_v0 }
 0x7e4   :  { %v640_v4 = vrot.slane %v5749_v1, 2 }
 0x7e5   :  { %v641_v5 = vrot.slane %v5751_v2, 1 }
 0x7e7   :  { %v642_v7 = vsel %vm345_vm2, %v641_v5, %v640_v4 }
 0x7e8   :  { %643 = vrot.lane.b32.xlu0 %v642_v7, %s5576_s15 }
 0x85a   :  { %v644_v8 = vpop.permute.xlu0 %643 }
 0x85b   :  { %4503 = vmatmul.mubr.msk.f32.vlgmr.msra.gmra.mrb[4].mxu1 %vm205_vm3, %v644_v8 }
 0x85c   :  { %4996 = vmatpush3.bf16.msra.mxu1 %v5670_v11  ;;  %4516 = vmatprep.mubr.msk.f32.mxu1 %vm5571_vm0, %v6933_v6 }
 0x85d   :  { %5000 = vmatprep.subr.bf16.mxu1 %v6931_v3 }
 0x92e   :  { %v713_v9 = vpop.f32.mrb[4].mxu1 }
 0x92f   :  { %v718_v10 = vrot.slane %v713_v9, 5  ;;  %v719_v12 = vrot.slane %v713_v9, 6  ;;  %v4504_v13 = vpop.f32.mrb[5].mxu1 }
 0x931   :  { %v722_v14 = vadd.f32 %v718_v10, %v5698_v23  ;;  %v723_v15 = vadd.f32 %v719_v12, %v5695_v18 }
 0x933   :  { %5338 = vtanh.f32 %v722_v14  ;;  %v4105_v19 = vmul.f32 -1.442695, %v722_v14  ;;  %v4106_v20 = vmul.f32 -1.442695, %v723_v15 }
 0x934   :  { %5340 = vtanh.f32 %v723_v15 }
 0x935   :  { %5342 = vpow2.f32 %v4105_v19 }
 0x936   :  { %5344 = vpow2.f32 %v4106_v20 }
 0x93d   :  { %v5339_v16 = vpop.eup %5338 }
 0x93e   :  { %v5341_v17 = vpop.eup %5340  ;;  %748 = vrot.lane.b32.xlu1 %v5339_v16, %s5573_s13 }
 0x93f   :  { %750 = vrot.lane.b32.xlu0 %v5341_v17, %s5573_s13  ;;  %v5343_v21 = vpop.eup %5342 }
 0x940   :  { %v5345_v22 = vpop.eup %5344  ;;  %v730_v24 = vadd.f32 1.0, %v5343_v21 }
 0x941   :  { %v731_v25 = vadd.f32 1.0, %v5345_v22 }
 0x942   :  { %5346 = vrcp.f32 %v730_v24 }
 0x943   :  { %5348 = vrcp.f32 %v731_v25 }
 0x94c   :  { %v5347_v28 = vpop.eup %5346 }
 0x94d   :  { %v5349_v30 = vpop.eup %5348  ;;  %v744_v36 = vmul.f32 %v5347_v28, %v740_v34 }
 0x94e   :  { %v745_v37 = vmul.f32 %v5349_v30, %v741_v35 }
 0x9b0   :  { %v749_v29 = vpop.permute.xlu1 %748 }
 0x9b1   :  { %v751_v31 = vpop.permute.xlu0 %750  ;;  %v754_v32 = vmul.f32 %v5347_v28, %v749_v29 }
 0x9b2   :  { %v755_v33 = vmul.f32 %v5349_v30, %v751_v31 }
 0x9b3   :  { %758 = vrot.lane.b32.xlu1 %v754_v32, %s5574_s4 }
 0x9b4   :  { %760 = vrot.lane.b32.xlu0 %v755_v33, %s5574_s4 }
 0xa25   :  { %v759_v38 = vpop.permute.xlu1 %758 }
 0xa26   :  { %v761_v39 = vpop.permute.xlu0 %760  ;;  %v764_v40 = vadd.f32 %v759_v38, %v744_v36 }
 0xa27   :  { %v765_v41 = vadd.f32 %v761_v39, %v745_v37 }
 0xa28   :  { %5350 = vtanh.f32 %v764_v40  ;;  %v889_v15 = vrot.slane %v764_v40, 7 }
 0xa29   :  { %5352 = vtanh.f32 %v765_v41  ;;  %v890_v16 = vrot.slane %v765_v41, 7 }
 0xa32   :  { %v5351_v42 = vpop.eup %5350 }
 0xa33   :  { %v5353_v43 = vpop.eup %5352  ;;  %770 = vrot.lane.b32.xlu1 %v5351_v42, %s5575_s14 }
 0xa34   :  { %772 = vrot.lane.b32.xlu0 %v5353_v43, %s5575_s14 }
 0xaa5   :  { %v771_v44 = vpop.permute.xlu1 %770 }
 0xaa6   :  { %v773_v45 = vpop.permute.xlu0 %772  ;;  %v5770_v46 = vmul.f32 %v5347_v28, %v771_v44 }
 0xaa7   :  { %v5772_v47 = vmul.f32 %v5349_v30, %v773_v45 }
 0xaa8   :  { %v789_v49 = vrot.slane %v5770_v46, 3 }
 0xaa9   :  { %v790_v50 = vrot.slane %v5772_v47, 2 }
 0xaab   :  { %v791_v52 = vsel %vm345_vm2, %v790_v50, %v789_v49 }
 0xaac   :  { %792 = vrot.lane.b32.xlu1 %v791_v52, %s5576_s15 }
 0xb1e   :  { %v793_v53 = vpop.permute.xlu1 %792 }
 0xb1f   :  { %4510 = vmatmul.mubr.msk.f32.vlgmr.msra.gmra.mrb[6].mxu0 %vm205_vm3, %v793_v53 }
 0xb20   :  { %4999 = vmatpush3.bf16.msra.mxu0 %v5670_v11  ;;  %4523 = vmatprep.mubr.msk.f32.mxu0 %vm5571_vm0, %v6933_v6 }
 0xb21   :  { %5003 = vmatprep.subr.bf16.mxu0 %v6931_v3 }
 0xbf2   :  { %v862_v54 = vpop.f32.mrb[6].mxu0 }
 0xbf3   :  { %v867_v55 = vrot.slane %v862_v54, 4  ;;  %v868_v56 = vrot.slane %v862_v54, 5  ;;  %v4511_v57 = vpop.f32.mrb[7].mxu0 }
 0xbf5   :  { %v871_v58 = vadd.f32 %v867_v55, %v5698_v23  ;;  %v872_v59 = vadd.f32 %v868_v56, %v5695_v18 }
 0xbf7   :  { %5354 = vtanh.f32 %v871_v58  ;;  %v4108_v62 = vmul.f32 -1.442695, %v871_v58  ;;  %v4109_v63 = vmul.f32 -1.442695, %v872_v59 }
 0xbf8   :  { %5356 = vtanh.f32 %v872_v59 }
 0xbf9   :  { %5358 = vpow2.f32 %v4108_v62 }
 0xbfa   :  { %5360 = vpow2.f32 %v4109_v63 }
 0xc01   :  { %v5355_v60 = vpop.eup %5354 }
 0xc02   :  { %v5357_v61 = vpop.eup %5356  ;;  %897 = vrot.lane.b32.xlu0 %v5355_v60, %s5573_s13 }
 0xc03   :  { %899 = vrot.lane.b32.xlu1 %v5357_v61, %s5573_s13  ;;  %v5359_v0 = vpop.eup %5358 }
 0xc04   :  { %v5361_v4 = vpop.eup %5360  ;;  %v879_v5 = vadd.f32 1.0, %v5359_v0 }
 0xc05   :  { %v880_v7 = vadd.f32 1.0, %v5361_v4 }
 0xc06   :  { %5362 = vrcp.f32 %v879_v5 }
 0xc07   :  { %5364 = vrcp.f32 %v880_v7 }
 0xc10   :  { %v5363_v8 = vpop.eup %5362 }
 0xc11   :  { %v5365_v10 = vpop.eup %5364  ;;  %v893_v17 = vmul.f32 %v5363_v8, %v889_v15 }
 0xc12   :  { %v894_v19 = vmul.f32 %v5365_v10, %v890_v16 }
 0xc74   :  { %v898_v9 = vpop.permute.xlu0 %897 }
 0xc75   :  { %v900_v12 = vpop.permute.xlu1 %899  ;;  %v903_v13 = vmul.f32 %v5363_v8, %v898_v9 }
 0xc76   :  { %v904_v14 = vmul.f32 %v5365_v10, %v900_v12 }
 0xc77   :  { %907 = vrot.lane.b32.xlu0 %v903_v13, %s5574_s4 }
 0xc78   :  { %909 = vrot.lane.b32.xlu1 %v904_v14, %s5574_s4 }
 0xce9   :  { %v908_v20 = vpop.permute.xlu0 %907 }
 0xcea   :  { %v910_v21 = vpop.permute.xlu1 %909  ;;  %v913_v22 = vadd.f32 %v908_v20, %v893_v17  ;;  %v49_v20 = vld [vmem:[%s6915_s3 + $0x8] sm:$0xff] }
 0xceb   :  { %v914_v24 = vadd.f32 %v910_v21, %v894_v19  ;;  %v48_v19 = vld [vmem:[%s6915_s3] sm:$0xff]  ;;  %s5577_s3 = smov 64  }
 0xcec   :  { %5366 = vtanh.f32 %v913_v22  ;;  %v1038_v60 = vrot.slane %v913_v22, 7  ;;  %v5832_v21 = vpack.c.bf16 %v49_v20, %v48_v19 }
 0xced   :  { %5368 = vtanh.f32 %v914_v24  ;;  %v1039_v61 = vrot.slane %v914_v24, 7 }
 0xcf6   :  { %v5367_v25 = vpop.eup %5366 }
 0xcf7   :  { %v5369_v28 = vpop.eup %5368  ;;  %919 = vrot.lane.b32.xlu0 %v5367_v25, %s5575_s14 }
 0xcf8   :  { %921 = vrot.lane.b32.xlu1 %v5369_v28, %s5575_s14 }
 0xd69   :  { %v920_v29 = vpop.permute.xlu0 %919 }
 0xd6a   :  { %v922_v30 = vpop.permute.xlu1 %921  ;;  %v5791_v31 = vmul.f32 %v5363_v8, %v920_v29 }
 0xd6b   :  { %v5793_v32 = vmul.f32 %v5365_v10, %v922_v30 }
 0xd6c   :  { %v938_v33 = vrot.slane %v5791_v31, 4 }
 0xd6d   :  { %v939_v34 = vrot.slane %v5793_v32, 3 }
 0xd6f   :  { %v940_v35 = vsel %vm345_vm2, %v939_v34, %v938_v33 }
 0xd70   :  { %941 = vrot.lane.b32.xlu0 %v940_v35, %s5576_s15 }
 0xde2   :  { %v942_v36 = vpop.permute.xlu0 %941 }
 0xde3   :  { %4517 = vmatmul.mubr.msk.f32.vlgmr.msra.gmra.mrb[6].mxu1 %vm205_vm3, %v942_v36 }
 0xde4   :  { %5002 = vmatpush3.bf16.msra.mxu1 %v5670_v11  ;;  %4530 = vmatprep.mubr.msk.f32.mxu1 %vm5571_vm0, %v6933_v6 }
 0xde5   :  { %5006 = vmatprep.subr.bf16.mxu1 %v6931_v3 }
 0xeb6   :  { %v1011_v37 = vpop.f32.mrb[6].mxu1 }
 0xeb7   :  { %v1016_v38 = vrot.slane %v1011_v37, 3  ;;  %v1017_v39 = vrot.slane %v1011_v37, 4  ;;  %v4518_v40 = vpop.f32.mrb[7].mxu1 }
 0xeb9   :  { %v1020_v41 = vadd.f32 %v1016_v38, %v5698_v23  ;;  %v1021_v42 = vadd.f32 %v1017_v39, %v5695_v18 }
 0xebb   :  { %5370 = vtanh.f32 %v1020_v41  ;;  %v4111_v11 = vmul.f32 -1.442695, %v1020_v41  ;;  %v4112_v45 = vmul.f32 -1.442695, %v1021_v42 }
 0xebc   :  { %5372 = vtanh.f32 %v1021_v42 }
 0xebd   :  { %5374 = vpow2.f32 %v4111_v11 }
 0xebe   :  { %5376 = vpow2.f32 %v4112_v45 }
 0xec5   :  { %v5371_v43 = vpop.eup %5370 }
 0xec6   :  { %v5373_v44 = vpop.eup %5372  ;;  %1046 = vrot.lane.b32.xlu1 %v5371_v43, %s5573_s13 }
 0xec7   :  { %1048 = vrot.lane.b32.xlu0 %v5373_v44, %s5573_s13  ;;  %v5375_v49 = vpop.eup %5374 }
 0xec8   :  { %v5377_v50 = vpop.eup %5376  ;;  %v1028_v52 = vadd.f32 1.0, %v5375_v49 }
 0xec9   :  { %v1029_v53 = vadd.f32 1.0, %v5377_v50 }
 0xeca   :  { %5378 = vrcp.f32 %v1028_v52 }
 0xecb   :  { %5380 = vrcp.f32 %v1029_v53 }
 0xed4   :  { %v5379_v54 = vpop.eup %5378 }
 0xed5   :  { %v5381_v56 = vpop.eup %5380  ;;  %v1042_v62 = vmul.f32 %v5379_v54, %v1038_v60 }
 0xed6   :  { %v1043_v63 = vmul.f32 %v5381_v56, %v1039_v61 }
 0xf38   :  { %v1047_v55 = vpop.permute.xlu1 %1046 }
 0xf39   :  { %v1049_v57 = vpop.permute.xlu0 %1048  ;;  %v1052_v58 = vmul.f32 %v5379_v54, %v1047_v55 }
 0xf3a   :  { %v1053_v59 = vmul.f32 %v5381_v56, %v1049_v57 }
 0xf3b   :  { %1056 = vrot.lane.b32.xlu1 %v1052_v58, %s5574_s4 }
 0xf3c   :  { %1058 = vrot.lane.b32.xlu0 %v1053_v59, %s5574_s4 }
 0xfad   :  { %v1057_v0 = vpop.permute.xlu1 %1056 }
 0xfae   :  { %v1059_v4 = vpop.permute.xlu0 %1058  ;;  %v5810_v5 = vadd.f32 %v1057_v0, %v1042_v62 }
 0xfaf   :  { %v5812_v7 = vadd.f32 %v1059_v4, %v1043_v63 }
 0xfb0   :  { %5382 = vtanh.f32 %v5810_v5 }
 0xfb1   :  { %5384 = vtanh.f32 %v5812_v7  ;;  %v1188_v19 = vrot.slane %v5812_v7, 7 }
 0xfba   :  { %v5383_v8 = vpop.eup %5382 }
 0xfbb   :  { %v5385_v9 = vpop.eup %5384  ;;  %1068 = vrot.lane.b32.xlu1 %v5383_v8, %s5575_s14 }
 0xfbc   :  { %1070 = vrot.lane.b32.xlu0 %v5385_v9, %s5575_s14 }
0x102d   :  { %v1069_v10 = vpop.permute.xlu1 %1068 }
0x102e   :  { %v1071_v12 = vpop.permute.xlu0 %1070  ;;  %v5818_v13 = vmul.f32 %v5379_v54, %v1069_v10 }
0x102f   :  { %v5820_v14 = vmul.f32 %v5381_v56, %v1071_v12 }
0x1030   :  { %v1087_v15 = vrot.slane %v5818_v13, 5 }
0x1031   :  { %v1088_v16 = vrot.slane %v5820_v14, 4 }
0x1033   :  { %v1089_v17 = vsel %vm345_vm2, %v1088_v16, %v1087_v15  ;;  %v1187_v15 = vrot.slane %v5810_v5, 7 }
0x1034   :  { %1090 = vrot.lane.b32.xlu1 %v1089_v17, %s5576_s15 }
0x10a6   :  { %v1091_v22 = vpop.permute.xlu1 %1090 }
0x10a7   :  { %4524 = vmatmul.mubr.msk.f32.vlgmr.msra.gmra.mrb[8].mxu0 %vm205_vm3, %v1091_v22 }
0x10a8   :  { %5005 = vmatpush3.bf16.msra.mxu0 %v5832_v21  ;;  %4537 = vmatprep.mubr.msk.f32.mxu0 %vm5571_vm0, %v6933_v6 }
0x10a9   :  { %5009 = vmatprep.subr.bf16.mxu0 %v6931_v3 }
0x10ab   :  { %4538 = vmatmul.mubr.f32.vlgmr.msra.gmra.mrb[10].mxu0 %v6933_v6 }
0x10ac   :  { %5011 = vmatpush3.bf16.msra.mxu0 %v5832_v21  ;;  %4551 = vmatprep.mubr.msk.f32.mxu0 %vm5571_vm0, %v6933_v6 }
0x10ad   :  { %5015 = vmatprep.subr.bf16.mxu0 %v6931_v3 }
0x117a   :  { %v1160_v24 = vpop.f32.mrb[8].mxu0 }
0x117b   :  { %v1165_v25 = vrot.slane %v1160_v24, 2  ;;  %v1166_v28 = vrot.slane %v1160_v24, 3  ;;  %v4525_v29 = vpop.f32.mrb[9].mxu0 }
0x117d   :  { %v1169_v30 = vadd.f32 %v1165_v25, %v5698_v23  ;;  %v1170_v33 = vadd.f32 %v1166_v28, %v5695_v18 }
0x117e   :  { %v1451_v34 = vpop.f32.mrb[10].mxu0 }
0x117f   :  { %5386 = vtanh.f32 %v1169_v30  ;;  %v1456_v35 = vrot.slane %v1451_v34, 1  ;;  %v4539_v36 = vpop.f32.mrb[11].mxu0  ;;  %v1457_v37 = vrot.slane %v1451_v34, 2  ;;  %v4114_v40 = vmul.f32 -1.442695, %v1169_v30 }
0x1180   :  { %5388 = vtanh.f32 %v1170_v33  ;;  %v4115_v41 = vmul.f32 -1.442695, %v1170_v33 }
0x1181   :  { %1458 = vrot.lane.b32.xlu0 %v1456_v35, %s5577_s3  ;;  %1460 = vrot.lane.b32.xlu1 %v1457_v37, %s5577_s3  ;;  %5390 = vpow2.f32 %v4114_v40 }
0x1182   :  { %5392 = vpow2.f32 %v4115_v41 }
0x1189   :  { %v5387_v38 = vpop.eup %5386 }
0x118a   :  { %v5389_v39 = vpop.eup %5388  ;;  %1195 = vrot.lane.b32.xlu0 %v5387_v38, %s5573_s13 }
0x118b   :  { %1197 = vrot.lane.b32.xlu1 %v5389_v39, %s5573_s13  ;;  %v5391_v42 = vpop.eup %5390 }
0x118c   :  { %v5393_v43 = vpop.eup %5392  ;;  %v1177_v11 = vadd.f32 1.0, %v5391_v42 }
0x118d   :  { %v1178_v50 = vadd.f32 1.0, %v5393_v43 }
0x11f3   :  { %v1459_v44 = vpop.permute.xlu0 %1458  ;;  %v1461_v45 = vpop.permute.xlu1 %1460 }
0x11f4   :  { %v1464_v49 = vadd.f32 %v1459_v44, %v5698_v23  ;;  %v1465_v52 = vadd.f32 %v1461_v45, %v5695_v18 }
0x11f6   :  { %5394 = vtanh.f32 %v1464_v49  ;;  %v4119_v61 = vmul.f32 -1.442695, %v1464_v49  ;;  %v4120_v62 = vmul.f32 -1.442695, %v1465_v52 }
0x11f7   :  { %5396 = vtanh.f32 %v1465_v52 }
0x11f8   :  { %5398 = vrcp.f32 %v1177_v11 }
0x11f9   :  { %5400 = vrcp.f32 %v1178_v50 }
0x11fa   :  { %5402 = vpow2.f32 %v4119_v61 }
0x11fb   :  { %5404 = vpow2.f32 %v4120_v62 }
0x11fc   :  { %v1196_v54 = vpop.permute.xlu0 %1195 }
0x11fd   :  { %v1198_v56 = vpop.permute.xlu1 %1197 }
0x1200   :  { %v5395_v53 = vpop.eup %5394 }
0x1201   :  { %v5397_v55 = vpop.eup %5396  ;;  %1484 = vrot.lane.b32.xlu0 %v5395_v53, %s5573_s13 }
0x1202   :  { %v5399_v57 = vpop.eup %5398  ;;  %1486 = vrot.lane.b32.xlu1 %v5397_v55, %s5573_s13 }
0x1203   :  { %v5401_v58 = vpop.eup %5400  ;;  %v1201_v59 = vmul.f32 %v5399_v57, %v1196_v54  ;;  %v1191_v22 = vmul.f32 %v5399_v57, %v1187_v15 }
0x1204   :  { %v1202_v60 = vmul.f32 %v5401_v58, %v1198_v56  ;;  %v5403_v63 = vpop.eup %5402  ;;  %v1192_v24 = vmul.f32 %v5401_v58, %v1188_v19 }
0x1205   :  { %1205 = vrot.lane.b32.xlu0 %v1201_v59, %s5574_s4  ;;  %v5405_v0 = vpop.eup %5404  ;;  %v1472_v4 = vadd.f32 1.0, %v5403_v63 }
0x1206   :  { %1207 = vrot.lane.b32.xlu1 %v1202_v60, %s5574_s4  ;;  %v1473_v8 = vadd.f32 1.0, %v5405_v0 }
0x1207   :  { %5406 = vrcp.f32 %v1472_v4 }
0x1208   :  { %5408 = vrcp.f32 %v1473_v8 }
0x1211   :  { %v5407_v9 = vpop.eup %5406 }
0x1212   :  { %v5409_v12 = vpop.eup %5408  ;;  %v1480_v7 = vmul.f32 0.0, %v5407_v9 }
0x1213   :  { %v1481_v34 = vmul.f32 0.0, %v5409_v12 }
0x1273   :  { %v1485_v10 = vpop.permute.xlu0 %1484 }
0x1274   :  { %v1487_v16 = vpop.permute.xlu1 %1486  ;;  %v1490_v17 = vmul.f32 %v5407_v9, %v1485_v10 }
0x1275   :  { %v1491_v20 = vmul.f32 %v5409_v12, %v1487_v16 }
0x1276   :  { %1494 = vrot.lane.b32.xlu0 %v1490_v17, %s5574_s4 }
0x1277   :  { %1496 = vrot.lane.b32.xlu1 %v1491_v20, %s5574_s4  ;;  %v1206_v25 = vpop.permute.xlu0 %1205 }
0x1278   :  { %v1208_v28 = vpop.permute.xlu1 %1207  ;;  %v5860_v29 = vadd.f32 %v1206_v25, %v1191_v22 }
0x1279   :  { %v5862_v30 = vadd.f32 %v1208_v28, %v1192_v24 }
0x127a   :  { %5410 = vtanh.f32 %v5860_v29 }
0x127b   :  { %5412 = vtanh.f32 %v5862_v30 }
0x1284   :  { %v5411_v5 = vpop.eup %5410 }
0x1285   :  { %v5413_v33 = vpop.eup %5412  ;;  %1217 = vrot.lane.b32.xlu0 %v5411_v5, %s5575_s14 }
0x1286   :  { %1219 = vrot.lane.b32.xlu1 %v5413_v33, %s5575_s14 }
0x12e8   :  { %v1495_v35 = vpop.permute.xlu0 %1494 }
0x12e9   :  { %v1497_v36 = vpop.permute.xlu1 %1496  ;;  %v5868_v37 = vadd.f32 %v1495_v35, %v1480_v7 }
0x12ea   :  { %v5870_v38 = vadd.f32 %v1497_v36, %v1481_v34 }
0x12eb   :  { %5414 = vtanh.f32 %v5868_v37 }
0x12ec   :  { %5416 = vtanh.f32 %v5870_v38  ;;  %v1630_v36 = vrot.slane %v5870_v38, 1 }
0x12f5   :  { %v5415_v39 = vpop.eup %5414 }
0x12f6   :  { %v5417_v40 = vpop.eup %5416  ;;  %1506 = vrot.lane.b32.xlu0 %v5415_v39, %s5575_s14  ;;  %v1629_v39 = vrot.slane %v5868_v37, 1 }
0x12f7   :  { %1508 = vrot.lane.b32.xlu1 %v5417_v40, %s5575_s14  ;;  %v1218_v41 = vpop.permute.xlu0 %1217 }
0x12f8   :  { %v1220_v42 = vpop.permute.xlu1 %1219  ;;  %v5876_v43 = vmul.f32 %v5399_v57, %v1218_v41 }
0x12f9   :  { %v5878_v44 = vmul.f32 %v5401_v58, %v1220_v42 }
0x12fa   :  { %v1236_v11 = vrot.slane %v5876_v43, 6 }
0x12fb   :  { %v1237_v45 = vrot.slane %v5878_v44, 5 }
0x12fd   :  { %v1238_v49 = vsel %vm345_vm2, %v1237_v45, %v1236_v11 }
0x12fe   :  { %1239 = vrot.lane.b32.xlu0 %v1238_v49, %s5576_s15 }
0x1368   :  { %v1507_v50 = vpop.permute.xlu0 %1506 }
0x1369   :  { %v1509_v52 = vpop.permute.xlu1 %1508  ;;  %v5884_v53 = vmul.f32 %v5407_v9, %v1507_v50 }
0x136a   :  { %v5886_v54 = vmul.f32 %v5409_v12, %v1509_v52 }
0x136b   :  { %v1525_v55 = vrot.slane %v5884_v53, 7 }
0x136c   :  { %v1526_v56 = vrot.slane %v5886_v54, 6 }
0x136e   :  { %v1527_v57 = vsel %vm345_vm2, %v1526_v56, %v1525_v55 }
0x136f   :  { %1528 = vrot.lane.b32.xlu1 %v1527_v57, %s5574_s4 }
0x1370   :  { %v1240_v58 = vpop.permute.xlu0 %1239 }
0x1371   :  { %4531 = vmatmul.mubr.msk.f32.vlgmr.msra.gmra.mrb[8].mxu1 %vm205_vm3, %v1240_v58 }
0x1372   :  { %5008 = vmatpush3.bf16.msra.mxu1 %v5832_v21  ;;  %4544 = vmatprep.mubr.msk.f32.mxu1 %vm5571_vm0, %v6933_v6 }
0x1373   :  { %5012 = vmatprep.subr.bf16.mxu1 %v6931_v3 }
0x13e1   :  { %v1529_v59 = vpop.permute.xlu1 %1528 }
0x13e2   :  { %4545 = vmatmul.mubr.msk.f32.vlgmr.msra.gmra.mrb[10].mxu1 %vm205_vm3, %v1529_v59 }
0x13e3   :  { %5014 = vmatpush3.bf16.msra.mxu1 %v5832_v21  ;;  %4558 = vmatprep.mubr.msk.f32.mxu1 %vm5571_vm0, %v6933_v6 }
0x13e4   :  { %5018 = vmatprep.subr.bf16.mxu1 %v6931_v3 }
0x1444   :  { %v5902_v60 = vpop.f32.mrb[8].mxu1 }
0x1445   :  { %v4532_v61 = vpop.f32.mrb[9].mxu1 }
0x14b5   :  { %v1598_v62 = vpop.f32.mrb[10].mxu1 }
0x14b6   :  { %v1603_v63 = vrot.slane %v1598_v62, 2  ;;  %v1604_v0 = vrot.slane %v1598_v62, 3  ;;  %v4546_v4 = vpop.f32.mrb[11].mxu1 }
0x14b8   :  { %1607 = vrot.lane.b32.xlu1 %v1604_v0, %s5577_s3  ;;  %1605 = vrot.lane.b32.xlu0 %v1603_v63, %s5577_s3 }
0x152a   :  { %v1608_v8 = vpop.permute.xlu1 %1607  ;;  %v1606_v9 = vpop.permute.xlu0 %1605 }
0x152b   :  { %v1612_v10 = vadd.f32 %v1608_v8, %v5695_v18  ;;  %v1611_v12 = vadd.f32 %v1606_v9, %v5698_v23 }
0x152d   :  { %5418 = vtanh.f32 %v1612_v10  ;;  %v4123_v17 = vmul.f32 -1.442695, %v1612_v10  ;;  %v4122_v19 = vmul.f32 -1.442695, %v1611_v12 }
0x152e   :  { %5420 = vtanh.f32 %v1611_v12 }
0x152f   :  { %5422 = vpow2.f32 %v4123_v17 }
0x1530   :  { %5424 = vpow2.f32 %v4122_v19 }
0x1537   :  { %v5419_v15 = vpop.eup %5418 }
0x1538   :  { %v5421_v16 = vpop.eup %5420  ;;  %1639 = vrot.lane.b32.xlu1 %v5419_v15, %s5573_s13 }
0x1539   :  { %1637 = vrot.lane.b32.xlu0 %v5421_v16, %s5573_s13  ;;  %v5423_v20 = vpop.eup %5422 }
0x153a   :  { %v5425_v22 = vpop.eup %5424  ;;  %v1620_v24 = vadd.f32 1.0, %v5423_v20 }
0x153b   :  { %v1619_v25 = vadd.f32 1.0, %v5425_v22 }
0x153c   :  { %5426 = vrcp.f32 %v1620_v24 }
0x153d   :  { %5428 = vrcp.f32 %v1619_v25 }
0x1546   :  { %v5427_v28 = vpop.eup %5426 }
0x1547   :  { %v5429_v33 = vpop.eup %5428  ;;  %v1634_v40 = vmul.f32 %v5427_v28, %v1630_v36 }
0x1548   :  { %v1633_v42 = vmul.f32 %v5429_v33, %v1629_v39 }
0x15aa   :  { %v1640_v5 = vpop.permute.xlu1 %1639 }
0x15ab   :  { %v1644_v7 = vmul.f32 %v5427_v28, %v1640_v5  ;;  %v1638_v34 = vpop.permute.xlu0 %1637 }
0x15ac   :  { %v1643_v35 = vmul.f32 %v5429_v33, %v1638_v34 }
0x15ad   :  { %1649 = vrot.lane.b32.xlu1 %v1644_v7, %s5574_s4 }
0x15ae   :  { %1647 = vrot.lane.b32.xlu0 %v1643_v35, %s5574_s4 }
0x161f   :  { %v1650_v41 = vpop.permute.xlu1 %1649 }
0x1620   :  { %v1654_v11 = vadd.f32 %v1650_v41, %v1634_v40  ;;  %v1648_v45 = vpop.permute.xlu0 %1647 }
0x1621   :  { %v1653_v49 = vadd.f32 %v1648_v45, %v1633_v42 }
0x1622   :  { %5430 = vtanh.f32 %v1654_v11  ;;  %v1783_v36 = vrot.slane %v1654_v11, 1 }
0x1623   :  { %5432 = vtanh.f32 %v1653_v49  ;;  %v1782_v39 = vrot.slane %v1653_v49, 1 }
0x162c   :  { %v5431_v50 = vpop.eup %5430 }
0x162d   :  { %v5433_v52 = vpop.eup %5432  ;;  %1661 = vrot.lane.b32.xlu1 %v5431_v50, %s5575_s14 }
0x162e   :  { %1659 = vrot.lane.b32.xlu0 %v5433_v52, %s5575_s14 }
0x169f   :  { %v1662_v55 = vpop.permute.xlu1 %1661 }
0x16a0   :  { %v5916_v56 = vmul.f32 %v5427_v28, %v1662_v55  ;;  %v1660_v38 = vpop.permute.xlu0 %1659 }
0x16a1   :  { %v5918_v57 = vmul.f32 %v5429_v33, %v1660_v38 }
0x16a2   :  { %v1679_v37 = vrot.slane %v5916_v56, 5 }
0x16a3   :  { %v1678_v58 = vrot.slane %v5918_v57, 6 }
0x16a5   :  { %v1680_v59 = vsel %vm345_vm2, %v1679_v37, %v1678_v58 }
0x16a6   :  { %1681 = vrot.lane.b32.xlu0 %v1680_v59, %s5574_s4 }
0x1718   :  { %v1682_v61 = vpop.permute.xlu0 %1681 }
0x1719   :  { %4552 = vmatmul.mubr.msk.f32.vlgmr.msra.gmra.mrb[12].mxu0 %vm205_vm3, %v1682_v61 }
0x171a   :  { %5017 = vmatpush3.bf16.msra.mxu0 %v5832_v21  ;;  %4565 = vmatprep.mubr.msk.f32.mxu0 %vm5571_vm0, %v6933_v6 }
0x171b   :  { %5021 = vmatprep.subr.bf16.mxu0 %v6931_v3 }
0x17ec   :  { %v1751_v62 = vpop.f32.mrb[12].mxu0 }
0x17ed   :  { %v1756_v63 = vrot.slane %v1751_v62, 3  ;;  %v1757_v0 = vrot.slane %v1751_v62, 4  ;;  %v4553_v4 = vpop.f32.mrb[13].mxu0 }
0x17ef   :  { %1760 = vrot.lane.b32.xlu0 %v1757_v0, %s5577_s3  ;;  %1758 = vrot.lane.b32.xlu1 %v1756_v63, %s5577_s3 }
0x1861   :  { %v1761_v8 = vpop.permute.xlu0 %1760  ;;  %v1759_v9 = vpop.permute.xlu1 %1758 }
0x1862   :  { %v1765_v10 = vadd.f32 %v1761_v8, %v5695_v18  ;;  %v1764_v12 = vadd.f32 %v1759_v9, %v5698_v23 }
0x1864   :  { %5434 = vtanh.f32 %v1765_v10  ;;  %v4126_v17 = vmul.f32 -1.442695, %v1765_v10  ;;  %v4125_v19 = vmul.f32 -1.442695, %v1764_v12 }
0x1865   :  { %5436 = vtanh.f32 %v1764_v12 }
0x1866   :  { %5438 = vpow2.f32 %v4126_v17 }
0x1867   :  { %5440 = vpow2.f32 %v4125_v19 }
0x186e   :  { %v5435_v15 = vpop.eup %5434 }
0x186f   :  { %v5437_v16 = vpop.eup %5436  ;;  %1792 = vrot.lane.b32.xlu0 %v5435_v15, %s5573_s13 }
0x1870   :  { %1790 = vrot.lane.b32.xlu1 %v5437_v16, %s5573_s13  ;;  %v5439_v20 = vpop.eup %5438 }
0x1871   :  { %v5441_v22 = vpop.eup %5440  ;;  %v1773_v24 = vadd.f32 1.0, %v5439_v20 }
0x1872   :  { %v1772_v25 = vadd.f32 1.0, %v5441_v22 }
0x1873   :  { %5442 = vrcp.f32 %v1773_v24 }
0x1874   :  { %5444 = vrcp.f32 %v1772_v25 }
0x187d   :  { %v5443_v28 = vpop.eup %5442 }
0x187e   :  { %v5445_v33 = vpop.eup %5444  ;;  %v1787_v40 = vmul.f32 %v5443_v28, %v1783_v36 }
0x187f   :  { %v1786_v42 = vmul.f32 %v5445_v33, %v1782_v39 }
0x18e1   :  { %v1793_v5 = vpop.permute.xlu0 %1792 }
0x18e2   :  { %v1797_v7 = vmul.f32 %v5443_v28, %v1793_v5  ;;  %v1791_v34 = vpop.permute.xlu1 %1790 }
0x18e3   :  { %v1796_v35 = vmul.f32 %v5445_v33, %v1791_v34 }
0x18e4   :  { %1802 = vrot.lane.b32.xlu0 %v1797_v7, %s5574_s4 }
0x18e5   :  { %1800 = vrot.lane.b32.xlu1 %v1796_v35, %s5574_s4 }
0x1956   :  { %v1803_v41 = vpop.permute.xlu0 %1802 }
0x1957   :  { %v1807_v45 = vadd.f32 %v1803_v41, %v1787_v40  ;;  %v1801_v50 = vpop.permute.xlu1 %1800 }
0x1958   :  { %v1806_v52 = vadd.f32 %v1801_v50, %v1786_v42 }
0x1959   :  { %5446 = vtanh.f32 %v1807_v45  ;;  %v1936_v40 = vrot.slane %v1807_v45, 1 }
0x195a   :  { %5448 = vtanh.f32 %v1806_v52  ;;  %v1935_v41 = vrot.slane %v1806_v52, 1 }
0x1963   :  { %v5447_v55 = vpop.eup %5446 }
0x1964   :  { %v5449_v38 = vpop.eup %5448  ;;  %1814 = vrot.lane.b32.xlu0 %v5447_v55, %s5575_s14 }
0x1965   :  { %1812 = vrot.lane.b32.xlu1 %v5449_v38, %s5575_s14 }
0x19d6   :  { %v1815_v37 = vpop.permute.xlu0 %1814 }
0x19d7   :  { %v5939_v58 = vmul.f32 %v5443_v28, %v1815_v37  ;;  %v1813_v59 = vpop.permute.xlu1 %1812 }
0x19d8   :  { %v5941_v11 = vmul.f32 %v5445_v33, %v1813_v59 }
0x19d9   :  { %v1832_v49 = vrot.slane %v5939_v58, 4 }
0x19da   :  { %v1831_v61 = vrot.slane %v5941_v11, 5 }
0x19dc   :  { %v1833_v62 = vsel %vm345_vm2, %v1832_v49, %v1831_v61 }
0x19dd   :  { %1834 = vrot.lane.b32.xlu1 %v1833_v62, %s5574_s4 }
0x1a4f   :  { %v1835_v63 = vpop.permute.xlu1 %1834 }
0x1a50   :  { %4559 = vmatmul.mubr.msk.f32.vlgmr.msra.gmra.mrb[12].mxu1 %vm205_vm3, %v1835_v63 }
0x1a51   :  { %5020 = vmatpush3.bf16.msra.mxu1 %v5832_v21  ;;  %4572 = vmatprep.mubr.msk.f32.mxu1 %vm5571_vm0, %v6933_v6 }
0x1a52   :  { %5024 = vmatprep.subr.bf16.mxu1 %v6931_v3 }
0x1b23   :  { %v1904_v0 = vpop.f32.mrb[12].mxu1 }
0x1b24   :  { %v1909_v4 = vrot.slane %v1904_v0, 4  ;;  %v1910_v8 = vrot.slane %v1904_v0, 5  ;;  %v4560_v9 = vpop.f32.mrb[13].mxu1 }
0x1b26   :  { %1913 = vrot.lane.b32.xlu1 %v1910_v8, %s5577_s3  ;;  %1911 = vrot.lane.b32.xlu0 %v1909_v4, %s5577_s3 }
0x1b98   :  { %v1914_v10 = vpop.permute.xlu1 %1913  ;;  %v1912_v12 = vpop.permute.xlu0 %1911 }
0x1b99   :  { %v1918_v15 = vadd.f32 %v1914_v10, %v5695_v18  ;;  %v1917_v16 = vadd.f32 %v1912_v12, %v5698_v23 }
0x1b9b   :  { %5450 = vtanh.f32 %v1918_v15  ;;  %v4129_v20 = vmul.f32 -1.442695, %v1918_v15  ;;  %v4128_v22 = vmul.f32 -1.442695, %v1917_v16 }
0x1b9c   :  { %5452 = vtanh.f32 %v1917_v16 }
0x1b9d   :  { %5454 = vpow2.f32 %v4129_v20 }
0x1b9e   :  { %5456 = vpow2.f32 %v4128_v22 }
0x1ba5   :  { %v5451_v17 = vpop.eup %5450 }
0x1ba6   :  { %v5453_v19 = vpop.eup %5452  ;;  %1945 = vrot.lane.b32.xlu1 %v5451_v17, %s5573_s13 }
0x1ba7   :  { %1943 = vrot.lane.b32.xlu0 %v5453_v19, %s5573_s13  ;;  %v5455_v24 = vpop.eup %5454 }
0x1ba8   :  { %v5457_v25 = vpop.eup %5456  ;;  %v1926_v28 = vadd.f32 1.0, %v5455_v24 }
0x1ba9   :  { %v1925_v5 = vadd.f32 1.0, %v5457_v25 }
0x1baa   :  { %5458 = vrcp.f32 %v1926_v28 }
0x1bab   :  { %5460 = vrcp.f32 %v1925_v5 }
0x1bb4   :  { %v5459_v33 = vpop.eup %5458 }
0x1bb5   :  { %v5461_v34 = vpop.eup %5460  ;;  %v1940_v42 = vmul.f32 %v5459_v33, %v1936_v40 }
0x1bb6   :  { %v1939_v55 = vmul.f32 %v5461_v34, %v1935_v41 }
0x1c18   :  { %v1946_v7 = vpop.permute.xlu1 %1945 }
0x1c19   :  { %v1950_v35 = vmul.f32 %v5459_v33, %v1946_v7  ;;  %v1944_v36 = vpop.permute.xlu0 %1943 }
0x1c1a   :  { %v1949_v39 = vmul.f32 %v5461_v34, %v1944_v36 }
0x1c1b   :  { %1955 = vrot.lane.b32.xlu1 %v1950_v35, %s5574_s4 }
0x1c1c   :  { %1953 = vrot.lane.b32.xlu0 %v1949_v39, %s5574_s4 }
0x1c8d   :  { %v1956_v50 = vpop.permute.xlu1 %1955 }
0x1c8e   :  { %v1960_v38 = vadd.f32 %v1956_v50, %v1940_v42  ;;  %v1954_v37 = vpop.permute.xlu0 %1953 }
0x1c8f   :  { %v1959_v59 = vadd.f32 %v1954_v37, %v1939_v55 }
0x1c90   :  { %5462 = vtanh.f32 %v1960_v38  ;;  %v2089_v55 = vrot.slane %v1960_v38, 1 }
0x1c91   :  { %5464 = vtanh.f32 %v1959_v59  ;;  %v2088_v37 = vrot.slane %v1959_v59, 1 }
0x1c9a   :  { %v5463_v49 = vpop.eup %5462 }
0x1c9b   :  { %v5465_v61 = vpop.eup %5464  ;;  %1967 = vrot.lane.b32.xlu1 %v5463_v49, %s5575_s14 }
0x1c9c   :  { %1965 = vrot.lane.b32.xlu0 %v5465_v61, %s5575_s14 }
0x1d0d   :  { %v1968_v62 = vpop.permute.xlu1 %1967 }
0x1d0e   :  { %v5962_v63 = vmul.f32 %v5459_v33, %v1968_v62  ;;  %v1966_v0 = vpop.permute.xlu0 %1965 }
0x1d0f   :  { %v5964_v45 = vmul.f32 %v5461_v34, %v1966_v0 }
0x1d10   :  { %v1985_v52 = vrot.slane %v5962_v63, 3 }
0x1d11   :  { %v1984_v4 = vrot.slane %v5964_v45, 4 }
0x1d13   :  { %v1986_v8 = vsel %vm345_vm2, %v1985_v52, %v1984_v4 }
0x1d14   :  { %1987 = vrot.lane.b32.xlu0 %v1986_v8, %s5574_s4 }
0x1d86   :  { %v1988_v9 = vpop.permute.xlu0 %1987 }
0x1d87   :  { %4566 = vmatmul.mubr.msk.f32.vlgmr.msra.gmra.mrb[14].mxu0 %vm205_vm3, %v1988_v9 }
0x1d88   :  { %5023 = vmatpush3.bf16.msra.mxu0 %v5832_v21  ;;  %4579 = vmatprep.mubr.msk.f32.mxu0 %vm5571_vm0, %v6933_v6 }
0x1d89   :  { %5027 = vmatprep.subr.bf16.mxu0 %v6931_v3 }
0x1e5a   :  { %v2057_v10 = vpop.f32.mrb[14].mxu0 }
0x1e5b   :  { %v2062_v12 = vrot.slane %v2057_v10, 5  ;;  %v2063_v15 = vrot.slane %v2057_v10, 6  ;;  %v4567_v16 = vpop.f32.mrb[15].mxu0 }
0x1e5d   :  { %2066 = vrot.lane.b32.xlu0 %v2063_v15, %s5577_s3  ;;  %2064 = vrot.lane.b32.xlu1 %v2062_v12, %s5577_s3 }
0x1ecf   :  { %v2067_v17 = vpop.permute.xlu0 %2066  ;;  %v2065_v19 = vpop.permute.xlu1 %2064 }
0x1ed0   :  { %v2071_v20 = vadd.f32 %v2067_v17, %v5695_v18  ;;  %v2070_v22 = vadd.f32 %v2065_v19, %v5698_v23 }
0x1ed2   :  { %5466 = vtanh.f32 %v2071_v20  ;;  %v4132_v28 = vmul.f32 -1.442695, %v2071_v20  ;;  %v4131_v5 = vmul.f32 -1.442695, %v2070_v22 }
0x1ed3   :  { %5468 = vtanh.f32 %v2070_v22 }
0x1ed4   :  { %5470 = vpow2.f32 %v4132_v28 }
0x1ed5   :  { %5472 = vpow2.f32 %v4131_v5 }
0x1edc   :  { %v5467_v24 = vpop.eup %5466 }
0x1edd   :  { %v5469_v25 = vpop.eup %5468  ;;  %2098 = vrot.lane.b32.xlu0 %v5467_v24, %s5573_s13 }
0x1ede   :  { %2096 = vrot.lane.b32.xlu1 %v5469_v25, %s5573_s13  ;;  %v5471_v33 = vpop.eup %5470 }
0x1edf   :  { %v5473_v7 = vpop.eup %5472  ;;  %v2079_v34 = vadd.f32 1.0, %v5471_v33 }
0x1ee0   :  { %v2078_v35 = vadd.f32 1.0, %v5473_v7 }
0x1ee1   :  { %5474 = vrcp.f32 %v2079_v34 }
0x1ee2   :  { %5476 = vrcp.f32 %v2078_v35 }
0x1eeb   :  { %v5475_v36 = vpop.eup %5474 }
0x1eec   :  { %v5477_v40 = vpop.eup %5476  ;;  %v2093_v49 = vmul.f32 %v5475_v36, %v2089_v55 }
0x1eed   :  { %v2092_v62 = vmul.f32 %v5477_v40, %v2088_v37 }
0x1f4f   :  { %v2099_v39 = vpop.permute.xlu0 %2098 }
0x1f50   :  { %v2103_v41 = vmul.f32 %v5475_v36, %v2099_v39  ;;  %v2097_v42 = vpop.permute.xlu1 %2096 }
0x1f51   :  { %v2102_v50 = vmul.f32 %v5477_v40, %v2097_v42 }
0x1f52   :  { %2108 = vrot.lane.b32.xlu0 %v2103_v41, %s5574_s4 }
0x1f53   :  { %2106 = vrot.lane.b32.xlu1 %v2102_v50, %s5574_s4 }
0x1fc4   :  { %v2109_v61 = vpop.permute.xlu0 %2108 }
0x1fc5   :  { %v2113_v0 = vadd.f32 %v2109_v61, %v2093_v49  ;;  %v2107_v52 = vpop.permute.xlu1 %2106 }
0x1fc6   :  { %v2112_v4 = vadd.f32 %v2107_v52, %v2092_v62 }
0x1fc7   :  { %5478 = vtanh.f32 %v2113_v0  ;;  %v2242_v52 = vrot.slane %v2113_v0, 1 }
0x1fc8   :  { %5480 = vtanh.f32 %v2112_v4 }
0x1fd1   :  { %v5479_v8 = vpop.eup %5478 }
0x1fd2   :  { %v5481_v9 = vpop.eup %5480  ;;  %2120 = vrot.lane.b32.xlu0 %v5479_v8, %s5575_s14  ;;  %v2241_v8 = vrot.slane %v2112_v4, 1 }
0x1fd3   :  { %2118 = vrot.lane.b32.xlu1 %v5481_v9, %s5575_s14 }
0x2044   :  { %v2121_v10 = vpop.permute.xlu0 %2120 }
0x2045   :  { %v5985_v12 = vmul.f32 %v5475_v36, %v2121_v10  ;;  %v2119_v15 = vpop.permute.xlu1 %2118 }
0x2046   :  { %v5987_v38 = vmul.f32 %v5477_v40, %v2119_v15 }
0x2047   :  { %v2138_v59 = vrot.slane %v5985_v12, 2 }
0x2048   :  { %v2137_v16 = vrot.slane %v5987_v38, 3 }
0x204a   :  { %v2139_v17 = vsel %vm345_vm2, %v2138_v59, %v2137_v16 }
0x204b   :  { %2140 = vrot.lane.b32.xlu1 %v2139_v17, %s5574_s4 }
0x20bd   :  { %v2141_v19 = vpop.permute.xlu1 %2140 }
0x20be   :  { %4573 = vmatmul.mubr.msk.f32.vlgmr.msra.gmra.mrb[14].mxu1 %vm205_vm3, %v2141_v19 }
0x20bf   :  { %5026 = vmatpush3.bf16.msra.mxu1 %v5832_v21  ;;  %4586 = vmatprep.mubr.msk.f32.mxu1 %vm5571_vm0, %v6933_v6 }
0x20c0   :  { %5045 = vmatprep.subr.bf16.mxu1 %v6931_v3 }
0x2191   :  { %v2210_v20 = vpop.f32.mrb[14].mxu1 }
0x2192   :  { %v2215_v22 = vrot.slane %v2210_v20, 6  ;;  %v2216_v24 = vrot.slane %v2210_v20, 7  ;;  %v4574_v25 = vpop.f32.mrb[15].mxu1 }
0x2194   :  { %2219 = vrot.lane.b32.xlu1 %v2216_v24, %s5577_s3  ;;  %2217 = vrot.lane.b32.xlu0 %v2215_v22, %s5577_s3 }
0x2206   :  { %v2220_v28 = vpop.permute.xlu1 %2219  ;;  %v2218_v5 = vpop.permute.xlu0 %2217 }
0x2207   :  { %v2224_v33 = vadd.f32 %v2220_v28, %v5695_v18  ;;  %v2223_v7 = vadd.f32 %v2218_v5, %v5698_v23 }
0x2209   :  { %5482 = vtanh.f32 %v2224_v33  ;;  %v4135_v35 = vmul.f32 -1.442695, %v2224_v33  ;;  %v4134_v36 = vmul.f32 -1.442695, %v2223_v7 }
0x220a   :  { %5484 = vtanh.f32 %v2223_v7 }
0x220b   :  { %5486 = vpow2.f32 %v4135_v35 }
0x220c   :  { %5488 = vpow2.f32 %v4134_v36 }
0x2213   :  { %v5483_v21 = vpop.eup %5482 }
0x2214   :  { %v5485_v34 = vpop.eup %5484  ;;  %2251 = vrot.lane.b32.xlu1 %v5483_v21, %s5573_s13 }
0x2215   :  { %2249 = vrot.lane.b32.xlu0 %v5485_v34, %s5573_s13  ;;  %v5487_v39 = vpop.eup %5486 }
0x2216   :  { %v5489_v40 = vpop.eup %5488  ;;  %v2232_v41 = vadd.f32 1.0, %v5487_v39 }
0x2217   :  { %v2231_v42 = vadd.f32 1.0, %v5489_v40 }
0x2218   :  { %5490 = vrcp.f32 %v2232_v41 }
0x2219   :  { %5492 = vrcp.f32 %v2231_v42 }
0x2222   :  { %v5491_v50 = vpop.eup %5490 }
0x2223   :  { %v5493_v37 = vpop.eup %5492  ;;  %v2246_v9 = vmul.f32 %v5491_v50, %v2242_v52 }
0x2224   :  { %v2245_v15 = vmul.f32 %v5493_v37, %v2241_v8 }
0x2286   :  { %v2252_v55 = vpop.permute.xlu1 %2251 }
0x2287   :  { %v2256_v49 = vmul.f32 %v5491_v50, %v2252_v55  ;;  %v2250_v61 = vpop.permute.xlu0 %2249 }
0x2288   :  { %v2255_v62 = vmul.f32 %v5493_v37, %v2250_v61 }
0x2289   :  { %2261 = vrot.lane.b32.xlu1 %v2256_v49, %s5574_s4 }
0x228a   :  { %2259 = vrot.lane.b32.xlu0 %v2255_v62, %s5574_s4 }
0x22fb   :  { %v2262_v10 = vpop.permute.xlu1 %2261 }
0x22fc   :  { %v2266_v59 = vadd.f32 %v2262_v10, %v2246_v9  ;;  %v2260_v16 = vpop.permute.xlu0 %2259 }
0x22fd   :  { %v2265_v17 = vadd.f32 %v2260_v16, %v2245_v15 }
0x22fe   :  { %5494 = vtanh.f32 %v2266_v59 }
0x22ff   :  { %5496 = vtanh.f32 %v2265_v17 }
0x2308   :  { %v5495_v19 = vpop.eup %5494 }
0x2309   :  { %v5497_v20 = vpop.eup %5496  ;;  %2273 = vrot.lane.b32.xlu1 %v5495_v19, %s5575_s14  ;;  %v2394_v19 = vrot.slane %v2266_v59, 1  ;;  %v1314_v59 = vrot.slane %v5902_v60, 1 }
0x230a   :  { %2271 = vrot.lane.b32.xlu0 %v5497_v20, %s5575_s14 }
0x237b   :  { %v2274_v22 = vpop.permute.xlu1 %2273 }
0x237c   :  { %v6008_v24 = vmul.f32 %v5491_v50, %v2274_v22  ;;  %v2272_v25 = vpop.permute.xlu0 %2271  ;;  %v2393_v22 = vrot.slane %v2265_v17, 1  ;;  %v1318_v17 = vadd.f32 %v1314_v59, %v5698_v23 }
0x237d   :  { %v6010_v0 = vmul.f32 %v5493_v37, %v2272_v25 }
0x237e   :  { %v2291_v4 = vrot.slane %v6008_v24, 1 }
0x237f   :  { %v2290_v28 = vrot.slane %v6010_v0, 2 }
0x2381   :  { %v2292_v5 = vsel %vm345_vm2, %v2291_v4, %v2290_v28 }
0x2382   :  { %2293 = vrot.lane.b32.xlu0 %v2292_v5, %s5574_s4 }
0x23f4   :  { %v2294_v33 = vpop.permute.xlu0 %2293 }
0x23f5   :  { %4580 = vmatmul.mubr.msk.f32.vlgmr.msra.gmra.mrb[16].mxu0 %vm205_vm3, %v2294_v33 }
0x23f6   :  { %4613 = vmatprep.mubr.msk.f32.mxu0 %vm5571_vm0, %v6933_v6 }
0x24c8   :  { %v2363_v7 = vpop.f32.mrb[16].mxu0 }
0x24c9   :  { %v2368_v21 = vrot.slane %v2363_v7, 7  ;;  %2371 = vrot.lane.b32.xlu0 %v2363_v7, %s5577_s3  ;;  %v4581_v34 = vpop.f32.mrb[17].mxu0 }
0x24cb   :  { %2369 = vrot.lane.b32.xlu1 %v2368_v21, %s5577_s3 }
0x253b   :  { %v2372_v35 = vpop.permute.xlu0 %2371 }
0x253c   :  { %v2376_v36 = vadd.f32 %v2372_v35, %v5695_v18 }
0x253d   :  { %v2370_v39 = vpop.permute.xlu1 %2369 }
0x253e   :  { %5498 = vtanh.f32 %v2376_v36  ;;  %v2375_v40 = vadd.f32 %v2370_v39, %v5698_v23  ;;  %v4138_v50 = vmul.f32 -1.442695, %v2376_v36 }
0x2540   :  { %5500 = vtanh.f32 %v2375_v40  ;;  %v4137_v55 = vmul.f32 -1.442695, %v2375_v40 }
0x2541   :  { %5502 = vpow2.f32 %v4138_v50  ;;  %v4117_v50 = vmul.f32 -1.442695, %v1318_v17 }
0x2542   :  { %5504 = vpow2.f32 %v4137_v55 }
0x2548   :  { %v5499_v41 = vpop.eup %5498 }
0x2549   :  { %2403 = vrot.lane.b32.xlu0 %v5499_v41, %s5573_s13 }
0x254a   :  { %v5501_v42 = vpop.eup %5500 }
0x254b   :  { %2401 = vrot.lane.b32.xlu1 %v5501_v42, %s5573_s13  ;;  %v5503_v37 = vpop.eup %5502 }
0x254c   :  { %v5505_v49 = vpop.eup %5504  ;;  %v2384_v61 = vadd.f32 1.0, %v5503_v37 }
0x254d   :  { %v2383_v62 = vadd.f32 1.0, %v5505_v49 }
0x254e   :  { %5506 = vrcp.f32 %v2384_v61 }
0x254f   :  { %5508 = vrcp.f32 %v2383_v62 }
0x2558   :  { %v5507_v52 = vpop.eup %5506 }
0x2559   :  { %v5509_v10 = vpop.eup %5508  ;;  %v2398_v20 = vmul.f32 %v5507_v52, %v2394_v19 }
0x255a   :  { %v2397_v28 = vmul.f32 %v5509_v10, %v2393_v22 }
0x25bb   :  { %v2404_v8 = vpop.permute.xlu0 %2403 }
0x25bc   :  { %v2408_v9 = vmul.f32 %v5507_v52, %v2404_v8  ;;  %v1336_v8 = vrot.slane %v5860_v29, 7 }
0x25bd   :  { %v2402_v15 = vpop.permute.xlu1 %2401 }
0x25be   :  { %2413 = vrot.lane.b32.xlu0 %v2408_v9, %s5574_s4  ;;  %v2407_v16 = vmul.f32 %v5509_v10, %v2402_v15 }
0x25c0   :  { %2411 = vrot.lane.b32.xlu1 %v2407_v16, %s5574_s4 }
0x2630   :  { %v2414_v25 = vpop.permute.xlu0 %2413 }
0x2631   :  { %v6027_v4 = vadd.f32 %v2414_v25, %v2398_v20 }
0x2632   :  { %v2412_v5 = vpop.permute.xlu1 %2411 }
0x2633   :  { %5510 = vtanh.f32 %v6027_v4  ;;  %v6030_v33 = vadd.f32 %v2412_v5, %v2397_v28 }
0x2635   :  { %5512 = vtanh.f32 %v6030_v33  ;;  %v2544_v59 = vrot.slane %v6030_v33, 1 }
0x2636   :  { %5514 = vtanh.f32 %v1318_v17 }
0x2637   :  { %5516 = vpow2.f32 %v4117_v50 }
0x263d   :  { %v5511_v7 = vpop.eup %5510 }
0x263e   :  { %2425 = vrot.lane.b32.xlu0 %v5511_v7, %s5575_s14 }
0x263f   :  { %v5513_v21 = vpop.eup %5512 }
0x2640   :  { %2423 = vrot.lane.b32.xlu1 %v5513_v21, %s5575_s14  ;;  %v5515_v42 = vpop.eup %5514 }
0x2641   :  { %v5517_v55 = vpop.eup %5516 }
0x2642   :  { %v1326_v37 = vadd.f32 1.0, %v5517_v55  ;;  %v2598_v55 = vld [vmem:[%s6917_s5 + $0x18] sm:$0xff] }
0x2644   :  { %5518 = vrcp.f32 %v1326_v37 }
0x264e   :  { %v5519_v61 = vpop.eup %5518 }
0x264f   :  { %v1340_v9 = vmul.f32 %v5519_v61, %v1336_v8 }
0x26b0   :  { %v2426_v34 = vpop.permute.xlu0 %2425 }
0x26b1   :  { %v6037_v39 = vmul.f32 %v5507_v52, %v2426_v34 }
0x26b2   :  { %v2424_v35 = vpop.permute.xlu1 %2423 }
0x26b3   :  { %v2429_v36 = vmul.f32 %v5509_v10, %v2424_v35 }
0x26b5   :  { %v2442_v40 = vrot.slane %v2429_v36, 1 }
0x26b7   :  { %v2443_v41 = vsel %vm345_vm2, %v6037_v39, %v2442_v40  ;;  %vm6926_vm2 = vcmask 260230  }
0x26b8   :  { %2444 = vrot.lane.b32.xlu1 %v2443_v41, %s5574_s4 }
0x26bc   :  { %1344 = vrot.lane.b32.xlu1 %v5515_v42, %s5573_s13 }
0x272a   :  { %v2445_v49 = vpop.permute.xlu1 %2444 }
0x272b   :  { %4587 = vmatmul.mubr.msk.f32.vlgmr.msra.gmra.mrb[16].mxu1 %vm205_vm3, %v2445_v49  ;;  %vm6927_vm3 = vcmask 258180  }
0x272c   :  { %4640 = vmatprep.mubr.msk.f32.mxu1 %vm5571_vm0, %v6933_v6 }
0x272e   :  { %v1345_v62 = vpop.permute.xlu1 %1344 }
0x272f   :  { %v1350_v52 = vmul.f32 %v5519_v61, %v1345_v62  ;;  %v2600_v62 = vld [vmem:[%s6917_s5 + $0x28] sm:$0xff] }
0x2731   :  { %1354 = vrot.lane.b32.xlu1 %v1350_v52, %s5574_s4 }
0x27a3   :  { %v1355_v10 = vpop.permute.xlu1 %1354 }
0x27a4   :  { %v1360_v15 = vadd.f32 %v1355_v10, %v1340_v9  ;;  %v2601_v9 = vld [vmem:[%s6917_s5 + $0x30] sm:$0xff]  ;;  %v2602_v10 = vld [vmem:[%s6917_s5 + $0x38] sm:$0xff] }
0x27a6   :  { %5520 = vtanh.f32 %v1360_v15  ;;  %v6132_v15 = vpack.c.bf16 %v2602_v10, %v2601_v9  ;;  %v2616_v9 = vld [vmem:[%s6919_s7 + $0x40] sm:$0xff]  ;;  %v2617_v10 = vld [vmem:[%s6919_s7 + $0x48] sm:$0xff] }
0x27b0   :  { %v5521_v16 = vpop.eup %5520 }
0x27b1   :  { %1366 = vrot.lane.b32.xlu1 %v5521_v16, %s5575_s14 }
0x27b5   :  { %335 = vrot.lane.b32.xlu1 %v5710_v51, %s5576_s15 }
0x27b9   :  { %631 = vrot.lane.b32.xlu1 %v5749_v1, %s5576_s15 }
0x27bd   :  { %929 = vrot.lane.b32.xlu1 %v5791_v31, %s5576_s15 }
0x27c1   :  { %1227 = vrot.lane.b32.xlu1 %v5876_v43, %s5576_s15 }
0x27c5   :  { %1516 = vrot.lane.b32.xlu1 %v5884_v53, %s5575_s14 }
0x27c9   :  { %1822 = vrot.lane.b32.xlu1 %v5941_v11, %s5575_s14 }
0x27cd   :  { %2128 = vrot.lane.b32.xlu1 %v5987_v38, %s5575_s14 }
0x27d1   :  { %2433 = vrot.lane.b32.xlu1 %v2429_v36, %s5575_s14 }
0x27fe   :  { %v6064_v51 = vpop.f32.mrb[16].mxu1 }
0x27ff   :  { %2520 = vrot.lane.b32.xlu0 %v6064_v51, %s5577_s3  ;;  %v4588_v1 = vpop.f32.mrb[17].mxu1 }
0x2800   :  { %v2603_v1 = vld [vmem:[%s6917_s5 + $0x40] sm:$0xff] }
0x2823   :  { %v1367_v31 = vpop.permute.xlu1 %1366 }
0x2824   :  { %v1372_v36 = vmul.f32 %v5519_v61, %v1367_v31  ;;  %v2599_v61 = vld [vmem:[%s6917_s5 + $0x20] sm:$0xff]  ;;  %v2604_v31 = vld [vmem:[%s6917_s5 + $0x48] sm:$0xff] }
0x2825   :  { %v6120_v52 = vpack.c.bf16 %v2600_v62, %v2599_v61  ;;  %v2614_v61 = vld [vmem:[%s6919_s7 + $0x30] sm:$0xff]  ;;  %v2615_v62 = vld [vmem:[%s6919_s7 + $0x38] sm:$0xff] }
0x2827   :  { %v336_v29 = vpop.permute.xlu1 %335 }
0x2828   :  { %342 = vst.msk [vmem:[#allocation2] sm:$0x1] %vm341_vm4, %v336_v29  ;;  %v6144_v29 = vpack.c.bf16 %v2604_v31, %v2603_v1  ;;  %v2618_v1 = vld [vmem:[%s6919_s7 + $0x50] sm:$0xff]  ;;  %v2619_v31 = vld [vmem:[%s6919_s7 + $0x58] sm:$0xff] }
0x282b   :  { %v632_v43 = vpop.permute.xlu1 %631 }
0x282c   :  { %638 = vst.msk [vmem:[#allocation2] sm:$0x4] %vm637_vm5, %v632_v43 }
0x282f   :  { %v930_v53 = vpop.permute.xlu1 %929 }
0x2830   :  { %936 = vst.msk [vmem:[#allocation2] sm:$0x10] %vm935_vm6, %v930_v53  ;;  %v2605_v53 = vld [vmem:[%s6917_s5 + $0x50] sm:$0xff] }
0x2833   :  { %v1228_v11 = vpop.permute.xlu1 %1227 }
0x2834   :  { %1234 = vst.msk [vmem:[#allocation2] sm:$0x40] %vm1233_vm7, %v1228_v11  ;;  %v2606_v11 = vld [vmem:[%s6917_s5 + $0x58] sm:$0xff] }
0x2837   :  { %v1517_v33 = vpop.permute.xlu1 %1516 }
0x2871   :  { %v2521_v38 = vpop.permute.xlu0 %2520 }
0x2872   :  { %v2526_v19 = vadd.f32 %v2521_v38, %v5698_v23  ;;  %v6155_v38 = vpack.c.bf16 %v2606_v11, %v2605_v53  ;;  %v6237_v53 = vld [vmem:[%s6918_s6] ss:$0 sm:$0xff] }
0x2874   :  { %5522 = vtanh.f32 %v2526_v19  ;;  %v4140_v22 = vmul.f32 -1.442695, %v2526_v19 }
0x2876   :  { %5524 = vpow2.f32 %v4140_v22 }
0x287e   :  { %v5523_v20 = vpop.eup %5522 }
0x287f   :  { %2552 = vrot.lane.b32.xlu0 %v5523_v20, %s5573_s13 }
0x2880   :  { %v5525_v25 = vpop.eup %5524 }
0x2881   :  { %v2534_v28 = vadd.f32 1.0, %v5525_v25 }
0x2883   :  { %5526 = vrcp.f32 %v2534_v28 }
0x288d   :  { %v5527_v5 = vpop.eup %5526 }
0x288e   :  { %v2548_v17 = vmul.f32 %v5527_v5, %v2544_v59 }
0x28f1   :  { %v2553_v7 = vpop.permute.xlu0 %2552 }
0x28f2   :  { %v2558_v21 = vmul.f32 %v5527_v5, %v2553_v7 }
0x28f4   :  { %2562 = vrot.lane.b32.xlu0 %v2558_v21, %s5574_s4 }
0x2966   :  { %v2563_v34 = vpop.permute.xlu0 %2562 }
0x2967   :  { %v2568_v35 = vadd.f32 %v2563_v34, %v2548_v17 }
0x2969   :  { %5528 = vtanh.f32 %v2568_v35 }
0x2973   :  { %v5529_v23 = vpop.eup %5528 }
0x2974   :  { %2574 = vrot.lane.b32.xlu0 %v5529_v23, %s5575_s14 }
0x2978   :  { %483 = vrot.lane.b32.xlu0 %v5728_v26, %s5576_s15  ;;  %v1823_v26 = vpop.permute.xlu1 %1822 }
0x297c   :  { %780 = vrot.lane.b32.xlu0 %v5770_v46, %s5576_s15  ;;  %v2129_v40 = vpop.permute.xlu1 %2128 }
0x2980   :  { %1078 = vrot.lane.b32.xlu0 %v5818_v13, %s5576_s15  ;;  %v2434_v42 = vpop.permute.xlu1 %2433 }
0x2984   :  { %1376 = vrot.lane.b32.xlu0 %v1372_v36, %s5576_s15 }
0x2988   :  { %1669 = vrot.lane.b32.xlu0 %v5918_v57, %s5575_s14  ;;  %v2595_v57 = vld [vmem:[%s6917_s5] sm:$0xff] }
0x298c   :  { %1975 = vrot.lane.b32.xlu0 %v5964_v45, %s5575_s14  ;;  %v2596_v45 = vld [vmem:[%s6917_s5 + $0x8] sm:$0xff] }
0x298d   :  { %v6101_v50 = vpack.c.bf16 %v2596_v45, %v2595_v57  ;;  %v2611_v45 = vld [vmem:[%s6919_s7 + $0x18] sm:$0xff] }
0x298f   :  { %5029 = vmatpush3.bf16.msra.mxu0 %v6101_v50 }
0x2990   :  { %2281 = vrot.lane.b32.xlu0 %v6010_v0, %s5575_s14  ;;  %v2597_v0 = vld [vmem:[%s6917_s5 + $0x10] sm:$0xff]  ;;  %5030 = vmatprep.subr.bf16.mxu0 %v6931_v3 }
0x2991   :  { %v6108_v37 = vpack.c.bf16 %v2598_v55, %v2597_v0  ;;  %v2613_v55 = vld [vmem:[%s6919_s7 + $0x28] sm:$0xff] }
0x2993   :  { %5032 = vmatpush3.bf16.msra.mxu0 %v6108_v37 }
0x2994   :  { %5033 = vmatprep.subr.bf16.mxu0 %v6931_v3 }
0x2997   :  { %5035 = vmatpush3.bf16.msra.mxu0 %v6120_v52 }
0x2998   :  { %5036 = vmatprep.subr.bf16.mxu0 %v6931_v3 }
0x299b   :  { %5038 = vmatpush3.bf16.msra.mxu0 %v6132_v15 }
0x299c   :  { %5039 = vmatprep.subr.bf16.mxu0 %v6931_v3 }
0x299f   :  { %5041 = vmatpush3.bf16.msra.mxu0 %v6144_v29 }
0x29a0   :  { %5042 = vmatprep.subr.bf16.mxu0 %v6931_v3 }
0x29a3   :  { %5044 = vmatpush3.bf16.msra.mxu0 %v6155_v38 }
0x29a4   :  { %5063 = vmatprep.subr.bf16.mxu0 %v6931_v3 }
0x29e6   :  { %v2575_v41 = vpop.permute.xlu0 %2574 }
0x29e7   :  { %v2580_v46 = vmul.f32 %v5527_v5, %v2575_v41  ;;  %v2608_v41 = vld [vmem:[%s6919_s7] sm:$0xff] }
0x29e9   :  { %2584 = vrot.lane.b32.xlu0 %v2580_v46, %s5575_s14  ;;  %v2609_v46 = vld [vmem:[%s6919_s7 + $0x8] sm:$0xff] }
0x29ea   :  { %v484_v13 = vpop.permute.xlu0 %483  ;;  %v6183_v57 = vpack.c.bf16 %v2609_v46, %v2608_v41  ;;  %v2652_v41 = vld [vmem:[%s6921_s9 + $0x8] sm:$0xff]  ;;  %v2653_v46 = vld [vmem:[%s6921_s9 + $0x10] sm:$0xff] }
0x29eb   :  { %490 = vst.msk [vmem:[#allocation2] sm:$0x2] %vm489_vm8, %v484_v13  ;;  %v2610_v13 = vld [vmem:[%s6919_s7 + $0x10] sm:$0xff] }
0x29ec   :  { %2440 = vst.msk [vmem:[#allocation2] sm:$0x2] %vm6928_vm9, %v2434_v42  ;;  %vm2702_vm9 = vcmask 1046528   ;;  %5047 = vmatpush3.bf16.msra.mxu1 %v6183_v57  ;;  %v6189_v0 = vpack.c.bf16 %v2611_v45, %v2610_v13  ;;  %v2612_v42 = vld [vmem:[%s6919_s7 + $0x20] sm:$0xff]  ;;  %v2654_v45 = vld [vmem:[%s6921_s9 + $0x18] sm:$0xff] }
0x29ed   :  { %5048 = vmatprep.subr.bf16.mxu1 %v6931_v3 }
0x29ee   :  { %v781_v49 = vpop.permute.xlu0 %780 }
0x29ef   :  { %787 = vst.msk [vmem:[#allocation2] sm:$0x8] %vm786_vm10, %v781_v49  ;;  %v6199_v49 = vpack.c.bf16 %v2613_v55, %v2612_v42  ;;  %v6269_v42 = vpack.c.bf16 %v2654_v45, %v2653_v46  ;;  %v2655_v55 = vld [vmem:[%s6921_s9 + $0x20] sm:$0xff] }
0x29f0   :  { %2135 = vst.msk [vmem:[#allocation2] sm:$0x8] %vm2134_vm11, %v2129_v40  ;;  %5050 = vmatpush3.bf16.msra.mxu1 %v6189_v0 }
0x29f1   :  { %5051 = vmatprep.subr.bf16.mxu1 %v6931_v3 }
0x29f2   :  { %v1079_v8 = vpop.permute.xlu0 %1078 }
0x29f3   :  { %1085 = vst.msk [vmem:[#allocation2] sm:$0x20] %vm1084_vm12, %v1079_v8  ;;  %v6209_v8 = vpack.c.bf16 %v2615_v62, %v2614_v61  ;;  %v2656_v61 = vld [vmem:[%s6921_s9 + $0x28] sm:$0xff] }
0x29f4   :  { %1829 = vst.msk [vmem:[#allocation2] sm:$0x20] %vm1828_vm13, %v1823_v26  ;;  %5053 = vmatpush3.bf16.msra.mxu1 %v6199_v49  ;;  %v6279_v62 = vpack.c.bf16 %v2656_v61, %v2655_v55 }
0x29f5   :  { %5054 = vmatprep.subr.bf16.mxu1 %v6931_v3 }
0x29f6   :  { %v1377_v16 = vpop.permute.xlu0 %1376 }
0x29f7   :  { %1383 = vst.msk [vmem:[#allocation2] sm:$0x80] %vm6925_vm14, %v1377_v16  ;;  %vm6929_vm14 = vcmask 254080   ;;  %v6219_v16 = vpack.c.bf16 %v2617_v10, %v2616_v9  ;;  %v2657_v9 = vld [vmem:[%s6921_s9 + $0x30] sm:$0xff]  ;;  %v2658_v10 = vld [vmem:[%s6921_s9 + $0x38] sm:$0xff] }
0x29f8   :  { %1523 = vst.msk [vmem:[#allocation2] sm:$0x80] %vm6924_vm15, %v1517_v33  ;;  %vm6930_vm15 = vcmask 256130   ;;  %5056 = vmatpush3.bf16.msra.mxu1 %v6209_v8 }
0x29f9   :  { %5057 = vmatprep.subr.bf16.mxu1 %v6931_v3 }
0x29fa   :  { %v1670_v43 = vpop.permute.xlu0 %1669 }
0x29fb   :  { %1676 = vst.msk [vmem:[#allocation2] sm:$0x40] %vm6926_vm2, %v1670_v43  ;;  %vm2697_vm2 = vcmask 1040384   ;;  %v6229_v43 = vpack.c.bf16 %v2619_v31, %v2618_v1  ;;  %v6289_v1 = vpack.c.bf16 %v2658_v10, %v2657_v9  ;;  %v2659_v31 = vld [vmem:[%s6921_s9 + $0x40] sm:$0xff] }
0x29fc   :  { %5059 = vmatpush3.bf16.msra.mxu1 %v6219_v16  ;;  %v4142_v10 = vld [vmem:[%s6919_s7 + $0x60] sm:$0xff] }
0x29fd   :  { %5060 = vmatprep.subr.bf16.mxu1 %v6931_v3 }
0x29fe   :  { %v1976_v19 = vpop.permute.xlu0 %1975 }
0x29ff   :  { %1982 = vst.msk [vmem:[#allocation2] sm:$0x10] %vm6927_vm3, %v1976_v19  ;;  %vm2709_vm3 = vcmask 1045504  }
0x2a00   :  { %5062 = vmatpush3.bf16.msra.mxu1 %v6229_v43 }
0x2a01   :  { %5081 = vmatprep.subr.bf16.mxu1 %v6931_v3 }
0x2a02   :  { %v2282_v20 = vpop.permute.xlu0 %2281 }
0x2a03   :  { %2288 = vst.msk [vmem:[#allocation2] sm:$0x4] %vm6930_vm15, %v2282_v20  ;;  %vm2725_vm15 = vcmask 785408  }
0x2a5b   :  { %v2585_v22 = vpop.permute.xlu0 %2584 }
0x2a5c   :  { %2591 = vst.msk [vmem:[#allocation2] sm:$0x1] %vm6929_vm14, %v2585_v22  ;;  %vm2717_vm14 = vcmask 523264  }
0x2a63   :  { %v2593_v25 = vld [vmem:[#allocation2] sm:$0xff] }
0x2a64   :  { %v2695_v28 = vrot.slane %v2593_v25, 7 }
0x2a66   :  { %v2698_v5 = vsel %vm2697_vm2, 0.0, %v2695_v28  ;;  %v2699_v7 = vsel %vm2697_vm2, %v2695_v28, 0.0 }
0x2a67   :  { %v2710_v21 = vrot.slane %v2698_v5, 2  ;;  %v2711_v59 = vrot.slane %v2699_v7, 2  ;;  %v2703_v17 = vrot.slane %v2698_v5, 1  ;;  %v2704_v34 = vrot.slane %v2699_v7, 1 }
0x2a69   :  { %v2712_v35 = vsel %vm2709_vm3, %v2710_v21, %v2711_v59  ;;  %v2705_v23 = vsel %vm2702_vm9, %v2703_v17, %v2704_v34 }
0x2a6a   :  { %2713 = vrot.lane.b32.xlu0 %v2712_v35, %s5577_s3  ;;  %2706 = vrot.lane.b32.xlu1 %v2705_v23, %s5575_s14 }
0x2adc   :  { %v2714_v36 = vpop.permute.xlu0 %2713  ;;  %v2707_v33 = vpop.permute.xlu1 %2706 }
0x2add   :  { %v2716_v26 = vsel %vm50_vm1, %v2698_v5, %v2707_v33 }
0x2ade   :  { %v2718_v40 = vsel %vm2717_vm14, %v2716_v26, %v2714_v36 }
0x2adf   :  { %4614 = vmatmul.mubr.msk.f32.vlgmr.msra.gmra.mrb[18].mxu0 %vm2725_vm15, %v2718_v40  ;;  %v2651_v40 = vld [vmem:[%s6921_s9] sm:$0xff] }
0x2ae0   :  { %4667 = vmatprep.mubr.msk.f32.mxu0 %vm5571_vm0, %v6933_v6  ;;  %v6263_v13 = vpack.c.bf16 %v2652_v41, %v2651_v40 }
0x2ae2   :  { %5065 = vmatpush3.bf16.msra.mxu0 %v6263_v13 }
0x2ae3   :  { %5066 = vmatprep.subr.bf16.mxu0 %v6931_v3 }
0x2ae6   :  { %5068 = vmatpush3.bf16.msra.mxu0 %v6269_v42 }
0x2ae7   :  { %5069 = vmatprep.subr.bf16.mxu0 %v6931_v3 }
0x2aea   :  { %5071 = vmatpush3.bf16.msra.mxu0 %v6279_v62 }
0x2aeb   :  { %5072 = vmatprep.subr.bf16.mxu0 %v6931_v3 }
0x2aee   :  { %5074 = vmatpush3.bf16.msra.mxu0 %v6289_v1 }
0x2aef   :  { %5075 = vmatprep.subr.bf16.mxu0 %v6931_v3 }
0x2bb2   :  { %v2795_v11 = vpop.f32.mrb[18].mxu0 }
0x2bb3   :  { %v6240_v19 = vadd.f32 %v6237_v53, %v2795_v11  ;;  %v4615_v20 = vpop.f32.mrb[19].mxu0  ;;  %v2660_v11 = vld [vmem:[%s6921_s9 + $0x48] sm:$0xff] }
0x2bb4   :  { %v6299_v20 = vpack.c.bf16 %v2660_v11, %v2659_v31  ;;  %v4143_v31 = vld [vmem:[%s6919_s7 + $0x68] sm:$0xff]  ;;  %v4144_v11 = vld [vmem:[%s6919_s7 + $0x70] sm:$0xff] }
0x2bb5   :  { %v2799_v22 = vmax.f32 %v6240_v19, 0.0 }
0x2bb6   :  { %5077 = vmatpush3.bf16.msra.mxu0 %v6299_v20 }
0x2bb7   :  { %v2801_v25 = vrot.slane %v2799_v22, 7  ;;  %v2661_v22 = vld [vmem:[%s6921_s9 + $0x50] sm:$0xff]  ;;  %5078 = vmatprep.subr.bf16.mxu0 %v6931_v3 }
0x2bb9   :  { %v2803_v28 = vsel %vm2697_vm2, 0.0, %v2801_v25  ;;  %v2804_v5 = vsel %vm2697_vm2, %v2801_v25, 0.0  ;;  %v2662_v25 = vld [vmem:[%s6921_s9 + $0x58] sm:$0xff] }
0x2bba   :  { %v2807_v7 = vrot.slane %v2803_v28, 1  ;;  %v2808_v21 = vrot.slane %v2804_v5, 1  ;;  %v2813_v59 = vrot.slane %v2803_v28, 2  ;;  %v2814_v17 = vrot.slane %v2804_v5, 2  ;;  %v6317_v5 = vld [vmem:[%s6920_s8] ss:$0 sm:$0xff] }
0x2bbc   :  { %v2815_v34 = vsel %vm2709_vm3, %v2813_v59, %v2814_v17  ;;  %v2809_v35 = vsel %vm2702_vm9, %v2807_v7, %v2808_v21 }
0x2bbd   :  { %2816 = vrot.lane.b32.xlu0 %v2815_v34, %s5577_s3  ;;  %2810 = vrot.lane.b32.xlu1 %v2809_v35, %s5575_s14 }
0x2c2f   :  { %v2817_v23 = vpop.permute.xlu0 %2816  ;;  %v2811_v36 = vpop.permute.xlu1 %2810 }
0x2c30   :  { %v2819_v33 = vsel %vm50_vm1, %v2803_v28, %v2811_v36  ;;  %v6309_v28 = vpack.c.bf16 %v2662_v25, %v2661_v22  ;;  %v6340_v22 = vpack.c.bf16 %v4143_v31, %v4142_v10  ;;  %v4145_v25 = vld [vmem:[%s6919_s7 + $0x78] sm:$0xff] }
0x2c31   :  { %v2820_v26 = vsel %vm2717_vm14, %v2819_v33, %v2817_v23 }
0x2c32   :  { %4641 = vmatmul.mubr.msk.f32.vlgmr.msra.gmra.mrb[18].mxu1 %vm2725_vm15, %v2820_v26  ;;  %5080 = vmatpush3.bf16.msra.mxu0 %v6309_v28 }
0x2c33   :  { %4694 = vmatprep.mubr.msk.f32.mxu1 %vm5571_vm0, %v6933_v6  ;;  %5099 = vmatprep.subr.bf16.mxu0 %v6931_v3 }
0x2c34   :  { %5083 = vmatpush3.bf16.msra.mxu1 %v6340_v22 }
0x2c35   :  { %5084 = vmatprep.subr.bf16.mxu1 %v6931_v3 }
0x2d05   :  { %v2896_v7 = vpop.f32.mrb[18].mxu1 }
0x2d06   :  { %v2897_v21 = vadd.f32 %v6317_v5, %v2896_v7  ;;  %v4642_v59 = vpop.f32.mrb[19].mxu1  ;;  %v6346_v7 = vpack.c.bf16 %v4145_v25, %v4144_v11 }
0x2d07   :  { %v4147_v59 = vld [vmem:[%s6919_s7 + $0x88] sm:$0xff] }
0x2d08   :  { %v2900_v17 = vmax.f32 %v2897_v21, 0.0  ;;  %v4146_v21 = vld [vmem:[%s6919_s7 + $0x80] sm:$0xff]  ;;  %5086 = vmatpush3.bf16.msra.mxu1 %v6346_v7 }
0x2d09   :  { %5087 = vmatprep.subr.bf16.mxu1 %v6931_v3 }
0x2d0a   :  { %v2902_v34 = vrot.slane %v2900_v17, 7  ;;  %v6356_v17 = vpack.c.bf16 %v4147_v59, %v4146_v21 }
0x2d0c   :  { %v2904_v35 = vsel %vm2697_vm2, 0.0, %v2902_v34  ;;  %v2905_v23 = vsel %vm2697_vm2, %v2902_v34, 0.0  ;;  %v4148_v34 = vld [vmem:[%s6919_s7 + $0x90] sm:$0xff]  ;;  %5089 = vmatpush3.bf16.msra.mxu1 %v6356_v17 }
0x2d0d   :  { %v2908_v36 = vrot.slane %v2904_v35, 1  ;;  %v2909_v33 = vrot.slane %v2905_v23, 1  ;;  %v2914_v26 = vrot.slane %v2904_v35, 2  ;;  %v2915_v40 = vrot.slane %v2905_v23, 2  ;;  %5090 = vmatprep.subr.bf16.mxu1 %v6931_v3 }
0x2d0f   :  { %v2916_v41 = vsel %vm2709_vm3, %v2914_v26, %v2915_v40  ;;  %v2910_v46 = vsel %vm2702_vm9, %v2908_v36, %v2909_v33  ;;  %v4150_v36 = vld [vmem:[%s6919_s7 + $0xa0] sm:$0xff]  ;;  %v4151_v33 = vld [vmem:[%s6919_s7 + $0xa8] sm:$0xff]  ;;  %v4152_v40 = vld [vmem:[%s6919_s7 + $0xb0] sm:$0xff] }
0x2d10   :  { %2917 = vrot.lane.b32.xlu0 %v2916_v41, %s5577_s3  ;;  %2911 = vrot.lane.b32.xlu1 %v2910_v46, %s5575_s14  ;;  %v6376_v26 = vpack.c.bf16 %v4151_v33, %v4150_v36  ;;  %v4153_v41 = vld [vmem:[%s6919_s7 + $0xb8] sm:$0xff] }
0x2d11   :  { %v6386_v46 = vpack.c.bf16 %v4153_v41, %v4152_v40 }
0x2d82   :  { %v2918_v45 = vpop.permute.xlu0 %2917  ;;  %v2912_v55 = vpop.permute.xlu1 %2911 }
0x2d83   :  { %v2920_v61 = vsel %vm50_vm1, %v2904_v35, %v2912_v55  ;;  %v4149_v35 = vld [vmem:[%s6919_s7 + $0x98] sm:$0xff] }
0x2d84   :  { %v2921_v9 = vsel %vm2717_vm14, %v2920_v61, %v2918_v45  ;;  %v6366_v23 = vpack.c.bf16 %v4149_v35, %v4148_v34  ;;  %v6394_v45 = vld [vmem:[%s6922_s10] ss:$0 sm:$0xff] }
0x2d85   :  { %4668 = vmatmul.mubr.msk.f32.vlgmr.msra.gmra.mrb[20].mxu0 %vm2725_vm15, %v2921_v9  ;;  %6938 = vst [vmem:[#allocation6_spill] sm:$0xff] %v6394_v45 }
0x2d86   :  { %4721 = vmatprep.mubr.msk.f32.mxu0 %vm5571_vm0, %v6933_v6  ;;  %5092 = vmatpush3.bf16.msra.mxu1 %v6366_v23 }
0x2d87   :  { %5093 = vmatprep.subr.bf16.mxu1 %v6931_v3 }
0x2d8a   :  { %5095 = vmatpush3.bf16.msra.mxu1 %v6376_v26 }
0x2d8b   :  { %5096 = vmatprep.subr.bf16.mxu1 %v6931_v3 }
0x2d8e   :  { %5098 = vmatpush3.bf16.msra.mxu1 %v6386_v46 }
0x2d8f   :  { %5117 = vmatprep.subr.bf16.mxu1 %v6931_v3 }
0x2e58   :  { %v2997_v55 = vpop.f32.mrb[20].mxu0 }
0x2e59   :  { %v2998_v61 = vadd.f32 %v6394_v45, %v2997_v55  ;;  %v4669_v9 = vpop.f32.mrb[21].mxu0 }
0x2e5b   :  { %v6398_v10 = vadd.f32 %v2998_v61, %v6240_v19  ;;  %v2519_v19 = vrot.slane %v6064_v51, 1  ;;  %v4169_v51 = vld [vmem:[%s6921_s9 + $0x68] sm:$0xff] }
0x2e5d   :  { %v3002_v31 = vmax.f32 %v6398_v10, 0.0 }
0x2e5f   :  { %v3004_v11 = vrot.slane %v3002_v31, 7  ;;  %v4168_v31 = vld [vmem:[%s6921_s9 + $0x60] sm:$0xff] }
0x2e61   :  { %v3006_v25 = vsel %vm2697_vm2, 0.0, %v3004_v11  ;;  %v3007_v21 = vsel %vm2697_vm2, %v3004_v11, 0.0  ;;  %v4170_v11 = vld [vmem:[%s6921_s9 + $0x70] sm:$0xff] }
0x2e62   :  { %v3016_v59 = vrot.slane %v3006_v25, 2  ;;  %v3017_v34 = vrot.slane %v3007_v21, 2  ;;  %v3010_v35 = vrot.slane %v3006_v25, 1  ;;  %v3011_v36 = vrot.slane %v3007_v21, 1  ;;  %v4171_v21 = vld [vmem:[%s6921_s9 + $0x78] sm:$0xff] }
0x2e64   :  { %v3018_v33 = vsel %vm2709_vm3, %v3016_v59, %v3017_v34  ;;  %v3012_v40 = vsel %vm2702_vm9, %v3010_v35, %v3011_v36  ;;  %v6429_v59 = vpack.c.bf16 %v4171_v21, %v4170_v11  ;;  %v4172_v34 = vld [vmem:[%s6921_s9 + $0x80] sm:$0xff]  ;;  %v4173_v35 = vld [vmem:[%s6921_s9 + $0x88] sm:$0xff]  ;;  %v1315_v11 = vrot.slane %v5902_v60, 2 }
0x2e65   :  { %3019 = vrot.lane.b32.xlu0 %v3018_v33, %s5577_s3  ;;  %3013 = vrot.lane.b32.xlu1 %v3012_v40, %s5575_s14  ;;  %v6439_v36 = vpack.c.bf16 %v4173_v35, %v4172_v34  ;;  %v4174_v33 = vld [vmem:[%s6921_s9 + $0x90] sm:$0xff]  ;;  %v4175_v40 = vld [vmem:[%s6921_s9 + $0x98] sm:$0xff] }
0x2e66   :  { %v6478_v34 = vld [vmem:[%s6920_s8 + $0x1] ss:$0 sm:$0xff]  ;;  %v1319_v35 = vadd.f32 %v1315_v11, %v5695_v18 }
0x2e68   :  { %5530 = vtanh.f32 %v1319_v35 }
0x2e69   :  { %2522 = vrot.lane.b32.xlu1 %v2519_v19, %s5577_s3  ;;  %v6449_v19 = vpack.c.bf16 %v4175_v40, %v4174_v33 }
0x2ed7   :  { %v3020_v41 = vpop.permute.xlu0 %3019  ;;  %v3014_v55 = vpop.permute.xlu1 %3013 }
0x2ed8   :  { %v3022_v61 = vsel %vm50_vm1, %v3006_v25, %v3014_v55  ;;  %v6423_v25 = vpack.c.bf16 %v4169_v51, %v4168_v31  ;;  %v4177_v55 = vld [vmem:[%s6921_s9 + $0xa8] sm:$0xff]  ;;  %v4179_v31 = vld [vmem:[%s6921_s9 + $0xb8] sm:$0xff] }
0x2ed9   :  { %v3023_v9 = vsel %vm2717_vm14, %v3022_v61, %v3020_v41  ;;  %v4176_v41 = vld [vmem:[%s6921_s9 + $0xa0] sm:$0xff] }
0x2eda   :  { %4695 = vmatmul.mubr.msk.f32.vlgmr.msra.gmra.mrb[20].mxu1 %vm2725_vm15, %v3023_v9  ;;  %5101 = vmatpush3.bf16.msra.mxu0 %v6423_v25  ;;  %v6459_v61 = vpack.c.bf16 %v4177_v55, %v4176_v41  ;;  %v4178_v9 = vld [vmem:[%s6921_s9 + $0xb0] sm:$0xff] }
0x2edb   :  { %4748 = vmatprep.mubr.msk.f32.mxu1 %vm5571_vm0, %v6933_v6  ;;  %5102 = vmatprep.subr.bf16.mxu0 %v6931_v3  ;;  %v6469_v51 = vpack.c.bf16 %v4179_v31, %v4178_v9  ;;  %v2523_v21 = vpop.permute.xlu1 %2522 }
0x2edc   :  { %6939 = vst [vmem:[#allocation7_spill] sm:$0xff] %v6459_v61  ;;  %v2527_v33 = vadd.f32 %v2523_v21, %v5695_v18  ;;  %v5531_v21 = vpop.eup %5530 }
0x2edd   :  { %6940 = vst [vmem:[#allocation8_spill] sm:$0xff] %v6469_v51 }
0x2ede   :  { %5104 = vmatpush3.bf16.msra.mxu0 %v6429_v59  ;;  %5532 = vtanh.f32 %v2527_v33 }
0x2edf   :  { %5105 = vmatprep.subr.bf16.mxu0 %v6931_v3 }
0x2ee2   :  { %5107 = vmatpush3.bf16.msra.mxu0 %v6439_v36 }
0x2ee3   :  { %5108 = vmatprep.subr.bf16.mxu0 %v6931_v3 }
0x2ee6   :  { %5110 = vmatpush3.bf16.msra.mxu0 %v6449_v19 }
0x2ee7   :  { %5111 = vmatprep.subr.bf16.mxu0 %v6931_v3 }
0x2eea   :  { %5113 = vmatpush3.bf16.msra.mxu0 %v6459_v61 }
0x2eeb   :  { %5114 = vmatprep.subr.bf16.mxu0 %v6931_v3 }
0x2eee   :  { %5116 = vmatpush3.bf16.msra.mxu0 %v6469_v51 }
0x2eef   :  { %5135 = vmatprep.subr.bf16.mxu0 %v6931_v3 }
0x2fad   :  { %v3099_v40 = vpop.f32.mrb[20].mxu1 }
0x2fae   :  { %v3100_v41 = vadd.f32 %v6478_v34, %v3099_v40  ;;  %v4696_v55 = vpop.f32.mrb[21].mxu1  ;;  %v5533_v40 = vpop.eup %5532 }
0x2faf   :  { %v4141_v55 = vmul.f32 -1.442695, %v2527_v33 }
0x2fb0   :  { %v3103_v9 = vmax.f32 %v3100_v41, 0.0  ;;  %v4118_v41 = vmul.f32 -1.442695, %v1319_v35 }
0x2fb2   :  { %v3105_v31 = vrot.slane %v3103_v9, 7  ;;  %5534 = vpow2.f32 %v4118_v41 }
0x2fb3   :  { %5536 = vpow2.f32 %v4141_v55 }
0x2fb4   :  { %v3107_v60 = vsel %vm2697_vm2, 0.0, %v3105_v31  ;;  %v3108_v3 = vsel %vm2697_vm2, %v3105_v31, 0.0 }
0x2fb5   :  { %v3111_v6 = vrot.slane %v3107_v60, 1  ;;  %v3112_v45 = vrot.slane %v3108_v3, 1  ;;  %v3117_v51 = vrot.slane %v3107_v60, 2  ;;  %v3118_v61 = vrot.slane %v3108_v3, 2 }
0x2fb7   :  { %v3119_v11 = vsel %vm2709_vm3, %v3117_v51, %v3118_v61  ;;  %v3113_v18 = vsel %vm2702_vm9, %v3111_v6, %v3112_v45 }
0x2fb8   :  { %3120 = vrot.lane.b32.xlu1 %v3119_v11, %s5577_s3  ;;  %3114 = vrot.lane.b32.xlu0 %v3113_v18, %s5575_s14 }
0x2fbc   :  { %1346 = vrot.lane.b32.xlu0 %v5531_v21, %s5573_s13  ;;  %2554 = vrot.lane.b32.xlu1 %v5533_v40, %s5573_s13  ;;  %v5535_v9 = vpop.eup %5534  ;;  %v6941_v40 = vmov 0.0  }
0x2fbd   :  { %v5537_v3 = vpop.eup %5536  ;;  %v1327_v31 = vadd.f32 1.0, %v5535_v9  ;;  %v2545_v9 = vrot.slane %v6027_v4, 1 }
0x2fbe   :  { %v2535_v61 = vadd.f32 1.0, %v5537_v3 }
0x2fbf   :  { %5538 = vrcp.f32 %v1327_v31 }
0x2fc0   :  { %5540 = vrcp.f32 %v2535_v61 }
0x2fc9   :  { %v6493_v18 = vpop.eup %5538 }
0x2fca   :  { %v6496_v35 = vpop.eup %5540 }
0x2fcb   :  { %v2549_v31 = vmul.f32 %v6496_v35, %v2545_v9 }
0x302a   :  { %v3115_v6 = vpop.permute.xlu0 %3114  ;;  %v3121_v45 = vpop.permute.xlu1 %3120 }
0x302b   :  { %v3123_v51 = vsel %vm50_vm1, %v3107_v60, %v3115_v6  ;;  %v1337_v60 = vrot.slane %v5862_v30, 7 }
0x302c   :  { %v3124_v11 = vsel %vm2717_vm14, %v3123_v51, %v3121_v45 }
0x302d   :  { %4722 = vmatmul.mubr.msk.f32.vlgmr.msra.gmra.mrb[22].mxu0 %vm2725_vm15, %v3124_v11  ;;  %v1341_v3 = vmul.f32 %v6493_v18, %v1337_v60  ;;  %v4157_v60 = vld [vmem:[%s6919_s7 + $0xd8] sm:$0xff] }
0x302e   :  { %v1347_v33 = vpop.permute.xlu0 %1346  ;;  %v2555_v21 = vpop.permute.xlu1 %2554  ;;  %4775 = vmatprep.mubr.msk.f32.mxu0 %vm5571_vm0, %v6941_v40 }
0x302f   :  { %v1351_v41 = vmul.f32 %v6493_v18, %v1347_v33  ;;  %v2559_v55 = vmul.f32 %v6496_v35, %v2555_v21 }
0x3031   :  { %1356 = vrot.lane.b32.xlu0 %v1351_v41, %s5574_s4  ;;  %2564 = vrot.lane.b32.xlu1 %v2559_v55, %s5574_s4 }
0x30a3   :  { %v1357_v61 = vpop.permute.xlu0 %1356  ;;  %v2565_v6 = vpop.permute.xlu1 %2564 }
0x30a4   :  { %v1361_v45 = vadd.f32 %v1357_v61, %v1341_v3  ;;  %v2569_v51 = vadd.f32 %v2565_v6, %v2549_v31  ;;  %v4158_v3 = vld [vmem:[%s6919_s7 + $0xe0] sm:$0xff]  ;;  %v4159_v31 = vld [vmem:[%s6919_s7 + $0xe8] sm:$0xff]  ;;  %v4160_v6 = vld [vmem:[%s6919_s7 + $0xf0] sm:$0xff] }
0x30a5   :  { %v6575_v61 = vpack.c.bf16 %v4159_v31, %v4158_v3 }
0x30a6   :  { %5542 = vtanh.f32 %v1361_v45  ;;  %v4161_v45 = vld [vmem:[%s6919_s7 + $0xf8] sm:$0xff] }
0x30a7   :  { %5544 = vtanh.f32 %v2569_v51  ;;  %v6585_v51 = vpack.c.bf16 %v4161_v45, %v4160_v6 }
0x30b0   :  { %v5543_v11 = vpop.eup %5542 }
0x30b1   :  { %v5545_v33 = vpop.eup %5544  ;;  %1368 = vrot.lane.b32.xlu0 %v5543_v11, %s5575_s14 }
0x30b2   :  { %2576 = vrot.lane.b32.xlu1 %v5545_v33, %s5575_s14 }
0x30b5   :  { %337 = vrot.lane.b32.xlu0 %v5707_v48, %s5576_s15  ;;  %v6535_v48 = vld [vmem:[%s6922_s10 + $0x1] ss:$0 sm:$0xff] }
0x30b6   :  { %485 = vrot.lane.b32.xlu1 %v5730_v27, %s5576_s15 }
0x30b9   :  { %633 = vrot.lane.b32.xlu0 %v5751_v2, %s5576_s15  ;;  %v4154_v2 = vld [vmem:[%s6919_s7 + $0xc0] sm:$0xff] }
0x30ba   :  { %782 = vrot.lane.b32.xlu1 %v5772_v47, %s5576_s15  ;;  %v4155_v47 = vld [vmem:[%s6919_s7 + $0xc8] sm:$0xff] }
0x30bb   :  { %v6544_v30 = vpack.c.bf16 %v4155_v47, %v4154_v2  ;;  %v4162_v2 = vld [vmem:[%s6919_s7 + $0x100] sm:$0xff]  ;;  %v4163_v47 = vld [vmem:[%s6919_s7 + $0x108] sm:$0xff] }
0x30bd   :  { %931 = vrot.lane.b32.xlu0 %v5793_v32, %s5576_s15  ;;  %5119 = vmatpush3.bf16.msra.mxu1 %v6544_v30 }
0x30be   :  { %1080 = vrot.lane.b32.xlu1 %v5820_v14, %s5576_s15 }
0x30c1   :  { %1229 = vrot.lane.b32.xlu0 %v5878_v44, %s5576_s15 }
0x30c5   :  { %1518 = vrot.lane.b32.xlu0 %v5886_v54, %s5575_s14  ;;  %v6942_v54 = vmov 0.0|0.0  }
0x30c6   :  { %5120 = vmatprep.subr.bf16.mxu1 %v6942_v54 }
0x30c9   :  { %1824 = vrot.lane.b32.xlu0 %v5939_v58, %s5575_s14 }
0x30cd   :  { %2130 = vrot.lane.b32.xlu0 %v5985_v12, %s5575_s14 }
0x30d1   :  { %2435 = vrot.lane.b32.xlu0 %v6037_v39, %s5575_s14 }
0x3100   :  { %v3200_v27 = vpop.f32.mrb[22].mxu0 }
0x3101   :  { %v3201_v32 = vadd.f32 %v6535_v48, %v3200_v27  ;;  %v4723_v14 = vpop.f32.mrb[23].mxu0 }
0x3103   :  { %v6547_v44 = vadd.f32 %v3201_v32, %v6398_v10  ;;  %v4156_v10 = vld [vmem:[%s6919_s7 + $0xd0] sm:$0xff]  ;;  %v6597_v32 = vpack.c.bf16 %v4163_v47, %v4162_v2 }
0x3104   :  { %v6565_v9 = vpack.c.bf16 %v4157_v60, %v4156_v10 }
0x3105   :  { %v3205_v58 = vmax.f32 %v6547_v44, 0.0 }
0x3106   :  { %5122 = vmatpush3.bf16.msra.mxu1 %v6565_v9 }
0x3107   :  { %v3207_v12 = vrot.slane %v3205_v58, 7  ;;  %5123 = vmatprep.subr.bf16.mxu1 %v6942_v54  ;;  %v4164_v58 = vld [vmem:[%s6919_s7 + $0x110] sm:$0xff] }
0x3109   :  { %v6553_v4 = vsel %vm2697_vm2, 0.0, %v3207_v12  ;;  %v3210_v39 = vsel %vm2697_vm2, %v3207_v12, 0.0  ;;  %v4165_v12 = vld [vmem:[%s6919_s7 + $0x118] sm:$0xff] }
0x310a   :  { %v3213_v21 = vrot.slane %v6553_v4, 1  ;;  %v3214_v41 = vrot.slane %v3210_v39, 1  ;;  %5125 = vmatpush3.bf16.msra.mxu1 %v6575_v61  ;;  %v3219_v31 = vrot.slane %v6553_v4, 2  ;;  %v3220_v6 = vrot.slane %v3210_v39, 2 }
0x310b   :  { %5126 = vmatprep.subr.bf16.mxu1 %v6942_v54 }
0x310c   :  { %v3215_v55 = vsel %vm2702_vm9, %v3213_v21, %v3214_v41  ;;  %v6611_v21 = vpack.c.bf16 %v4165_v12, %v4164_v58  ;;  %v3221_v45 = vsel %vm2709_vm3, %v3219_v31, %v3220_v6 }
0x310d   :  { %3216 = vrot.lane.b32.xlu0 %v3215_v55, %s5575_s14 }
0x310e   :  { %5128 = vmatpush3.bf16.msra.mxu1 %v6585_v51 }
0x310f   :  { %5129 = vmatprep.subr.bf16.mxu1 %v6942_v54 }
0x3112   :  { %5131 = vmatpush3.bf16.msra.mxu1 %v6597_v32 }
0x3113   :  { %5132 = vmatprep.subr.bf16.mxu1 %v6942_v54 }
0x3116   :  { %5134 = vmatpush3.bf16.msra.mxu1 %v6611_v21 }
0x3117   :  { %5153 = vmatprep.subr.bf16.mxu1 %v6942_v54 }
0x3123   :  { %v1369_v11 = vpop.permute.xlu0 %1368 }
0x3124   :  { %v1373_v33 = vmul.f32 %v6493_v18, %v1369_v11  ;;  %v2577_v27 = vpop.permute.xlu1 %2576 }
0x3125   :  { %v2581_v3 = vmul.f32 %v6496_v35, %v2577_v27 }
0x3126   :  { %1378 = vrot.lane.b32.xlu1 %v1373_v33, %s5576_s15 }
0x3127   :  { %v338_v14 = vpop.permute.xlu0 %337 }
0x3128   :  { %343 = vst.msk [vmem:[#allocation2 + $0x8] sm:$0x1] %vm341_vm4, %v338_v14  ;;  %v486_v18 = vpop.permute.xlu1 %485  ;;  %vm6943_vm4 = vcmask 255105  }
0x3129   :  { %491 = vst.msk [vmem:[#allocation2 + $0x8] sm:$0x2] %vm489_vm8, %v486_v18  ;;  %vm6947_vm8 = vcmask 258180  }
0x312a   :  { %1671 = vrot.lane.b32.xlu1 %v5916_v56, %s5575_s14 }
0x312b   :  { %v634_v41 = vpop.permute.xlu0 %633 }
0x312c   :  { %639 = vst.msk [vmem:[#allocation2 + $0x8] sm:$0x4] %vm637_vm5, %v634_v41  ;;  %v783_v55 = vpop.permute.xlu1 %782  ;;  %vm6944_vm5 = vcmask 130055  }
0x312d   :  { %788 = vst.msk [vmem:[#allocation2 + $0x8] sm:$0x8] %vm786_vm10, %v783_v55  ;;  %vm6948_vm10 = vcmask 256130  }
0x312e   :  { %1977 = vrot.lane.b32.xlu1 %v5962_v63, %s5575_s14 }
0x312f   :  { %v932_v10 = vpop.permute.xlu0 %931 }
0x3130   :  { %937 = vst.msk [vmem:[#allocation2 + $0x8] sm:$0x10] %vm935_vm6, %v932_v10  ;;  %v1081_v60 = vpop.permute.xlu1 %1080  ;;  %vm6945_vm6 = vcmask 261255  }
0x3131   :  { %1086 = vst.msk [vmem:[#allocation2 + $0x8] sm:$0x20] %vm1084_vm12, %v1081_v60 }
0x3132   :  { %2283 = vrot.lane.b32.xlu1 %v6008_v24, %s5575_s14 }
0x3133   :  { %v1230_v56 = vpop.permute.xlu0 %1229 }
0x3134   :  { %1235 = vst.msk [vmem:[#allocation2 + $0x8] sm:$0x40] %vm1233_vm7, %v1230_v56  ;;  %vm6946_vm7 = vcmask 260230  }
0x3136   :  { %2586 = vrot.lane.b32.xlu1 %v2581_v3, %s5575_s14 }
0x3137   :  { %v1519_v63 = vpop.permute.xlu0 %1518 }
0x313a   :  { %3222 = vrot.lane.b32.xlu1 %v3221_v45, %s5577_s3  ;;  %v4184_v45 = vld [vmem:[%s6921_s9 + $0xe0] sm:$0xff] }
0x313b   :  { %v1825_v11 = vpop.permute.xlu0 %1824 }
0x313c   :  { %1830 = vst.msk [vmem:[#allocation2 + $0x8] sm:$0x20] %vm1828_vm13, %v1825_v11  ;;  %v4185_v11 = vld [vmem:[%s6921_s9 + $0xe8] sm:$0xff] }
0x313f   :  { %v2131_v33 = vpop.permute.xlu0 %2130 }
0x3140   :  { %2136 = vst.msk [vmem:[#allocation2 + $0x8] sm:$0x8] %vm2134_vm11, %v2131_v33  ;;  %vm6949_vm11 = vcmask 254080   ;;  %v6687_v33 = vpack.c.bf16 %v4185_v11, %v4184_v45 }
0x3143   :  { %v2436_v24 = vpop.permute.xlu0 %2435 }
0x3144   :  { %2441 = vst.msk [vmem:[#allocation2 + $0x8] sm:$0x2] %vm6943_vm4, %v2436_v24  ;;  %v4186_v24 = vld [vmem:[%s6921_s9 + $0xf0] sm:$0xff] }
0x317f   :  { %v3217_v14 = vpop.permute.xlu0 %3216 }
0x3180   :  { %v3225_v18 = vsel %vm50_vm1, %v6553_v4, %v3217_v14  ;;  %v4190_v14 = vld [vmem:[%s6921_s9 + $0x110] sm:$0xff] }
0x3198   :  { %v1379_v35 = vpop.permute.xlu1 %1378 }
0x3199   :  { %1384 = vst.msk [vmem:[#allocation2 + $0x8] sm:$0x80] %vm6944_vm5, %v1379_v35  ;;  %v4187_v35 = vld [vmem:[%s6921_s9 + $0xf8] sm:$0xff] }
0x319a   :  { %1524 = vst.msk [vmem:[#allocation2 + $0x8] sm:$0x80] %vm6945_vm6, %v1519_v63 }
0x319c   :  { %v1672_v39 = vpop.permute.xlu1 %1671 }
0x319d   :  { %1677 = vst.msk [vmem:[#allocation2 + $0x8] sm:$0x40] %vm6946_vm7, %v1672_v39  ;;  %v6697_v39 = vpack.c.bf16 %v4187_v35, %v4186_v24 }
0x31a0   :  { %v1978_v27 = vpop.permute.xlu1 %1977 }
0x31a1   :  { %1983 = vst.msk [vmem:[#allocation2 + $0x8] sm:$0x10] %vm6947_vm8, %v1978_v27  ;;  %v4188_v27 = vld [vmem:[%s6921_s9 + $0x100] sm:$0xff] }
0x31a4   :  { %v2284_v2 = vpop.permute.xlu1 %2283 }
0x31a5   :  { %2289 = vst.msk [vmem:[#allocation2 + $0x8] sm:$0x4] %vm6948_vm10, %v2284_v2  ;;  %v4189_v2 = vld [vmem:[%s6921_s9 + $0x108] sm:$0xff] }
0x31a8   :  { %v2587_v47 = vpop.permute.xlu1 %2586 }
0x31a9   :  { %2592 = vst.msk [vmem:[#allocation2 + $0x8] sm:$0x1] %vm6949_vm11, %v2587_v47  ;;  %v6707_v47 = vpack.c.bf16 %v4189_v2, %v4188_v27 }
0x31ac   :  { %v3223_v58 = vpop.permute.xlu1 %3222 }
0x31ad   :  { %v3226_v12 = vsel %vm2717_vm14, %v3225_v18, %v3223_v58  ;;  %v4191_v18 = vld [vmem:[%s6921_s9 + $0x118] sm:$0xff] }
0x31ae   :  { %4749 = vmatmul.mubr.msk.f32.vlgmr.msra.gmra.mrb[22].mxu1 %vm2725_vm15, %v3226_v12  ;;  %v6717_v58 = vpack.c.bf16 %v4191_v18, %v4190_v14 }
0x31af   :  { %5155 = vmatpush3.bf16.msra.mxu1 %v6101_v50  ;;  %4802 = vmatprep.mubr.msk.f32.mxu1 %vm5571_vm0, %v6941_v40 }
0x31b0   :  { %v2594_v41 = vld [vmem:[#allocation2 + $0x8] sm:$0xff]  ;;  %5156 = vmatprep.subr.bf16.mxu1 %v6942_v54 }
0x31b1   :  { %v3409_v55 = vrot.slane %v2594_v41, 7 }
0x31b3   :  { %v3411_v10 = vsel %vm2697_vm2, 0.0, %v3409_v55  ;;  %v3412_v60 = vsel %vm2697_vm2, %v3409_v55, 0.0  ;;  %5158 = vmatpush3.bf16.msra.mxu1 %v6108_v37  ;;  %v4180_v37 = vld [vmem:[%s6921_s9 + $0xc0] sm:$0xff] }
0x31b4   :  { %v3421_v4 = vrot.slane %v3411_v10, 2  ;;  %v3422_v56 = vrot.slane %v3412_v60, 2  ;;  %v3415_v3 = vrot.slane %v3411_v10, 1  ;;  %v3416_v31 = vrot.slane %v3412_v60, 1  ;;  %5159 = vmatprep.subr.bf16.mxu1 %v6942_v54 }
0x31b6   :  { %v3423_v50 = vsel %vm2709_vm3, %v3421_v4, %v3422_v56  ;;  %v3417_v6 = vsel %vm2702_vm9, %v3415_v3, %v3416_v31 }
0x31b7   :  { %3424 = vrot.lane.b32.xlu1 %v3423_v50, %s5577_s3  ;;  %3418 = vrot.lane.b32.xlu0 %v3417_v6, %s5575_s14 }
0x31b8   :  { %5161 = vmatpush3.bf16.msra.mxu1 %v6120_v52  ;;  %v4181_v52 = vld [vmem:[%s6921_s9 + $0xc8] sm:$0xff] }
0x31b9   :  { %5162 = vmatprep.subr.bf16.mxu1 %v6942_v54  ;;  %v6671_v63 = vpack.c.bf16 %v4181_v52, %v4180_v37 }
0x31bb   :  { %5137 = vmatpush3.bf16.msra.mxu0 %v6671_v63 }
0x31bc   :  { %5164 = vmatpush3.bf16.msra.mxu1 %v6132_v15  ;;  %v4182_v15 = vld [vmem:[%s6921_s9 + $0xd0] sm:$0xff]  ;;  %5138 = vmatprep.subr.bf16.mxu0 %v6942_v54 }
0x31bd   :  { %5165 = vmatprep.subr.bf16.mxu1 %v6942_v54 }
0x31c0   :  { %5167 = vmatpush3.bf16.msra.mxu1 %v6144_v29  ;;  %v4183_v29 = vld [vmem:[%s6921_s9 + $0xd8] sm:$0xff] }
0x31c1   :  { %5168 = vmatprep.subr.bf16.mxu1 %v6942_v54 }
0x31c4   :  { %5170 = vmatpush3.bf16.msra.mxu1 %v6155_v38  ;;  %v6677_v38 = vpack.c.bf16 %v4183_v29, %v4182_v15 }
0x31c5   :  { %5189 = vmatprep.subr.bf16.mxu1 %v6942_v54 }
0x31c6   :  { %5140 = vmatpush3.bf16.msra.mxu0 %v6677_v38 }
0x31c7   :  { %5141 = vmatprep.subr.bf16.mxu0 %v6942_v54 }
0x31ca   :  { %5143 = vmatpush3.bf16.msra.mxu0 %v6687_v33 }
0x31cb   :  { %5144 = vmatprep.subr.bf16.mxu0 %v6942_v54 }
0x31ce   :  { %5146 = vmatpush3.bf16.msra.mxu0 %v6697_v39 }
0x31cf   :  { %5147 = vmatprep.subr.bf16.mxu0 %v6942_v54 }
0x31d2   :  { %5149 = vmatpush3.bf16.msra.mxu0 %v6707_v47 }
0x31d3   :  { %5150 = vmatprep.subr.bf16.mxu0 %v6942_v54 }
0x31d6   :  { %5152 = vmatpush3.bf16.msra.mxu0 %v6717_v58 }
0x31d7   :  { %5171 = vmatprep.subr.bf16.mxu0 %v6942_v54 }
0x3229   :  { %v3425_v12 = vpop.permute.xlu1 %3424  ;;  %v3419_v41 = vpop.permute.xlu0 %3418 }
0x322a   :  { %v3427_v55 = vsel %vm50_vm1, %v3411_v10, %v3419_v41 }
0x322b   :  { %v3428_v60 = vsel %vm2717_vm14, %v3427_v55, %v3425_v12 }
0x322c   :  { %4803 = vmatmul.mubr.msk.f32.vlgmr.msra.gmra.mrb[24].mxu1 %vm2725_vm15, %v3428_v60 }
0x322d   :  { %5191 = vmatpush3.bf16.msra.mxu1 %v6263_v13  ;;  %4856 = vmatprep.mubr.msk.f32.mxu1 %vm5571_vm0, %v6941_v40  ;;  %v6742_v13 = vld [vmem:[%s6920_s8 + $0x2] ss:$0 sm:$0xff] }
0x322e   :  { %5192 = vmatprep.subr.bf16.mxu1 %v6942_v54 }
0x3231   :  { %5194 = vmatpush3.bf16.msra.mxu1 %v6269_v42 }
0x3232   :  { %5195 = vmatprep.subr.bf16.mxu1 %v6942_v54 }
0x3235   :  { %5197 = vmatpush3.bf16.msra.mxu1 %v6279_v62 }
0x3236   :  { %5198 = vmatprep.subr.bf16.mxu1 %v6942_v54 }
0x3239   :  { %5200 = vmatpush3.bf16.msra.mxu1 %v6289_v1 }
0x323a   :  { %5201 = vmatprep.subr.bf16.mxu1 %v6942_v54 }
0x323d   :  { %5203 = vmatpush3.bf16.msra.mxu1 %v6299_v20 }
0x323e   :  { %5204 = vmatprep.subr.bf16.mxu1 %v6942_v54 }
0x3241   :  { %5206 = vmatpush3.bf16.msra.mxu1 %v6309_v28 }
0x3242   :  { %5225 = vmatprep.subr.bf16.mxu1 %v6942_v54 }
0x3281   :  { %v3302_v42 = vpop.f32.mrb[22].mxu1 }
0x3282   :  { %v3303_v62 = vadd.f32 %v6742_v13, %v3302_v42  ;;  %v4750_v10 = vpop.f32.mrb[23].mxu1 }
0x3284   :  { %v3306_v1 = vmax.f32 %v3303_v62, 0.0 }
0x3286   :  { %v3308_v4 = vrot.slane %v3306_v1, 7 }
0x3288   :  { %v3310_v56 = vsel %vm2697_vm2, 0.0, %v3308_v4  ;;  %v3311_v20 = vsel %vm2697_vm2, %v3308_v4, 0.0 }
0x3289   :  { %v3314_v3 = vrot.slane %v3310_v56, 1  ;;  %v3315_v31 = vrot.slane %v3311_v20, 1  ;;  %v3320_v28 = vrot.slane %v3310_v56, 2  ;;  %v3321_v50 = vrot.slane %v3311_v20, 2 }
0x328b   :  { %v3322_v6 = vsel %vm2709_vm3, %v3320_v28, %v3321_v50  ;;  %v3316_v37 = vsel %vm2702_vm9, %v3314_v3, %v3315_v31 }
0x328c   :  { %3323 = vrot.lane.b32.xlu1 %v3322_v6, %s5577_s3  ;;  %3317 = vrot.lane.b32.xlu0 %v3316_v37, %s5575_s14 }
0x32fe   :  { %v3324_v52 = vpop.permute.xlu1 %3323  ;;  %v3318_v15 = vpop.permute.xlu0 %3317 }
0x32ff   :  { %v3326_v29 = vsel %vm50_vm1, %v3310_v56, %v3318_v15  ;;  %v3498_v45 = vpop.f32.mrb[24].mxu1 }
0x3300   :  { %v3327_v11 = vsel %vm2717_vm14, %v3326_v29, %v3324_v52  ;;  %v6754_v24 = vadd.f32 %v6237_v53, %v3498_v45  ;;  %v4804_v35 = vpop.f32.mrb[25].mxu1  ;;  %v6950_v52 = vld [vmem:[#allocation7_spill] sm:$0xff] }
0x3301   :  { %4776 = vmatmul.mubr.msk.f32.vlgmr.msra.gmra.mrb[24].mxu0 %vm2725_vm15, %v3327_v11 }
0x3302   :  { %v3502_v27 = vmax.f32 %v6754_v24, 0.0  ;;  %5173 = vmatpush3.bf16.msra.mxu0 %v6183_v57  ;;  %4829 = vmatprep.mubr.msk.f32.mxu0 %vm5571_vm0, %v6941_v40 }
0x3303   :  { %5174 = vmatprep.subr.bf16.mxu0 %v6942_v54 }
0x3304   :  { %v3504_v2 = vrot.slane %v3502_v27, 7 }
0x3306   :  { %v3506_v14 = vsel %vm2697_vm2, 0.0, %v3504_v2  ;;  %v3507_v18 = vsel %vm2697_vm2, %v3504_v2, 0.0  ;;  %5176 = vmatpush3.bf16.msra.mxu0 %v6189_v0 }
0x3307   :  { %v3510_v53 = vrot.slane %v3506_v14, 1  ;;  %v3511_v12 = vrot.slane %v3507_v18, 1  ;;  %v3516_v41 = vrot.slane %v3506_v14, 2  ;;  %v3517_v55 = vrot.slane %v3507_v18, 2  ;;  %5177 = vmatprep.subr.bf16.mxu0 %v6942_v54 }
0x3309   :  { %v3518_v57 = vsel %vm2709_vm3, %v3516_v41, %v3517_v55  ;;  %v3512_v60 = vsel %vm2702_vm9, %v3510_v53, %v3511_v12 }
0x330a   :  { %3519 = vrot.lane.b32.xlu1 %v3518_v57, %s5577_s3  ;;  %3513 = vrot.lane.b32.xlu0 %v3512_v60, %s5575_s14 }
0x330b   :  { %5179 = vmatpush3.bf16.msra.mxu0 %v6199_v49 }
0x330c   :  { %5180 = vmatprep.subr.bf16.mxu0 %v6942_v54 }
0x330f   :  { %5182 = vmatpush3.bf16.msra.mxu0 %v6209_v8  ;;  %v6798_v8 = vld [vmem:[%s6922_s10 + $0x2] ss:$0 sm:$0xff]  ;;  %s5578_s10 = smov [#allocation3]  }
0x3310   :  { %5183 = vmatprep.subr.bf16.mxu0 %v6942_v54  ;;  %s4082_s15 = sshll.u32 %s5578_s10, 4  ;;  %s4083_s15 = int_to_ptr.vmem [resolvable:$true] %s4082_s15 }
0x3311   :  { %p5551_p1 = scmp.lt.s32.totalorder %s4083_s15, %s4083_s15 }
0x3313   :  { %5185 = vmatpush3.bf16.msra.mxu0 %v6219_v16 }
0x3314   :  { %5186 = vmatprep.subr.bf16.mxu0 %v6942_v54 }
0x3317   :  { %5188 = vmatpush3.bf16.msra.mxu0 %v6229_v43 }
0x3318   :  { %5207 = vmatprep.subr.bf16.mxu0 %v6942_v54 }
0x337c   :  { %v3520_v0 = vpop.permute.xlu1 %3519  ;;  %v3514_v42 = vpop.permute.xlu0 %3513 }
0x337d   :  { %v3522_v62 = vsel %vm50_vm1, %v3506_v14, %v3514_v42 }
0x337e   :  { %v3523_v49 = vsel %vm2717_vm14, %v3522_v62, %v3520_v0 }
0x337f   :  { %4830 = vmatmul.mubr.msk.f32.vlgmr.msra.gmra.mrb[26].mxu0 %vm2725_vm15, %v3523_v49 }
0x3380   :  { %5209 = vmatpush3.bf16.msra.mxu0 %v6340_v22  ;;  %4883 = vmatprep.mubr.msk.f32.mxu0 %vm5571_vm0, %v6941_v40 }
0x3381   :  { %5210 = vmatprep.subr.bf16.mxu0 %v6942_v54 }
0x3384   :  { %5212 = vmatpush3.bf16.msra.mxu0 %v6346_v7 }
0x3385   :  { %5213 = vmatprep.subr.bf16.mxu0 %v6942_v54 }
0x3388   :  { %5215 = vmatpush3.bf16.msra.mxu0 %v6356_v17 }
0x3389   :  { %5216 = vmatprep.subr.bf16.mxu0 %v6942_v54 }
0x338c   :  { %5218 = vmatpush3.bf16.msra.mxu0 %v6366_v23 }
0x338d   :  { %5219 = vmatprep.subr.bf16.mxu0 %v6942_v54 }
0x3390   :  { %5221 = vmatpush3.bf16.msra.mxu0 %v6376_v26 }
0x3391   :  { %5222 = vmatprep.subr.bf16.mxu0 %v6942_v54 }
0x3394   :  { %5224 = vmatpush3.bf16.msra.mxu0 %v6386_v46 }
0x3395   :  { %5243 = vmatprep.subr.bf16.mxu0 %v6942_v54 }
0x33d4   :  { %v3403_v16 = vpop.f32.mrb[24].mxu0 }
0x33d5   :  { %v3404_v43 = vadd.f32 %v6798_v8, %v3403_v16  ;;  %v4777_v22 = vpop.f32.mrb[25].mxu0 }
0x33d7   :  { %v3407_v7 = vadd.f32 %v3404_v43, %v6547_v44 }
0x33d9   :  { %4075 = vst.msk [vmem:[#allocation3] sm:$0xff] %vm50_vm1, %v3407_v7 }
0x3452   :  { %v3593_v17 = vpop.f32.mrb[26].mxu0 }
0x3453   :  { %v3594_v23 = vadd.f32 %v6317_v5, %v3593_v17  ;;  %v4831_v26 = vpop.f32.mrb[27].mxu0 }
0x3455   :  { %v3597_v46 = vmax.f32 %v3594_v23, 0.0 }
0x3457   :  { %v3599_v10 = vrot.slane %v3597_v46, 7 }
0x3459   :  { %v3601_v1 = vsel %vm2697_vm2, 0.0, %v3599_v10  ;;  %v3602_v4 = vsel %vm2697_vm2, %v3599_v10, 0.0 }
0x345a   :  { %v3605_v56 = vrot.slane %v3601_v1, 1  ;;  %v3606_v20 = vrot.slane %v3602_v4, 1  ;;  %v3611_v3 = vrot.slane %v3601_v1, 2  ;;  %v3612_v31 = vrot.slane %v3602_v4, 2 }
0x345c   :  { %v3613_v28 = vsel %vm2709_vm3, %v3611_v3, %v3612_v31  ;;  %v3607_v44 = vsel %vm2702_vm9, %v3605_v56, %v3606_v20 }
0x345d   :  { %3614 = vrot.lane.b32.xlu1 %v3613_v28, %s5577_s3  ;;  %3608 = vrot.lane.b32.xlu0 %v3607_v44, %s5575_s14 }
0x34cf   :  { %v3615_v5 = vpop.permute.xlu1 %3614  ;;  %v3609_v50 = vpop.permute.xlu0 %3608 }
0x34d0   :  { %v3617_v6 = vsel %vm50_vm1, %v3601_v1, %v3609_v50 }
0x34d1   :  { %v3618_v37 = vsel %vm2717_vm14, %v3617_v6, %v3615_v5 }
0x34d2   :  { %4857 = vmatmul.mubr.msk.f32.vlgmr.msra.gmra.mrb[26].mxu1 %vm2725_vm15, %v3618_v37 }
0x34d3   :  { %5227 = vmatpush3.bf16.msra.mxu1 %v6423_v25  ;;  %4910 = vmatprep.mubr.msk.f32.mxu1 %vm5571_vm0, %v6941_v40  ;;  %v6951_v25 = vld [vmem:[#allocation8_spill] sm:$0xff] }
0x34d4   :  { %5228 = vmatprep.subr.bf16.mxu1 %v6942_v54 }
0x34d7   :  { %5230 = vmatpush3.bf16.msra.mxu1 %v6429_v59  ;;  %v6952_v59 = vld [vmem:[#allocation6_spill] sm:$0xff] }
0x34d8   :  { %5231 = vmatprep.subr.bf16.mxu1 %v6942_v54 }
0x34db   :  { %5233 = vmatpush3.bf16.msra.mxu1 %v6439_v36 }
0x34dc   :  { %5234 = vmatprep.subr.bf16.mxu1 %v6942_v54 }
0x34df   :  { %5236 = vmatpush3.bf16.msra.mxu1 %v6449_v19 }
0x34e0   :  { %5237 = vmatprep.subr.bf16.mxu1 %v6942_v54 }
0x34e3   :  { %5239 = vmatpush3.bf16.msra.mxu1 %v6950_v52 }
0x34e4   :  { %5240 = vmatprep.subr.bf16.mxu1 %v6942_v54 }
0x34e7   :  { %5242 = vmatpush3.bf16.msra.mxu1 %v6951_v25 }
0x34e8   :  { %5261 = vmatprep.subr.bf16.mxu1 %v6942_v54 }
0x35a5   :  { %v3688_v15 = vpop.f32.mrb[26].mxu1 }
0x35a6   :  { %v3689_v29 = vadd.f32 %v6952_v59, %v3688_v15  ;;  %v4858_v45 = vpop.f32.mrb[27].mxu1 }
0x35a8   :  { %v6829_v36 = vadd.f32 %v3689_v29, %v6754_v24 }
0x35aa   :  { %v3693_v11 = vmax.f32 %v6829_v36, 0.0 }
0x35ac   :  { %v3695_v19 = vrot.slane %v3693_v11, 7 }
0x35ae   :  { %v3697_v35 = vsel %vm2697_vm2, 0.0, %v3695_v19  ;;  %v3698_v27 = vsel %vm2697_vm2, %v3695_v19, 0.0 }
0x35af   :  { %v3707_v2 = vrot.slane %v3697_v35, 2  ;;  %v3708_v14 = vrot.slane %v3698_v27, 2  ;;  %v3701_v18 = vrot.slane %v3697_v35, 1  ;;  %v3702_v53 = vrot.slane %v3698_v27, 1 }
0x35b1   :  { %v3709_v12 = vsel %vm2709_vm3, %v3707_v2, %v3708_v14  ;;  %v3703_v41 = vsel %vm2702_vm9, %v3701_v18, %v3702_v53 }
0x35b2   :  { %3710 = vrot.lane.b32.xlu1 %v3709_v12, %s5577_s3  ;;  %3704 = vrot.lane.b32.xlu0 %v3703_v41, %s5575_s14 }
0x3624   :  { %v3711_v24 = vpop.permute.xlu1 %3710  ;;  %v3705_v55 = vpop.permute.xlu0 %3704 }
0x3625   :  { %v3713_v57 = vsel %vm50_vm1, %v3697_v35, %v3705_v55 }
0x3626   :  { %v3714_v60 = vsel %vm2717_vm14, %v3713_v57, %v3711_v24 }
0x3627   :  { %4884 = vmatmul.mubr.msk.f32.vlgmr.msra.gmra.mrb[28].mxu0 %vm2725_vm15, %v3714_v60 }
0x3628   :  { %5245 = vmatpush3.bf16.msra.mxu0 %v6544_v30  ;;  %4937 = vmatprep.mubr.msk.f32.mxu0 %vm5571_vm0, %v6941_v40 }
0x3629   :  { %5246 = vmatprep.subr.bf16.mxu0 %v6942_v54 }
0x362c   :  { %5248 = vmatpush3.bf16.msra.mxu0 %v6565_v9 }
0x362d   :  { %5249 = vmatprep.subr.bf16.mxu0 %v6942_v54 }
0x3630   :  { %5251 = vmatpush3.bf16.msra.mxu0 %v6575_v61 }
0x3631   :  { %5252 = vmatprep.subr.bf16.mxu0 %v6942_v54 }
0x3634   :  { %5254 = vmatpush3.bf16.msra.mxu0 %v6585_v51 }
0x3635   :  { %5255 = vmatprep.subr.bf16.mxu0 %v6942_v54 }
0x3638   :  { %5257 = vmatpush3.bf16.msra.mxu0 %v6597_v32 }
0x3639   :  { %5258 = vmatprep.subr.bf16.mxu0 %v6942_v54 }
0x363c   :  { %5260 = vmatpush3.bf16.msra.mxu0 %v6611_v21 }
0x36fa   :  { %v3784_v30 = vpop.f32.mrb[28].mxu0 }
0x36fb   :  { %v3785_v0 = vadd.f32 %v6478_v34, %v3784_v30  ;;  %v4885_v9 = vpop.f32.mrb[29].mxu0 }
0x36fd   :  { %v3788_v42 = vmax.f32 %v3785_v0, 0.0 }
0x36ff   :  { %v3790_v62 = vrot.slane %v3788_v42, 7 }
0x3701   :  { %v3792_v61 = vsel %vm2697_vm2, 0.0, %v3790_v62  ;;  %v3793_v49 = vsel %vm2697_vm2, %v3790_v62, 0.0 }
0x3702   :  { %v3796_v16 = vrot.slane %v3792_v61, 1  ;;  %v3797_v51 = vrot.slane %v3793_v49, 1  ;;  %v3802_v43 = vrot.slane %v3792_v61, 2  ;;  %v3803_v22 = vrot.slane %v3793_v49, 2 }
0x3704   :  { %v3804_v32 = vsel %vm2709_vm3, %v3802_v43, %v3803_v22  ;;  %v3798_v7 = vsel %vm2702_vm9, %v3796_v16, %v3797_v51 }
0x3705   :  { %3805 = vrot.lane.b32.xlu1 %v3804_v32, %s5577_s3  ;;  %3799 = vrot.lane.b32.xlu0 %v3798_v7, %s5575_s14 }
0x3777   :  { %v3806_v34 = vpop.permute.xlu1 %3805  ;;  %v3800_v21 = vpop.permute.xlu0 %3799 }
0x3778   :  { %v3808_v17 = vsel %vm50_vm1, %v3792_v61, %v3800_v21 }
0x3779   :  { %v3809_v23 = vsel %vm2717_vm14, %v3808_v17, %v3806_v34 }
0x377a   :  { %4911 = vmatmul.mubr.msk.f32.vlgmr.msra.gmra.mrb[28].mxu1 %vm2725_vm15, %v3809_v23 }
0x377b   :  { %5263 = vmatpush3.bf16.msra.mxu1 %v6671_v63  ;;  %4964 = vmatprep.mubr.msk.f32.mxu1 %vm5571_vm0, %v6941_v40 }
0x377c   :  { %5264 = vmatprep.subr.bf16.mxu1 %v6942_v54 }
0x377f   :  { %5266 = vmatpush3.bf16.msra.mxu1 %v6677_v38 }
0x3780   :  { %5267 = vmatprep.subr.bf16.mxu1 %v6942_v54 }
0x3783   :  { %5269 = vmatpush3.bf16.msra.mxu1 %v6687_v33 }
0x3784   :  { %5270 = vmatprep.subr.bf16.mxu1 %v6942_v54 }
0x3787   :  { %5272 = vmatpush3.bf16.msra.mxu1 %v6697_v39 }
0x3788   :  { %5273 = vmatprep.subr.bf16.mxu1 %v6942_v54 }
0x378b   :  { %5275 = vmatpush3.bf16.msra.mxu1 %v6707_v47 }
0x378c   :  { %5276 = vmatprep.subr.bf16.mxu1 %v6942_v54 }
0x378f   :  { %5278 = vmatpush3.bf16.msra.mxu1 %v6717_v58 }
0x384d   :  { %v3879_v40 = vpop.f32.mrb[28].mxu1 }
0x384e   :  { %v3880_v63 = vadd.f32 %v6535_v48, %v3879_v40  ;;  %v4912_v38 = vpop.f32.mrb[29].mxu1 }
0x3850   :  { %v3883_v26 = vadd.f32 %v3880_v63, %v6829_v36 }
0x3852   :  { %v3884_v46 = vmax.f32 %v3883_v26, 0.0 }
0x3854   :  { %v3886_v33 = vrot.slane %v3884_v46, 7 }
0x3856   :  { %v3888_v10 = vsel %vm2697_vm2, 0.0, %v3886_v33  ;;  %v3889_v39 = vsel %vm2697_vm2, %v3886_v33, 0.0 }
0x3857   :  { %v3898_v1 = vrot.slane %v3888_v10, 2  ;;  %v3899_v4 = vrot.slane %v3889_v39, 2  ;;  %v3892_v56 = vrot.slane %v3888_v10, 1  ;;  %v3893_v47 = vrot.slane %v3889_v39, 1 }
0x3859   :  { %v3900_v54 = vsel %vm2709_vm3, %v3898_v1, %v3899_v4  ;;  %v3894_v58 = vsel %vm2702_vm9, %v3892_v56, %v3893_v47 }
0x385a   :  { %3901 = vrot.lane.b32.xlu1 %v3900_v54, %s5577_s3  ;;  %3895 = vrot.lane.b32.xlu0 %v3894_v58, %s5575_s14 }
0x38cc   :  { %v3902_v48 = vpop.permute.xlu1 %3901  ;;  %v3896_v20 = vpop.permute.xlu0 %3895 }
0x38cd   :  { %v3904_v3 = vsel %vm50_vm1, %v3888_v10, %v3896_v20 }
0x38ce   :  { %v3905_v31 = vsel %vm2717_vm14, %v3904_v3, %v3902_v48 }
0x38cf   :  { %4938 = vmatmul.mubr.msk.f32.vlgmr.msra.gmra.mrb[30].mxu0 %vm2725_vm15, %v3905_v31 }
0x39a2   :  { %v3975_v28 = vpop.f32.mrb[30].mxu0 }
0x39a3   :  { %v3976_v44 = vadd.f32 %v6742_v13, %v3975_v28  ;;  %v4939_v5 = vpop.f32.mrb[31].mxu0 }
0x39a5   :  { %v3979_v50 = vmax.f32 %v3976_v44, 0.0 }
0x39a7   :  { %v3981_v6 = vrot.slane %v3979_v50, 7 }
0x39a9   :  { %v3983_v37 = vsel %vm2697_vm2, 0.0, %v3981_v6  ;;  %v3984_v52 = vsel %vm2697_vm2, %v3981_v6, 0.0 }
0x39aa   :  { %v3987_v25 = vrot.slane %v3983_v37, 1  ;;  %v3988_v15 = vrot.slane %v3984_v52, 1  ;;  %v3993_v59 = vrot.slane %v3983_v37, 2  ;;  %v3994_v29 = vrot.slane %v3984_v52, 2 }
0x39ac   :  { %v3995_v45 = vsel %vm2709_vm3, %v3993_v59, %v3994_v29  ;;  %v3989_v36 = vsel %vm2702_vm9, %v3987_v25, %v3988_v15 }
0x39ad   :  { %3996 = vrot.lane.b32.xlu1 %v3995_v45, %s5577_s3  ;;  %3990 = vrot.lane.b32.xlu0 %v3989_v36, %s5575_s14  ;;  %s5546_s3 = scalar_lea.vmem %s4083_s15, 256 }
0x39ae   :  { %p5547_p0 = scmp.ne.s32.totalorder %s4083_s15, %s5546_s3  ;;  %p5552_p2 = scmp.lt.s32.totalorder %s5546_s3, %s5546_s3 }
0x39b0   :  { %p5553_p3 = por %p5552_p2, %p5551_p1 }
0x39b2   :  { %p5554_p4 = pnand %p5553_p3, %p5547_p0 }
0x3a1f   :  { %v3997_v13 = vpop.permute.xlu1 %3996  ;;  %v3991_v11 = vpop.permute.xlu0 %3990 }
0x3a20   :  { %v3999_v19 = vsel %vm50_vm1, %v3983_v37, %v3991_v11 }
0x3a21   :  { %v4000_v35 = vsel %vm2717_vm14, %v3999_v19, %v3997_v13 }
0x3a22   :  { %4965 = vmatmul.mubr.msk.f32.vlgmr.msra.gmra.mrb[30].mxu1 %vm2725_vm15, %v4000_v35 }
0x3af5   :  { %v4070_v27 = vpop.f32.mrb[30].mxu1 }
0x3af6   :  { %v4071_v2 = vadd.f32 %v6798_v8, %v4070_v27  ;;  %v4966_v14 = vpop.f32.mrb[31].mxu1 }
0x3af8   :  { %v4074_v18 = vadd.f32 %v4071_v2, %v3883_v26 }
0x3afa   :  { %4076 = vst.msk [vmem:[#allocation3 + $0x8] sm:$0xff] %vm50_vm1, %v4074_v18 }
0x3afb   :  { %5557 = shalt.err (!%p5554_p4)
}
0x3afc   :  { %s5558_s26 = scalar_lea.hbm %s6923_s11, 256 }
0x3afd   :  { %p5559_p5 = scmp.ne.s32.totalorder %s6923_s11, %s5558_s26  ;;  %p5562_p6 = scmp.lt.u32.totalorder %s5558_s26, %s6923_s11 }
0x3aff   :  { %p5564_p7 = pnand %p5562_p6, %p5559_p5 }
0x3b01   :  { %5567 = shalt.err (!%p5564_p7)
}
0x3b02   :  { %s5579_s29 = smov 128   ;;  %s5580_s30 = smov 8  }
0x3b03   :  { %4088 = dma.vmem_to_hbm [thread:$0]  %s4083_s15, 256, %s6923_s11, [#allocation4], %s5579_s29, %s5579_s29, %s5580_s30  }
0x3b04   :  { %5568 = dma.done.wait [#allocation4], 256  }
0x3b05   :  { %5569 = vsyncadd [#allocation4], 4294967040 }
0x3b06   :  { %4092 = vsyncpa [#allocation4], 1 }

</bundles_post_ra>
